<compile_context>
chip_gen: v5e
topology: v5e:2x2
jax: 0.10.0
libtpu: 0.0.40
codegen_flags: <defaults>
</compile_context>

<pallas_src>
import functools

import jax
import jax.numpy as jnp
import numpy as np
from jax import lax
from jax.experimental import pallas as pl
from jax.experimental.pallas import tpu as pltpu

_BN_EPS = 1e-5


def _round_up(x, m):
    return (x + m - 1) // m * m


def _pick_block(total, cap, gran):
    """Largest multiple of `gran` that divides `total` and is <= cap.

    Callers guarantee `total` is a multiple of `gran`, so the loop terminates.
    """
    b = max(gran, min(cap, total) // gran * gran)
    while total % b:
        b -= gran
    return b


def _vmem_limit_bytes():
    """Generation-aware scoped-VMEM budget (~40 MiB v7x, ~100 MiB v5e/v6e)."""
    try:
        cap = int(pltpu.get_tpu_info().vmem_capacity_bytes)
    except Exception:                                    # pragma: no cover
        return 48 * 1024 * 1024
    return max(32 * 1024 * 1024,
               min(100 * 1024 * 1024, cap - 24 * 1024 * 1024))


_VMEM_LIMIT = _vmem_limit_bytes()


# ---------------------------------------------------------------------------
# Pallas kernels
# ---------------------------------------------------------------------------
def _mm_affine_kernel(*refs, relu, has_x2, use_acc):
    """maybe_relu(((x [+ x2]) @ w) * scale + bias), K-axis on grid axis 2."""
    if use_acc:
        acc_ref = refs[-1]
        refs = refs[:-1]
    if has_x2:
        x_ref, x2_ref, w_ref, s_ref, b_ref, o_ref = refs
    else:
        x_ref, w_ref, s_ref, b_ref, o_ref = refs
        x2_ref = None

    x = x_ref[...]
    if x2_ref is not None:
        x = x + x2_ref[...]                      # fused residual add (VALU slot)
    prod = jnp.dot(x, w_ref[...], preferred_element_type=jnp.float32)

    def _affine(acc):
        y = acc * s_ref[...] + b_ref[...]
        if relu:
            y = jnp.maximum(y, 0.0)
        o_ref[...] = y.astype(o_ref.dtype)

    if not use_acc:                               # single K step: no scratch copy
        _affine(prod)
    else:
        @pl.when(pl.program_id(2) == 0)
        def _():
            acc_ref[...] = jnp.zeros_like(acc_ref)

        acc_ref[...] += prod

        @pl.when(pl.program_id(2) == pl.num_programs(2) - 1)
        def _():
            _affine(acc_ref[...])


def _pam_flash_kernel(q_ref, k_ref, v_ref, x_ref, o_ref, m_sc, l_sc, acc_sc,
                      *, n_valid, needs_mask, c_out):
    """Flash position attention: online softmax over key tiles (grid axis 2)."""
    ki = pl.program_id(2)

    @pl.when(ki == 0)
    def _():
        m_sc[...] = jnp.full_like(m_sc, -jnp.inf)
        l_sc[...] = jnp.zeros_like(l_sc)
        acc_sc[...] = jnp.zeros_like(acc_sc)

    q = q_ref[0]                                              # (Tq, Cq_pad) bf16
    k = k_ref[0]                                              # (Tk, Cq_pad) bf16
    s = lax.dot_general(q, k, (((1,), (1,)), ((), ())),
                        preferred_element_type=jnp.float32)   # (Tq, Tk)
    if needs_mask:
        col = ki * k.shape[0] + lax.broadcasted_iota(jnp.int32, s.shape, 1)
        s = jnp.where(col < n_valid, s, -1e30)

    m_prev = m_sc[...]
    m_new = jnp.maximum(m_prev, jnp.max(s, axis=-1, keepdims=True))
    alpha = jnp.exp(m_prev - m_new)
    p = jnp.exp(s - m_new)
    l_sc[...] = alpha * l_sc[...] + jnp.sum(p, axis=-1, keepdims=True)
    acc_sc[...] = alpha * acc_sc[...] + jnp.dot(
        p.astype(jnp.bfloat16), v_ref[0], preferred_element_type=jnp.float32)
    m_sc[...] = m_new

    @pl.when(ki == pl.num_programs(2) - 1)
    def _():
        # v was pre-scaled by gamma in the fused projection, so out = attn@v + x.
        out = acc_sc[...] * pl.reciprocal(l_sc[...])
        o_ref[0] = (out[:, :c_out] + x_ref[0].astype(jnp.float32)).astype(o_ref.dtype)


def _cam_attn_kernel(x_ref, attn_ref, e_sc):
    """CAM pass 1: accumulate (C,C) energy over N tiles, softmax on last tile."""
    ni = pl.program_id(1)

    @pl.when(ni == 0)
    def _():
        e_sc[...] = jnp.zeros_like(e_sc)

    x = x_ref[0]                                              # (Tn, C) bf16
    e_sc[...] += lax.dot_general(x, x, (((0,), (0,)), ((), ())),
                                 preferred_element_type=jnp.float32)   # (C, C)

    @pl.when(ni == pl.num_programs(1) - 1)
    def _():
        energy = e_sc[...]
        energy_new = jnp.max(energy, axis=-1, keepdims=True) - energy
        p = jnp.exp(energy_new - jnp.max(energy_new, axis=-1, keepdims=True))
        attn = p * pl.reciprocal(jnp.sum(p, axis=-1, keepdims=True))
        attn_ref[0] = attn.astype(attn_ref.dtype)


def _cam_apply_kernel(attn_ref, x_ref, o_ref):
    """CAM pass 2 (per N tile): out = x @ (gamma*attn)^T + x  (spatial-major)."""
    x = x_ref[0]                                              # (Tn, C) bf16
    out = lax.dot_general(x, attn_ref[0], (((1,), (1,)), ((), ())),
                          preferred_element_type=jnp.float32)  # (Tn, C)
    o_ref[0] = (out + x.astype(jnp.float32)).astype(o_ref.dtype)


# ---------------------------------------------------------------------------
# Pallas wrappers
# ---------------------------------------------------------------------------
def matmul_affine(x, w, scale, bias, *, relu, out_dtype=jnp.float32,
                  x2=None, keep_padded_cols=False):
    """out = maybe_relu(((x [+x2]) @ w) * scale + bias); M/N/K tiled, bf16 MXU."""
    M, K = x.shape
    Kw, N = w.shape
    assert K == Kw, (K, Kw)

    K_pad = _round_up(K, 128)
    N_pad = _round_up(N, 128)
    block_m = min(512, _round_up(M, 8))
    if M % block_m and M % 8 == 0:
        bm = _pick_block(M, 512, 8)
        if bm >= 128:                      # clean divisor avoids a masked tail tile
            block_m = bm
    block_k = _pick_block(K_pad, 512, 128)
    block_n = _pick_block(N_pad, 512, 128)
    grid_k = K_pad // block_k
    use_acc = grid_k > 1

    def _prep(a):
        a = a.astype(jnp.bfloat16)
        if K_pad != K:
            a = jnp.pad(a, ((0, 0), (0, K_pad - K)))
        return a

    ops = [_prep(x)]
    if x2 is not None:
        ops.append(_prep(x2))
    wb = jnp.pad(w.astype(jnp.bfloat16), ((0, K_pad - K), (0, N_pad - N)))
    s = jnp.pad(scale.astype(jnp.float32).reshape(1, N), ((0, 0), (0, N_pad - N)))
    b = jnp.pad(bias.astype(jnp.float32).reshape(1, N), ((0, 0), (0, N_pad - N)))

    x_spec = pl.BlockSpec((block_m, block_k), lambda i, j, k: (i, k))
    in_specs = [x_spec] + ([x_spec] if x2 is not None else []) + [
        pl.BlockSpec((block_k, block_n), lambda i, j, k: (k, j)),
        pl.BlockSpec((1, block_n), lambda i, j, k: (0, j)),
        pl.BlockSpec((1, block_n), lambda i, j, k: (0, j)),
    ]
    out = pl.pallas_call(
        functools.partial(_mm_affine_kernel, relu=relu,
                          has_x2=x2 is not None, use_acc=use_acc),
        out_shape=jax.ShapeDtypeStruct((M, N_pad), out_dtype),
        grid_spec=pltpu.PrefetchScalarGridSpec(
            num_scalar_prefetch=0,
            grid=(pl.cdiv(M, block_m), N_pad // block_n, grid_k),
            in_specs=in_specs,
            out_specs=pl.BlockSpec((block_m, block_n), lambda i, j, k: (i, j)),
            scratch_shapes=([pltpu.VMEM((block_m, block_n), jnp.float32)]
                            if use_acc else []),
        ),
        compiler_params=pltpu.CompilerParams(
            dimension_semantics=("parallel", "parallel", "arbitrary"),
            vmem_limit_bytes=_VMEM_LIMIT),
    )(*ops, wb, s, b)
    if not keep_padded_cols and N_pad != N:
        out = out[:, :N]
    return out


def pam_module(qkv_flat, x_flat, *, batch, n, c, cq_pad, cv_pad):
    """Flash PAM. qkv_flat: (B*N, cv_pad + 2*cq_pad) bf16 laid out as [v | q | k]."""
    ctot = qkv_flat.shape[-1]
    t = min(256, _round_up(n, 8))
    n_pad = _round_up(n, t)
    needs_mask = n_pad != n

    qkv = qkv_flat.reshape(batch, n, ctot)
    x = x_flat.reshape(batch, n, c)
    if needs_mask:
        qkv = jnp.pad(qkv, ((0, 0), (0, n_pad - n), (0, 0)))
        x = jnp.pad(x, ((0, 0), (0, n_pad - n), (0, 0)))

    assert cv_pad % cq_pad == 0
    q_blk = cv_pad // cq_pad
    k_blk = q_blk + 1

    out = pl.pallas_call(
        functools.partial(_pam_flash_kernel, n_valid=n,
                          needs_mask=needs_mask, c_out=c),
        out_shape=jax.ShapeDtypeStruct((batch, n_pad, c), jnp.bfloat16),
        grid_spec=pltpu.PrefetchScalarGridSpec(
            num_scalar_prefetch=0,
            grid=(batch, n_pad // t, n_pad // t),
            in_specs=[
                pl.BlockSpec((1, t, cq_pad), lambda b, qi, ki: (b, qi, q_blk)),
                pl.BlockSpec((1, t, cq_pad), lambda b, qi, ki: (b, ki, k_blk)),
                pl.BlockSpec((1, t, cv_pad), lambda b, qi, ki: (b, ki, 0)),
                pl.BlockSpec((1, t, c), lambda b, qi, ki: (b, qi, 0)),
            ],
            out_specs=pl.BlockSpec((1, t, c), lambda b, qi, ki: (b, qi, 0)),
            scratch_shapes=[
                pltpu.VMEM((t, 1), jnp.float32),        # running max
                pltpu.VMEM((t, 1), jnp.float32),        # running denominator
                pltpu.VMEM((t, cv_pad), jnp.float32),   # output accumulator
            ],
        ),
        compiler_params=pltpu.CompilerParams(
            dimension_semantics=("parallel", "parallel", "arbitrary"),
            vmem_limit_bytes=_VMEM_LIMIT),
    )(qkv, qkv, qkv, x)
    if needs_mask:
        out = out[:, :n]
    return out                                              # (B, N, C) bf16


def cam_module(x_flat, gamma, *, batch, n, c):
    """Channel attention, spatial-major (N, C), two-pass N-tiled."""
    t = min(512, _round_up(n, 8))
    n_pad = _round_up(n, t)
    x = x_flat.reshape(batch, n, c)
    if n_pad != n:
        x = jnp.pad(x, ((0, 0), (0, n_pad - n), (0, 0)))    # zero rows add 0 energy
    n_tiles = n_pad // t

    attn = pl.pallas_call(
        _cam_attn_kernel,
        out_shape=jax.ShapeDtypeStruct((batch, c, c), jnp.float32),
        grid_spec=pltpu.PrefetchScalarGridSpec(
            num_scalar_prefetch=0,
            grid=(batch, n_tiles),
            in_specs=[pl.BlockSpec((1, t, c), lambda b, ni: (b, ni, 0))],
            out_specs=pl.BlockSpec((1, c, c), lambda b, ni: (b, 0, 0)),
            scratch_shapes=[pltpu.VMEM((c, c), jnp.float32)],
        ),
        compiler_params=pltpu.CompilerParams(
            dimension_semantics=("parallel", "arbitrary"),
            vmem_limit_bytes=_VMEM_LIMIT),
    )(x)

    # Fold gamma into the (tiny) attention matrix so the apply kernel is scalar-free.
    attn = (attn * gamma).astype(jnp.bfloat16)

    out = pl.pallas_call(
        _cam_apply_kernel,
        out_shape=jax.ShapeDtypeStruct((batch, n_pad, c), jnp.bfloat16),
        grid_spec=pltpu.PrefetchScalarGridSpec(
            num_scalar_prefetch=0,
            grid=(batch, n_tiles),
            in_specs=[
                pl.BlockSpec((1, c, c), lambda b, ni: (b, 0, 0)),
                pl.BlockSpec((1, t, c), lambda b, ni: (b, ni, 0)),
            ],
            out_specs=pl.BlockSpec((1, t, c), lambda b, ni: (b, ni, 0)),
        ),
        compiler_params=pltpu.CompilerParams(
            dimension_semantics=("parallel", "parallel"),
            vmem_limit_bytes=_VMEM_LIMIT),
    )(attn, x)
    if n_pad != n:
        out = out[:, :n]
    return out                                              # (B, N, C) bf16


# ---------------------------------------------------------------------------
# Glue (im2col, weight reshapes, BN folding) in plain JAX
# ---------------------------------------------------------------------------
def _im2col_3x3(x_nhwc):
    # TODO(synk): replace with an in-kernel 9-tap conv to avoid the 9x HBM slab.
    B, H, W, C = x_nhwc.shape
    xp = jnp.pad(x_nhwc, ((0, 0), (1, 1), (1, 1), (0, 0)))
    cols = [xp[:, dy:dy + H, dx:dx + W, :] for dy in range(3) for dx in range(3)]
    return jnp.concatenate(cols, axis=-1).reshape(B * H * W, 9 * C)


def _w3x3_to_mat(w_oihw):
    Co = w_oihw.shape[0]
    return jnp.transpose(w_oihw, (2, 3, 1, 0)).reshape(-1, Co)         # (9*Ci, Co)


def _bn_scale_bias(bn):
    gamma, beta, mean, var = bn
    s = gamma / jnp.sqrt(var + _BN_EPS)
    return s.astype(jnp.float32), (beta - mean * s).astype(jnp.float32)


def _conv3x3_bn_relu(x_nhwc, w_oihw, bn):
    """Returns flattened (B*H*W, Co) bf16."""
    patches = _im2col_3x3(x_nhwc.astype(jnp.bfloat16))
    s, b = _bn_scale_bias(bn)
    return matmul_affine(patches, _w3x3_to_mat(w_oihw), s, b, relu=True,
                         out_dtype=jnp.bfloat16)


def _conv3x3_bn_relu_pair(x_nhwc, w1, bn1, w2, bn2):
    """conv5a and conv5c share one im2col(x) pass: a single lane-dense matmul."""
    Co1, Co2 = w1.shape[0], w2.shape[0]
    patches = _im2col_3x3(x_nhwc.astype(jnp.bfloat16))
    s1, b1 = _bn_scale_bias(bn1)
    s2, b2 = _bn_scale_bias(bn2)
    w = jnp.concatenate([_w3x3_to_mat(w1), _w3x3_to_mat(w2)], axis=1)
    y = matmul_affine(patches, w, jnp.concatenate([s1, s2]),
                      jnp.concatenate([b1, b2]), relu=True,
                      out_dtype=jnp.bfloat16)
    # TODO(synk): a multi-output pallas_call would avoid these two column slices.
    return y[:, :Co1], y[:, Co1:Co1 + Co2]                  # flattened (B*H*W, Co)


# ---------------------------------------------------------------------------
# DANetHead forward (Pallas-backed)
# ---------------------------------------------------------------------------
def danet_head_forward(x_nchw, params):
    B, _, H, W = x_nchw.shape
    N = H * W
    inter = params["conv5a_w"].shape[0]
    qk_c = params["pam_wq"].shape[0]
    cq_pad = _round_up(qk_c, 128)
    cv_pad = _round_up(inter, 128)

    x = jnp.transpose(x_nchw, (0, 2, 3, 1)).astype(jnp.bfloat16)       # NHWC bf16

    # ---- shared stem: conv5a & conv5c fused over one im2col(x) pass ----
    feat1, feat2 = _conv3x3_bn_relu_pair(
        x, params["conv5a_w"], params["bn5a"], params["conv5c_w"], params["bn5c"])

    # ---- position-attention branch: fused [v|q|k] projection -> flash PAM ----
    gamma_p = jnp.asarray(params["pam_gamma"], jnp.float32)
    wv = jnp.pad(params["pam_wv"].reshape(inter, inter).T,
                 ((0, 0), (0, cv_pad - inter)))
    wq = jnp.pad(params["pam_wq"].reshape(qk_c, inter).T,
                 ((0, 0), (0, cq_pad - qk_c)))
    wk = jnp.pad(params["pam_wk"].reshape(qk_c, inter).T,
                 ((0, 0), (0, cq_pad - qk_c)))
    w_vqk = jnp.concatenate([wv, wq, wk], axis=1)
    # gamma is folded into the v-projection affine: out = attn @ (gamma*v) + x.
    s_vqk = jnp.concatenate([jnp.full((cv_pad,), 1.0, jnp.float32) * gamma_p,
                             jnp.ones((2 * cq_pad,), jnp.float32)])
    b_vqk = jnp.concatenate([
        jnp.pad(params["pam_bv"].astype(jnp.float32), (0, cv_pad - inter)) * gamma_p,
        jnp.pad(params["pam_bq"].astype(jnp.float32), (0, cq_pad - qk_c)),
        jnp.pad(params["pam_bk"].astype(jnp.float32), (0, cq_pad - qk_c))])
    qkv = matmul_affine(feat1, w_vqk, s_vqk, b_vqk, relu=False,
                        out_dtype=jnp.bfloat16, keep_padded_cols=True)
    sa_feat = pam_module(qkv, feat1, batch=B, n=N, c=inter,
                         cq_pad=cq_pad, cv_pad=cv_pad)
    sa_conv = _conv3x3_bn_relu(sa_feat.reshape(B, H, W, inter),
                               params["conv51_w"], params["bn51"])

    # ---- channel-attention branch: spatial-major CAM (no transposes) ----
    sc_feat = cam_module(feat2, jnp.asarray(params["cam_gamma"], jnp.float32),
                         batch=B, n=N, c=inter)
    sc_conv = _conv3x3_bn_relu(sc_feat.reshape(B, H, W, inter),
                               params["conv52_w"], params["bn52"])

    # ---- conv8: the sa_conv + sc_conv add is fused into the matmul ----
    # (Dropout2d(0.1) is the identity in eval mode.)
    Co = params["conv8_w"].shape[0]
    w8 = params["conv8_w"].reshape(Co, inter).T
    out = matmul_affine(sa_conv, w8, jnp.ones((Co,), jnp.float32),
                        params["conv8_b"], relu=False, x2=sc_conv,
                        out_dtype=jnp.float32)
    return jnp.transpose(out.reshape(B, H, W, Co), (0, 3, 1, 2))        # NCHW


# ---------------------------------------------------------------------------
# Pure-JAX reference (mirrors the PyTorch forward exactly, f32)
# ---------------------------------------------------------------------------
def reference_forward(x_nchw, params):
    def conv3x3_bn_relu(inp, w, bn):
        y = lax.conv_general_dilated(inp, w, (1, 1), ((1, 1), (1, 1)),
                                     dimension_numbers=("NCHW", "OIHW", "NCHW"))
        s, b = _bn_scale_bias(bn)
        return jnp.maximum(y * s.reshape(1, -1, 1, 1) + b.reshape(1, -1, 1, 1), 0.0)

    def conv1x1(inp, w, b):
        y = lax.conv_general_dilated(inp, w, (1, 1), "VALID",
                                     dimension_numbers=("NCHW", "OIHW", "NCHW"))
        return y + b.reshape(1, -1, 1, 1)

    B, _, H, W = x_nchw.shape
    Np = H * W

    feat1 = conv3x3_bn_relu(x_nchw, params["conv5a_w"], params["bn5a"])
    q = conv1x1(feat1, params["pam_wq"], params["pam_bq"]).reshape(B, -1, Np)
    k = conv1x1(feat1, params["pam_wk"], params["pam_bk"]).reshape(B, -1, Np)
    v = conv1x1(feat1, params["pam_wv"], params["pam_bv"]).reshape(B, -1, Np)
    energy = jnp.einsum("bcn,bcm->bnm", q, k)
    attn = jax.nn.softmax(energy, axis=-1)
    out = jnp.einsum("bcm,bnm->bcn", v, attn).reshape(B, -1, H, W)
    sa_feat = params["pam_gamma"] * out + feat1
    sa_conv = conv3x3_bn_relu(sa_feat, params["conv51_w"], params["bn51"])

    feat2 = conv3x3_bn_relu(x_nchw, params["conv5c_w"], params["bn5c"])
    xf = feat2.reshape(B, -1, Np)
    energy = jnp.einsum("bcn,bdn->bcd", xf, xf)
    energy_new = jnp.max(energy, axis=-1, keepdims=True) - energy
    attn = jax.nn.softmax(energy_new, axis=-1)
    out = jnp.einsum("bcd,bdn->bcn", attn, xf).reshape(B, -1, H, W)
    sc_feat = params["cam_gamma"] * out + feat2
    sc_conv = conv3x3_bn_relu(sc_feat, params["conv52_w"], params["bn52"])

    feat_sum = sa_conv + sc_conv
    return conv1x1(feat_sum, params["conv8_w"], params["conv8_b"])


# ---------------------------------------------------------------------------
if __name__ == "__main__":
    B, Cin, H, W = 2, 64, 8, 8
    Cout = 16
    inter = Cin // 4          # 16
    qk = max(1, inter // 8)   # 2

    key = jax.random.PRNGKey(0)
    ks = jax.random.split(key, 17)

    def bn_params(c, k):
        k1, k2, k3, k4 = jax.random.split(k, 4)
        return (1.0 + 0.1 * jax.random.normal(k1, (c,), jnp.float32),   # gamma
                0.1 * jax.random.normal(k2, (c,), jnp.float32),          # beta
                0.1 * jax.random.normal(k3, (c,), jnp.float32),          # running mean
                1.0 + 0.5 * jax.random.uniform(k4, (c,), jnp.float32))   # running var

    params = {
        "conv5a_w": jax.random.normal(ks[0], (inter, Cin, 3, 3), jnp.float32) * 0.02,
        "conv5c_w": jax.random.normal(ks[1], (inter, Cin, 3, 3), jnp.float32) * 0.02,
        "conv51_w": jax.random.normal(ks[2], (inter, inter, 3, 3), jnp.float32) * 0.05,
        "conv52_w": jax.random.normal(ks[3], (inter, inter, 3, 3), jnp.float32) * 0.05,
        "bn5a": bn_params(inter, ks[4]),
        "bn5c": bn_params(inter, ks[5]),
        "bn51": bn_params(inter, ks[6]),
        "bn52": bn_params(inter, ks[7]),
        "pam_wq": jax.random.normal(ks[8], (qk, inter, 1, 1), jnp.float32) * 0.1,
        "pam_bq": jax.random.normal(ks[9], (qk,), jnp.float32) * 0.1,
        "pam_wk": jax.random.normal(ks[10], (qk, inter, 1, 1), jnp.float32) * 0.1,
        "pam_bk": jax.random.normal(ks[11], (qk,), jnp.float32) * 0.1,
        "pam_wv": jax.random.normal(ks[12], (inter, inter, 1, 1), jnp.float32) * 0.1,
        "pam_bv": jax.random.normal(ks[13], (inter,), jnp.float32) * 0.1,
        # PyTorch inits gamma to 0; use small nonzero values so the attention
        # paths actually contribute to the output in this synthetic test.
        "pam_gamma": jnp.float32(0.1),
        "cam_gamma": jnp.float32(0.2),
        "conv8_w": jax.random.normal(ks[14], (Cout, inter, 1, 1), jnp.float32) * 0.1,
        "conv8_b": jax.random.normal(ks[15], (Cout,), jnp.float32) * 0.1,
    }
    x = jax.random.normal(ks[16], (B, Cin, H, W), jnp.float32)

    out = jax.block_until_ready(jax.jit(danet_head_forward)(x, params))
    ref = jax.block_until_ready(reference_forward(x, params))

    assert out.shape == (B, Cout, H, W), out.shape
    assert bool(jnp.all(jnp.isfinite(out)))
    np.testing.assert_allclose(np.asarray(out), np.asarray(ref), rtol=5e-2, atol=5e-2)

    print("KERNEL_OK")
</pallas_src>

<mosaic_0001>
module attributes {stable_mosaic.version = 11 : i64} {
  func.func @_mm_affine_kernel(%arg0: i32, %arg1: i32, %arg2: i32, %arg3: memref<128x128xbf16, #tpu.memory_space<vmem>>, %arg4: memref<128x128xbf16, #tpu.memory_space<vmem>>, %arg5: memref<1x128xf32, #tpu.memory_space<vmem>>, %arg6: memref<1x128xf32, #tpu.memory_space<vmem>>, %arg7: memref<128x128xbf16, #tpu.memory_space<vmem>>, %arg8: memref<128x128xf32, #tpu.memory_space<vmem>>) attributes {dimension_semantics = [#tpu.dimension_semantics<parallel>, #tpu.dimension_semantics<parallel>, #tpu.dimension_semantics<arbitrary>], iteration_bounds = array<i64: 1, 1, 5>, scalar_prefetch = 0 : i64, scratch_operands = 1 : i64, tpu.core_type = #tpu.core_type<tc>, window_params = [{transform_indices = @transform_0, window_bounds = array<i64: 128, 128>}, {transform_indices = @transform_1, window_bounds = array<i64: 128, 128>}, {transform_indices = @transform_2, window_bounds = array<i64: 1, 128>}, {transform_indices = @transform_3, window_bounds = array<i64: 1, 128>}, {transform_indices = @transform_4, window_bounds = array<i64: 128, 128>}]} {
    %c0 = arith.constant 0 : index
    %c0_0 = arith.constant 0 : index
    %0 = vector.load %arg3[%c0, %c0_0] : memref<128x128xbf16, #tpu.memory_space<vmem>>, vector<128x128xbf16>
    %c0_1 = arith.constant 0 : index
    %c0_2 = arith.constant 0 : index
    %1 = vector.load %arg4[%c0_1, %c0_2] : memref<128x128xbf16, #tpu.memory_space<vmem>>, vector<128x128xbf16>
    %cst = arith.constant dense<0.000000e+00> : vector<128x128xf32>
    %2 = tpu.matmul %0, %1, %cst {dimension_numbers = #tpu.dot_dimension_numbers<[1], [0], [0], [1], [0, 0, 1, 1], [], []>} : vector<128x128xbf16>, vector<128x128xbf16>, vector<128x128xf32> -> vector<128x128xf32>
    %c0_i32 = arith.constant 0 : i32
    %3 = arith.cmpi eq, %arg2, %c0_i32 : i32
    %4 = arith.extui %3 : i1 to i32
    %c0_i32_3 = arith.constant 0 : i32
    %5 = arith.cmpi ne, %4, %c0_i32_3 : i32
    scf.if %5 {
      %cst_9 = arith.constant 0.000000e+00 : f32
      %12 = vector.broadcast %cst_9 : f32 to vector<128x128xf32>
      %c0_10 = arith.constant 0 : index
      %c0_11 = arith.constant 0 : index
      %13 = vector.load %arg8[%c0_10, %c0_11] : memref<128x128xf32, #tpu.memory_space<vmem>>, vector<128x128xf32>
      tpu.vector_store %arg8[%c0_10, %c0_11], %12 {strides = array<i32>} : memref<128x128xf32, #tpu.memory_space<vmem>>, vector<128x128xf32>,
    } else {
    }
    %c0_4 = arith.constant 0 : index
    %c0_5 = arith.constant 0 : index
    %6 = vector.load %arg8[%c0_4, %c0_5] : memref<128x128xf32, #tpu.memory_space<vmem>>, vector<128x128xf32>
    %7 = arith.addf %6, %2 : vector<128x128xf32>
    %c0_6 = arith.constant 0 : index
    %c0_7 = arith.constant 0 : index
    %8 = vector.load %arg8[%c0_6, %c0_7] : memref<128x128xf32, #tpu.memory_space<vmem>>, vector<128x128xf32>
    tpu.vector_store %arg8[%c0_6, %c0_7], %7 {strides = array<i32>} : memref<128x128xf32, #tpu.memory_space<vmem>>, vector<128x128xf32>,
    %c4_i32 = arith.constant 4 : i32
    %9 = arith.cmpi eq, %arg2, %c4_i32 : i32
    %10 = arith.extui %9 : i1 to i32
    %c0_i32_8 = arith.constant 0 : i32
    %11 = arith.cmpi ne, %10, %c0_i32_8 : i32
    scf.if %11 {
      %c0_9 = arith.constant 0 : index
      %c0_10 = arith.constant 0 : index
      %12 = vector.load %arg8[%c0_9, %c0_10] : memref<128x128xf32, #tpu.memory_space<vmem>>, vector<128x128xf32>
      %c0_11 = arith.constant 0 : index
      %c0_12 = arith.constant 0 : index
      %13 = vector.load %arg5[%c0_11, %c0_12] : memref<1x128xf32, #tpu.memory_space<vmem>>, vector<1x128xf32>
      %14 = vector.broadcast %13 : vector<1x128xf32> to vector<128x128xf32>
      %15 = arith.mulf %12, %14 : vector<128x128xf32>
      %c0_13 = arith.constant 0 : index
      %c0_14 = arith.constant 0 : index
      %16 = vector.load %arg6[%c0_13, %c0_14] : memref<1x128xf32, #tpu.memory_space<vmem>>, vector<1x128xf32>
      %17 = vector.broadcast %16 : vector<1x128xf32> to vector<128x128xf32>
      %18 = arith.addf %15, %17 : vector<128x128xf32>
      %cst_15 = arith.constant 0.000000e+00 : f32
      %19 = vector.broadcast %cst_15 : f32 to vector<128x128xf32>
      %20 = arith.maximumf %18, %19 : vector<128x128xf32>
      %21 = arith.truncf %20 : vector<128x128xf32> to vector<128x128xbf16>
      %c0_16 = arith.constant 0 : index
      %c0_17 = arith.constant 0 : index
      %22 = vector.load %arg7[%c0_16, %c0_17] : memref<128x128xbf16, #tpu.memory_space<vmem>>, vector<128x128xbf16>
      tpu.vector_store %arg7[%c0_16, %c0_17], %21 {strides = array<i32>} : memref<128x128xbf16, #tpu.memory_space<vmem>>, vector<128x128xbf16>,
    } else {
    }
    return
  }
  func.func @transform_0(%arg0: i32, %arg1: i32, %arg2: i32) -> (i32, i32) {
    %c0_i32 = arith.constant 0 : i32
    return %arg0, %arg2 : i32, i32
  }
  func.func @transform_1(%arg0: i32, %arg1: i32, %arg2: i32) -> (i32, i32) {
    %c0_i32 = arith.constant 0 : i32
    return %arg2, %arg1 : i32, i32
  }
  func.func @transform_2(%arg0: i32, %arg1: i32, %arg2: i32) -> (i32, i32) {
    %c0_i32 = arith.constant 0 : i32
    %c0_i32_0 = arith.constant 0 : i32
    return %c0_i32, %arg1 : i32, i32
  }
  func.func @transform_3(%arg0: i32, %arg1: i32, %arg2: i32) -> (i32, i32) {
    %c0_i32 = arith.constant 0 : i32
    %c0_i32_0 = arith.constant 0 : i32
    return %c0_i32, %arg1 : i32, i32
  }
  func.func @transform_4(%arg0: i32, %arg1: i32, %arg2: i32) -> (i32, i32) {
    %c0_i32 = arith.constant 0 : i32
    return %arg0, %arg1 : i32, i32
  }
}

module attributes {stable_mosaic.version = 11 : i64} {
  func.func @_cam_attn_kernel(%arg0: i32, %arg1: i32, %arg2: memref<1x64x16xbf16, #tpu.memory_space<vmem>>, %arg3: memref<1x16x16xf32, #tpu.memory_space<vmem>>, %arg4: memref<16x16xf32, #tpu.memory_space<vmem>>) attributes {dimension_semantics = [#tpu.dimension_semantics<parallel>, #tpu.dimension_semantics<arbitrary>], iteration_bounds = array<i64: 2, 1>, scalar_prefetch = 0 : i64, scratch_operands = 1 : i64, tpu.core_type = #tpu.core_type<tc>, window_params = [{transform_indices = @transform_0, window_bounds = array<i64: 1, 64, 16>}, {transform_indices = @transform_1, window_bounds = array<i64: 1, 16, 16>}]} {
    %c0_i32 = arith.constant 0 : i32
    %0 = arith.cmpi eq, %arg1, %c0_i32 : i32
    %1 = arith.extui %0 : i1 to i32
    %c0_i32_0 = arith.constant 0 : i32
    %2 = arith.cmpi ne, %1, %c0_i32_0 : i32
    scf.if %2 {
      %cst_9 = arith.constant 0.000000e+00 : f32
      %12 = vector.broadcast %cst_9 : f32 to vector<16x16xf32>
      %c0_10 = arith.constant 0 : index
      %c0_11 = arith.constant 0 : index
      %13 = vector.load %arg4[%c0_10, %c0_11] : memref<16x16xf32, #tpu.memory_space<vmem>>, vector<16x16xf32>
      tpu.vector_store %arg4[%c0_10, %c0_11], %12 {strides = array<i32>} : memref<16x16xf32, #tpu.memory_space<vmem>>, vector<16x16xf32>,
    } else {
    }
    %c0 = arith.constant 0 : index
    %c0_1 = arith.constant 0 : index
    %c0_2 = arith.constant 0 : index
    %3 = vector.load %arg2[%c0, %c0_1, %c0_2] : memref<1x64x16xbf16, #tpu.memory_space<vmem>>, vector<1x64x16xbf16>
    %4 = vector.shape_cast %3 : vector<1x64x16xbf16> to vector<64x16xbf16>
    %c0_3 = arith.constant 0 : index
    %c0_4 = arith.constant 0 : index
    %5 = vector.load %arg4[%c0_3, %c0_4] : memref<16x16xf32, #tpu.memory_space<vmem>>, vector<16x16xf32>
    %cst = arith.constant dense<0.000000e+00> : vector<16x16xf32>
    %6 = tpu.matmul %4, %4, %cst {dimension_numbers = #tpu.dot_dimension_numbers<[0], [0], [1], [1], [0, 1, 1, 1], [], []>} : vector<64x16xbf16>, vector<64x16xbf16>, vector<16x16xf32> -> vector<16x16xf32>
    %7 = arith.addf %5, %6 : vector<16x16xf32>
    %c0_5 = arith.constant 0 : index
    %c0_6 = arith.constant 0 : index
    %8 = vector.load %arg4[%c0_5, %c0_6] : memref<16x16xf32, #tpu.memory_space<vmem>>, vector<16x16xf32>
    tpu.vector_store %arg4[%c0_5, %c0_6], %7 {strides = array<i32>} : memref<16x16xf32, #tpu.memory_space<vmem>>, vector<16x16xf32>,
    %c0_i32_7 = arith.constant 0 : i32
    %9 = arith.cmpi eq, %arg1, %c0_i32_7 : i32
    %10 = arith.extui %9 : i1 to i32
    %c0_i32_8 = arith.constant 0 : i32
    %11 = arith.cmpi ne, %10, %c0_i32_8 : i32
    scf.if %11 {
      %c0_9 = arith.constant 0 : index
      %c0_10 = arith.constant 0 : index
      %12 = vector.load %arg4[%c0_9, %c0_10] : memref<16x16xf32, #tpu.memory_space<vmem>>, vector<16x16xf32>
      %cst_11 = arith.constant dense<0xFF800000> : vector<16xf32>
      %13 = vector.multi_reduction <maximumf>, %12, %cst_11 [1] : vector<16x16xf32> to vector<16xf32>
      %14 = vector.shape_cast %13 : vector<16xf32> to vector<16x1xf32>
      %15 = vector.broadcast %14 : vector<16x1xf32> to vector<16x16xf32>
      %16 = arith.subf %15, %12 : vector<16x16xf32>
      %cst_12 = arith.constant dense<0xFF800000> : vector<16xf32>
      %17 = vector.multi_reduction <maximumf>, %16, %cst_12 [1] : vector<16x16xf32> to vector<16xf32>
      %18 = vector.shape_cast %17 : vector<16xf32> to vector<16x1xf32>
      %19 = vector.broadcast %18 : vector<16x1xf32> to vector<16x16xf32>
      %20 = arith.subf %16, %19 : vector<16x16xf32>
      %21 = math.exp %20 : vector<16x16xf32>
      %cst_13 = arith.constant dense<0.000000e+00> : vector<16xf32>
      %22 = vector.multi_reduction <add>, %21, %cst_13 [1] : vector<16x16xf32> to vector<16xf32>
      %23 = vector.shape_cast %22 : vector<16xf32> to vector<16x1xf32>
      %24 = tpu.reciprocal %23 : vector<16x1xf32> -> vector<16x1xf32>
      %25 = vector.broadcast %24 : vector<16x1xf32> to vector<16x16xf32>
      %26 = arith.mulf %21, %25 : vector<16x16xf32>
      %c0_14 = arith.constant 0 : index
      %c0_15 = arith.constant 0 : index
      %c0_16 = arith.constant 0 : index
      %27 = vector.load %arg3[%c0_14, %c0_15, %c0_16] : memref<1x16x16xf32, #tpu.memory_space<vmem>>, vector<1x16x16xf32>
      %28 = vector.shape_cast %27 : vector<1x16x16xf32> to vector<16x16xf32>
      %29 = vector.shape_cast %26 : vector<16x16xf32> to vector<1x16x16xf32>
      tpu.vector_store %arg3[%c0_14, %c0_15, %c0_16], %29 {strides = array<i32>} : memref<1x16x16xf32, #tpu.memory_space<vmem>>, vector<1x16x16xf32>,
    } else {
    }
    return
  }
  func.func @transform_0(%arg0: i32, %arg1: i32) -> (i32, i32, i32) {
    %c0_i32 = arith.constant 0 : i32
    %c0_i32_0 = arith.constant 0 : i32
    return %arg0, %arg1, %c0_i32 : i32, i32, i32
  }
  func.func @transform_1(%arg0: i32, %arg1: i32) -> (i32, i32, i32) {
    %c0_i32 = arith.constant 0 : i32
    %c0_i32_0 = arith.constant 0 : i32
    %c0_i32_1 = arith.constant 0 : i32
    return %arg0, %c0_i32, %c0_i32_0 : i32, i32, i32
  }
}

module attributes {stable_mosaic.version = 11 : i64} {
  func.func @_cam_apply_kernel(%arg0: i32, %arg1: i32, %arg2: memref<1x16x16xbf16, #tpu.memory_space<vmem>>, %arg3: memref<1x64x16xbf16, #tpu.memory_space<vmem>>, %arg4: memref<1x64x16xbf16, #tpu.memory_space<vmem>>) attributes {dimension_semantics = [#tpu.dimension_semantics<parallel>, #tpu.dimension_semantics<parallel>], iteration_bounds = array<i64: 2, 1>, scalar_prefetch = 0 : i64, scratch_operands = 0 : i64, tpu.core_type = #tpu.core_type<tc>, window_params = [{transform_indices = @transform_0, window_bounds = array<i64: 1, 16, 16>}, {transform_indices = @transform_1, window_bounds = array<i64: 1, 64, 16>}, {transform_indices = @transform_2, window_bounds = array<i64: 1, 64, 16>}]} {
    %c0 = arith.constant 0 : index
    %c0_0 = arith.constant 0 : index
    %c0_1 = arith.constant 0 : index
    %0 = vector.load %arg3[%c0, %c0_0, %c0_1] : memref<1x64x16xbf16, #tpu.memory_space<vmem>>, vector<1x64x16xbf16>
    %1 = vector.shape_cast %0 : vector<1x64x16xbf16> to vector<64x16xbf16>
    %c0_2 = arith.constant 0 : index
    %c0_3 = arith.constant 0 : index
    %c0_4 = arith.constant 0 : index
    %2 = vector.load %arg2[%c0_2, %c0_3, %c0_4] : memref<1x16x16xbf16, #tpu.memory_space<vmem>>, vector<1x16x16xbf16>
    %3 = vector.shape_cast %2 : vector<1x16x16xbf16> to vector<16x16xbf16>
    %cst = arith.constant dense<0.000000e+00> : vector<64x16xf32>
    %4 = tpu.matmul %1, %3, %cst {dimension_numbers = #tpu.dot_dimension_numbers<[1], [1], [0], [0], [0, 0, 1, 0], [], []>} : vector<64x16xbf16>, vector<16x16xbf16>, vector<64x16xf32> -> vector<64x16xf32>
    %5 = arith.extf %1 : vector<64x16xbf16> to vector<64x16xf32>
    %6 = arith.addf %4, %5 : vector<64x16xf32>
    %7 = arith.truncf %6 : vector<64x16xf32> to vector<64x16xbf16>
    %c0_5 = arith.constant 0 : index
    %c0_6 = arith.constant 0 : index
    %c0_7 = arith.constant 0 : index
    %8 = vector.load %arg4[%c0_5, %c0_6, %c0_7] : memref<1x64x16xbf16, #tpu.memory_space<vmem>>, vector<1x64x16xbf16>
    %9 = vector.shape_cast %8 : vector<1x64x16xbf16> to vector<64x16xbf16>
    %10 = vector.shape_cast %7 : vector<64x16xbf16> to vector<1x64x16xbf16>
    tpu.vector_store %arg4[%c0_5, %c0_6, %c0_7], %10 {strides = array<i32>} : memref<1x64x16xbf16, #tpu.memory_space<vmem>>, vector<1x64x16xbf16>,
    return
  }
  func.func @transform_0(%arg0: i32, %arg1: i32) -> (i32, i32, i32) {
    %c0_i32 = arith.constant 0 : i32
    %c0_i32_0 = arith.constant 0 : i32
    %c0_i32_1 = arith.constant 0 : i32
    return %arg0, %c0_i32, %c0_i32_0 : i32, i32, i32
  }
  func.func @transform_1(%arg0: i32, %arg1: i32) -> (i32, i32, i32) {
    %c0_i32 = arith.constant 0 : i32
    %c0_i32_0 = arith.constant 0 : i32
    return %arg0, %arg1, %c0_i32 : i32, i32, i32
  }
  func.func @transform_2(%arg0: i32, %arg1: i32) -> (i32, i32, i32) {
    %c0_i32 = arith.constant 0 : i32
    %c0_i32_0 = arith.constant 0 : i32
    return %arg0, %arg1, %c0_i32 : i32, i32, i32
  }
}

module attributes {stable_mosaic.version = 11 : i64} {
  func.func @_mm_affine_kernel(%arg0: i32, %arg1: i32, %arg2: i32, %arg3: memref<128x256xbf16, #tpu.memory_space<vmem>>, %arg4: memref<256x128xbf16, #tpu.memory_space<vmem>>, %arg5: memref<1x128xf32, #tpu.memory_space<vmem>>, %arg6: memref<1x128xf32, #tpu.memory_space<vmem>>, %arg7: memref<128x128xbf16, #tpu.memory_space<vmem>>) attributes {dimension_semantics = [#tpu.dimension_semantics<parallel>, #tpu.dimension_semantics<parallel>, #tpu.dimension_semantics<arbitrary>], iteration_bounds = array<i64: 1, 1, 1>, scalar_prefetch = 0 : i64, scratch_operands = 0 : i64, tpu.core_type = #tpu.core_type<tc>, window_params = [{transform_indices = @transform_0, window_bounds = array<i64: 128, 256>}, {transform_indices = @transform_1, window_bounds = array<i64: 256, 128>}, {transform_indices = @transform_2, window_bounds = array<i64: 1, 128>}, {transform_indices = @transform_3, window_bounds = array<i64: 1, 128>}, {transform_indices = @transform_4, window_bounds = array<i64: 128, 128>}]} {
    %c0 = arith.constant 0 : index
    %c0_0 = arith.constant 0 : index
    %0 = vector.load %arg3[%c0, %c0_0] : memref<128x256xbf16, #tpu.memory_space<vmem>>, vector<128x256xbf16>
    %c0_1 = arith.constant 0 : index
    %c0_2 = arith.constant 0 : index
    %1 = vector.load %arg4[%c0_1, %c0_2] : memref<256x128xbf16, #tpu.memory_space<vmem>>, vector<256x128xbf16>
    %cst = arith.constant dense<0.000000e+00> : vector<128x128xf32>
    %2 = tpu.matmul %0, %1, %cst {dimension_numbers = #tpu.dot_dimension_numbers<[1], [0], [0], [1], [0, 0, 1, 1], [], []>} : vector<128x256xbf16>, vector<256x128xbf16>, vector<128x128xf32> -> vector<128x128xf32>
    %c0_3 = arith.constant 0 : index
    %c0_4 = arith.constant 0 : index
    %3 = vector.load %arg5[%c0_3, %c0_4] : memref<1x128xf32, #tpu.memory_space<vmem>>, vector<1x128xf32>
    %4 = vector.broadcast %3 : vector<1x128xf32> to vector<128x128xf32>
    %5 = arith.mulf %2, %4 : vector<128x128xf32>
    %c0_5 = arith.constant 0 : index
    %c0_6 = arith.constant 0 : index
    %6 = vector.load %arg6[%c0_5, %c0_6] : memref<1x128xf32, #tpu.memory_space<vmem>>, vector<1x128xf32>
    %7 = vector.broadcast %6 : vector<1x128xf32> to vector<128x128xf32>
    %8 = arith.addf %5, %7 : vector<128x128xf32>
    %cst_7 = arith.constant 0.000000e+00 : f32
    %9 = vector.broadcast %cst_7 : f32 to vector<128x128xf32>
    %10 = arith.maximumf %8, %9 : vector<128x128xf32>
    %11 = arith.truncf %10 : vector<128x128xf32> to vector<128x128xbf16>
    %c0_8 = arith.constant 0 : index
    %c0_9 = arith.constant 0 : index
    %12 = vector.load %arg7[%c0_8, %c0_9] : memref<128x128xbf16, #tpu.memory_space<vmem>>, vector<128x128xbf16>
    tpu.vector_store %arg7[%c0_8, %c0_9], %11 {strides = array<i32>} : memref<128x128xbf16, #tpu.memory_space<vmem>>, vector<128x128xbf16>,
    return
  }
  func.func @transform_0(%arg0: i32, %arg1: i32, %arg2: i32) -> (i32, i32) {
    %c0_i32 = arith.constant 0 : i32
    return %arg0, %arg2 : i32, i32
  }
  func.func @transform_1(%arg0: i32, %arg1: i32, %arg2: i32) -> (i32, i32) {
    %c0_i32 = arith.constant 0 : i32
    return %arg2, %arg1 : i32, i32
  }
  func.func @transform_2(%arg0: i32, %arg1: i32, %arg2: i32) -> (i32, i32) {
    %c0_i32 = arith.constant 0 : i32
    %c0_i32_0 = arith.constant 0 : i32
    return %c0_i32, %arg1 : i32, i32
  }
  func.func @transform_3(%arg0: i32, %arg1: i32, %arg2: i32) -> (i32, i32) {
    %c0_i32 = arith.constant 0 : i32
    %c0_i32_0 = arith.constant 0 : i32
    return %c0_i32, %arg1 : i32, i32
  }
  func.func @transform_4(%arg0: i32, %arg1: i32, %arg2: i32) -> (i32, i32) {
    %c0_i32 = arith.constant 0 : i32
    return %arg0, %arg1 : i32, i32
  }
}

module attributes {stable_mosaic.version = 11 : i64} {
  func.func @_mm_affine_kernel(%arg0: i32, %arg1: i32, %arg2: i32, %arg3: memref<128x128xbf16, #tpu.memory_space<vmem>>, %arg4: memref<128x384xbf16, #tpu.memory_space<vmem>>, %arg5: memref<1x384xf32, #tpu.memory_space<vmem>>, %arg6: memref<1x384xf32, #tpu.memory_space<vmem>>, %arg7: memref<128x384xbf16, #tpu.memory_space<vmem>>) attributes {dimension_semantics = [#tpu.dimension_semantics<parallel>, #tpu.dimension_semantics<parallel>, #tpu.dimension_semantics<arbitrary>], iteration_bounds = array<i64: 1, 1, 1>, scalar_prefetch = 0 : i64, scratch_operands = 0 : i64, tpu.core_type = #tpu.core_type<tc>, window_params = [{transform_indices = @transform_0, window_bounds = array<i64: 128, 128>}, {transform_indices = @transform_1, window_bounds = array<i64: 128, 384>}, {transform_indices = @transform_2, window_bounds = array<i64: 1, 384>}, {transform_indices = @transform_3, window_bounds = array<i64: 1, 384>}, {transform_indices = @transform_4, window_bounds = array<i64: 128, 384>}]} {
    %c0 = arith.constant 0 : index
    %c0_0 = arith.constant 0 : index
    %0 = vector.load %arg3[%c0, %c0_0] : memref<128x128xbf16, #tpu.memory_space<vmem>>, vector<128x128xbf16>
    %c0_1 = arith.constant 0 : index
    %c0_2 = arith.constant 0 : index
    %1 = vector.load %arg4[%c0_1, %c0_2] : memref<128x384xbf16, #tpu.memory_space<vmem>>, vector<128x384xbf16>
    %cst = arith.constant dense<0.000000e+00> : vector<128x384xf32>
    %2 = tpu.matmul %0, %1, %cst {dimension_numbers = #tpu.dot_dimension_numbers<[1], [0], [0], [1], [0, 0, 1, 1], [], []>} : vector<128x128xbf16>, vector<128x384xbf16>, vector<128x384xf32> -> vector<128x384xf32>
    %c0_3 = arith.constant 0 : index
    %c0_4 = arith.constant 0 : index
    %3 = vector.load %arg5[%c0_3, %c0_4] : memref<1x384xf32, #tpu.memory_space<vmem>>, vector<1x384xf32>
    %4 = vector.broadcast %3 : vector<1x384xf32> to vector<128x384xf32>
    %5 = arith.mulf %2, %4 : vector<128x384xf32>
    %c0_5 = arith.constant 0 : index
    %c0_6 = arith.constant 0 : index
    %6 = vector.load %arg6[%c0_5, %c0_6] : memref<1x384xf32, #tpu.memory_space<vmem>>, vector<1x384xf32>
    %7 = vector.broadcast %6 : vector<1x384xf32> to vector<128x384xf32>
    %8 = arith.addf %5, %7 : vector<128x384xf32>
    %9 = arith.truncf %8 : vector<128x384xf32> to vector<128x384xbf16>
    %c0_7 = arith.constant 0 : index
    %c0_8 = arith.constant 0 : index
    %10 = vector.load %arg7[%c0_7, %c0_8] : memref<128x384xbf16, #tpu.memory_space<vmem>>, vector<128x384xbf16>
    tpu.vector_store %arg7[%c0_7, %c0_8], %9 {strides = array<i32>} : memref<128x384xbf16, #tpu.memory_space<vmem>>, vector<128x384xbf16>,
    return
  }
  func.func @transform_0(%arg0: i32, %arg1: i32, %arg2: i32) -> (i32, i32) {
    %c0_i32 = arith.constant 0 : i32
    return %arg0, %arg2 : i32, i32
  }
  func.func @transform_1(%arg0: i32, %arg1: i32, %arg2: i32) -> (i32, i32) {
    %c0_i32 = arith.constant 0 : i32
    return %arg2, %arg1 : i32, i32
  }
  func.func @transform_2(%arg0: i32, %arg1: i32, %arg2: i32) -> (i32, i32) {
    %c0_i32 = arith.constant 0 : i32
    %c0_i32_0 = arith.constant 0 : i32
    return %c0_i32, %arg1 : i32, i32
  }
  func.func @transform_3(%arg0: i32, %arg1: i32, %arg2: i32) -> (i32, i32) {
    %c0_i32 = arith.constant 0 : i32
    %c0_i32_0 = arith.constant 0 : i32
    return %c0_i32, %arg1 : i32, i32
  }
  func.func @transform_4(%arg0: i32, %arg1: i32, %arg2: i32) -> (i32, i32) {
    %c0_i32 = arith.constant 0 : i32
    return %arg0, %arg1 : i32, i32
  }
}

module attributes {stable_mosaic.version = 11 : i64} {
  func.func @_pam_flash_kernel(%arg0: i32, %arg1: i32, %arg2: i32, %arg3: memref<1x64x128xbf16, #tpu.memory_space<vmem>>, %arg4: memref<1x64x128xbf16, #tpu.memory_space<vmem>>, %arg5: memref<1x64x128xbf16, #tpu.memory_space<vmem>>, %arg6: memref<1x64x16xbf16, #tpu.memory_space<vmem>>, %arg7: memref<1x64x16xbf16, #tpu.memory_space<vmem>>, %arg8: memref<64x1xf32, #tpu.memory_space<vmem>>, %arg9: memref<64x1xf32, #tpu.memory_space<vmem>>, %arg10: memref<64x128xf32, #tpu.memory_space<vmem>>) attributes {dimension_semantics = [#tpu.dimension_semantics<parallel>, #tpu.dimension_semantics<parallel>, #tpu.dimension_semantics<arbitrary>], iteration_bounds = array<i64: 2, 1, 1>, scalar_prefetch = 0 : i64, scratch_operands = 3 : i64, tpu.core_type = #tpu.core_type<tc>, window_params = [{transform_indices = @transform_0, window_bounds = array<i64: 1, 64, 128>}, {transform_indices = @transform_1, window_bounds = array<i64: 1, 64, 128>}, {transform_indices = @transform_2, window_bounds = array<i64: 1, 64, 128>}, {transform_indices = @transform_3, window_bounds = array<i64: 1, 64, 16>}, {transform_indices = @transform_4, window_bounds = array<i64: 1, 64, 16>}]} {
    %c0_i32 = arith.constant 0 : i32
    %0 = arith.cmpi eq, %arg2, %c0_i32 : i32
    %1 = arith.extui %0 : i1 to i32
    %c0_i32_0 = arith.constant 0 : i32
    %2 = arith.cmpi ne, %1, %c0_i32_0 : i32
    scf.if %2 {
      %cst_26 = arith.constant 0xFF800000 : f32
      %36 = vector.broadcast %cst_26 : f32 to vector<64x1xf32>
      %c0_27 = arith.constant 0 : index
      %c0_28 = arith.constant 0 : index
      %37 = vector.load %arg8[%c0_27, %c0_28] : memref<64x1xf32, #tpu.memory_space<vmem>>, vector<64x1xf32>
      tpu.vector_store %arg8[%c0_27, %c0_28], %36 {strides = array<i32>} : memref<64x1xf32, #tpu.memory_space<vmem>>, vector<64x1xf32>,
      %cst_29 = arith.constant 0.000000e+00 : f32
      %38 = vector.broadcast %cst_29 : f32 to vector<64x1xf32>
      %c0_30 = arith.constant 0 : index
      %c0_31 = arith.constant 0 : index
      %39 = vector.load %arg9[%c0_30, %c0_31] : memref<64x1xf32, #tpu.memory_space<vmem>>, vector<64x1xf32>
      tpu.vector_store %arg9[%c0_30, %c0_31], %38 {strides = array<i32>} : memref<64x1xf32, #tpu.memory_space<vmem>>, vector<64x1xf32>,
      %cst_32 = arith.constant 0.000000e+00 : f32
      %40 = vector.broadcast %cst_32 : f32 to vector<64x128xf32>
      %c0_33 = arith.constant 0 : index
      %c0_34 = arith.constant 0 : index
      %41 = vector.load %arg10[%c0_33, %c0_34] : memref<64x128xf32, #tpu.memory_space<vmem>>, vector<64x128xf32>
      tpu.vector_store %arg10[%c0_33, %c0_34], %40 {strides = array<i32>} : memref<64x128xf32, #tpu.memory_space<vmem>>, vector<64x128xf32>,
    } else {
    }
    %c0 = arith.constant 0 : index
    %c0_1 = arith.constant 0 : index
    %c0_2 = arith.constant 0 : index
    %3 = vector.load %arg3[%c0, %c0_1, %c0_2] : memref<1x64x128xbf16, #tpu.memory_space<vmem>>, vector<1x64x128xbf16>
    %4 = vector.shape_cast %3 : vector<1x64x128xbf16> to vector<64x128xbf16>
    %c0_3 = arith.constant 0 : index
    %c0_4 = arith.constant 0 : index
    %c0_5 = arith.constant 0 : index
    %5 = vector.load %arg4[%c0_3, %c0_4, %c0_5] : memref<1x64x128xbf16, #tpu.memory_space<vmem>>, vector<1x64x128xbf16>
    %6 = vector.shape_cast %5 : vector<1x64x128xbf16> to vector<64x128xbf16>
    %cst = arith.constant dense<0.000000e+00> : vector<64x64xf32>
    %7 = tpu.matmul %4, %6, %cst {dimension_numbers = #tpu.dot_dimension_numbers<[1], [1], [0], [0], [0, 0, 1, 0], [], []>} : vector<64x128xbf16>, vector<64x128xbf16>, vector<64x64xf32> -> vector<64x64xf32>
    %c0_6 = arith.constant 0 : index
    %c0_7 = arith.constant 0 : index
    %8 = vector.load %arg8[%c0_6, %c0_7] : memref<64x1xf32, #tpu.memory_space<vmem>>, vector<64x1xf32>
    %cst_8 = arith.constant dense<0xFF800000> : vector<64xf32>
    %9 = vector.multi_reduction <maximumf>, %7, %cst_8 [1] : vector<64x64xf32> to vector<64xf32>
    %10 = vector.shape_cast %9 : vector<64xf32> to vector<64x1xf32>
    %11 = arith.maximumf %8, %10 : vector<64x1xf32>
    %12 = arith.subf %8, %11 : vector<64x1xf32>
    %13 = math.exp %12 : vector<64x1xf32>
    %14 = vector.broadcast %11 : vector<64x1xf32> to vector<64x64xf32>
    %15 = arith.subf %7, %14 : vector<64x64xf32>
    %16 = math.exp %15 : vector<64x64xf32>
    %c0_9 = arith.constant 0 : index
    %c0_10 = arith.constant 0 : index
    %17 = vector.load %arg9[%c0_9, %c0_10] : memref<64x1xf32, #tpu.memory_space<vmem>>, vector<64x1xf32>
    %18 = arith.mulf %13, %17 : vector<64x1xf32>
    %cst_11 = arith.constant dense<0.000000e+00> : vector<64xf32>
    %19 = vector.multi_reduction <add>, %16, %cst_11 [1] : vector<64x64xf32> to vector<64xf32>
    %20 = vector.shape_cast %19 : vector<64xf32> to vector<64x1xf32>
    %21 = arith.addf %18, %20 : vector<64x1xf32>
    %c0_12 = arith.constant 0 : index
    %c0_13 = arith.constant 0 : index
    %22 = vector.load %arg9[%c0_12, %c0_13] : memref<64x1xf32, #tpu.memory_space<vmem>>, vector<64x1xf32>
    tpu.vector_store %arg9[%c0_12, %c0_13], %21 {strides = array<i32>} : memref<64x1xf32, #tpu.memory_space<vmem>>, vector<64x1xf32>,
    %c0_14 = arith.constant 0 : index
    %c0_15 = arith.constant 0 : index
    %23 = vector.load %arg10[%c0_14, %c0_15] : memref<64x128xf32, #tpu.memory_space<vmem>>, vector<64x128xf32>
    %24 = vector.broadcast %13 : vector<64x1xf32> to vector<64x128xf32>
    %25 = arith.mulf %24, %23 : vector<64x128xf32>
    %26 = arith.truncf %16 : vector<64x64xf32> to vector<64x64xbf16>
    %c0_16 = arith.constant 0 : index
    %c0_17 = arith.constant 0 : index
    %c0_18 = arith.constant 0 : index
    %27 = vector.load %arg5[%c0_16, %c0_17, %c0_18] : memref<1x64x128xbf16, #tpu.memory_space<vmem>>, vector<1x64x128xbf16>
    %28 = vector.shape_cast %27 : vector<1x64x128xbf16> to vector<64x128xbf16>
    %cst_19 = arith.constant dense<0.000000e+00> : vector<64x128xf32>
    %29 = tpu.matmul %26, %28, %cst_19 {dimension_numbers = #tpu.dot_dimension_numbers<[1], [0], [0], [1], [0, 0, 1, 1], [], []>} : vector<64x64xbf16>, vector<64x128xbf16>, vector<64x128xf32> -> vector<64x128xf32>
    %30 = arith.addf %25, %29 : vector<64x128xf32>
    %c0_20 = arith.constant 0 : index
    %c0_21 = arith.constant 0 : index
    %31 = vector.load %arg10[%c0_20, %c0_21] : memref<64x128xf32, #tpu.memory_space<vmem>>, vector<64x128xf32>
    tpu.vector_store %arg10[%c0_20, %c0_21], %30 {strides = array<i32>} : memref<64x128xf32, #tpu.memory_space<vmem>>, vector<64x128xf32>,
    %c0_22 = arith.constant 0 : index
    %c0_23 = arith.constant 0 : index
    %32 = vector.load %arg8[%c0_22, %c0_23] : memref<64x1xf32, #tpu.memory_space<vmem>>, vector<64x1xf32>
    tpu.vector_store %arg8[%c0_22, %c0_23], %11 {strides = array<i32>} : memref<64x1xf32, #tpu.memory_space<vmem>>, vector<64x1xf32>,
    %c0_i32_24 = arith.constant 0 : i32
    %33 = arith.cmpi eq, %arg2, %c0_i32_24 : i32
    %34 = arith.extui %33 : i1 to i32
    %c0_i32_25 = arith.constant 0 : i32
    %35 = arith.cmpi ne, %34, %c0_i32_25 : i32
    scf.if %35 {
      %c0_26 = arith.constant 0 : index
      %c0_27 = arith.constant 0 : index
      %36 = vector.load %arg10[%c0_26, %c0_27] : memref<64x128xf32, #tpu.memory_space<vmem>>, vector<64x128xf32>
      %c0_28 = arith.constant 0 : index
      %c0_29 = arith.constant 0 : index
      %37 = vector.load %arg9[%c0_28, %c0_29] : memref<64x1xf32, #tpu.memory_space<vmem>>, vector<64x1xf32>
      %38 = tpu.reciprocal %37 : vector<64x1xf32> -> vector<64x1xf32>
      %39 = vector.broadcast %38 : vector<64x1xf32> to vector<64x128xf32>
      %40 = arith.mulf %36, %39 : vector<64x128xf32>
      %41 = vector.extract_strided_slice %40 {offsets = [0, 0], sizes = [64, 16], strides = [1, 1]} : vector<64x128xf32> to vector<64x16xf32>
      %c0_30 = arith.constant 0 : index
      %c0_31 = arith.constant 0 : index
      %c0_32 = arith.constant 0 : index
      %42 = vector.load %arg6[%c0_30, %c0_31, %c0_32] : memref<1x64x16xbf16, #tpu.memory_space<vmem>>, vector<1x64x16xbf16>
      %43 = vector.shape_cast %42 : vector<1x64x16xbf16> to vector<64x16xbf16>
      %44 = arith.extf %43 : vector<64x16xbf16> to vector<64x16xf32>
      %45 = arith.addf %41, %44 : vector<64x16xf32>
      %46 = arith.truncf %45 : vector<64x16xf32> to vector<64x16xbf16>
      %c0_33 = arith.constant 0 : index
      %c0_34 = arith.constant 0 : index
      %c0_35 = arith.constant 0 : index
      %47 = vector.load %arg7[%c0_33, %c0_34, %c0_35] : memref<1x64x16xbf16, #tpu.memory_space<vmem>>, vector<1x64x16xbf16>
      %48 = vector.shape_cast %47 : vector<1x64x16xbf16> to vector<64x16xbf16>
      %49 = vector.shape_cast %46 : vector<64x16xbf16> to vector<1x64x16xbf16>
      tpu.vector_store %arg7[%c0_33, %c0_34, %c0_35], %49 {strides = array<i32>} : memref<1x64x16xbf16, #tpu.memory_space<vmem>>, vector<1x64x16xbf16>,
    } else {
    }
    return
  }
  func.func @transform_0(%arg0: i32, %arg1: i32, %arg2: i32) -> (i32, i32, i32) {
    %c1_i32 = arith.constant 1 : i32
    %c0_i32 = arith.constant 0 : i32
    return %arg0, %arg1, %c1_i32 : i32, i32, i32
  }
  func.func @transform_1(%arg0: i32, %arg1: i32, %arg2: i32) -> (i32, i32, i32) {
    %c2_i32 = arith.constant 2 : i32
    %c0_i32 = arith.constant 0 : i32
    return %arg0, %arg2, %c2_i32 : i32, i32, i32
  }
  func.func @transform_2(%arg0: i32, %arg1: i32, %arg2: i32) -> (i32, i32, i32) {
    %c0_i32 = arith.constant 0 : i32
    %c0_i32_0 = arith.constant 0 : i32
    return %arg0, %arg2, %c0_i32 : i32, i32, i32
  }
  func.func @transform_3(%arg0: i32, %arg1: i32, %arg2: i32) -> (i32, i32, i32) {
    %c0_i32 = arith.constant 0 : i32
    %c0_i32_0 = arith.constant 0 : i32
    return %arg0, %arg1, %c0_i32 : i32, i32, i32
  }
  func.func @transform_4(%arg0: i32, %arg1: i32, %arg2: i32) -> (i32, i32, i32) {
    %c0_i32 = arith.constant 0 : i32
    %c0_i32_0 = arith.constant 0 : i32
    return %arg0, %arg1, %c0_i32 : i32, i32, i32
  }
}

module attributes {stable_mosaic.version = 11 : i64} {
  func.func @_mm_affine_kernel(%arg0: i32, %arg1: i32, %arg2: i32, %arg3: memref<128x128xbf16, #tpu.memory_space<vmem>>, %arg4: memref<128x128xbf16, #tpu.memory_space<vmem>>, %arg5: memref<128x128xbf16, #tpu.memory_space<vmem>>, %arg6: memref<1x128xf32, #tpu.memory_space<vmem>>, %arg7: memref<1x128xf32, #tpu.memory_space<vmem>>, %arg8: memref<128x128xf32, #tpu.memory_space<vmem>>) attributes {dimension_semantics = [#tpu.dimension_semantics<parallel>, #tpu.dimension_semantics<parallel>, #tpu.dimension_semantics<arbitrary>], iteration_bounds = array<i64: 1, 1, 1>, scalar_prefetch = 0 : i64, scratch_operands = 0 : i64, tpu.core_type = #tpu.core_type<tc>, window_params = [{transform_indices = @transform_0, window_bounds = array<i64: 128, 128>}, {transform_indices = @transform_1, window_bounds = array<i64: 128, 128>}, {transform_indices = @transform_2, window_bounds = array<i64: 128, 128>}, {transform_indices = @transform_3, window_bounds = array<i64: 1, 128>}, {transform_indices = @transform_4, window_bounds = array<i64: 1, 128>}, {transform_indices = @transform_5, window_bounds = array<i64: 128, 128>}]} {
    %c0 = arith.constant 0 : index
    %c0_0 = arith.constant 0 : index
    %0 = vector.load %arg3[%c0, %c0_0] : memref<128x128xbf16, #tpu.memory_space<vmem>>, vector<128x128xbf16>
    %c0_1 = arith.constant 0 : index
    %c0_2 = arith.constant 0 : index
    %1 = vector.load %arg4[%c0_1, %c0_2] : memref<128x128xbf16, #tpu.memory_space<vmem>>, vector<128x128xbf16>
    %2 = arith.addf %0, %1 : vector<128x128xbf16>
    %c0_3 = arith.constant 0 : index
    %c0_4 = arith.constant 0 : index
    %3 = vector.load %arg5[%c0_3, %c0_4] : memref<128x128xbf16, #tpu.memory_space<vmem>>, vector<128x128xbf16>
    %cst = arith.constant dense<0.000000e+00> : vector<128x128xf32>
    %4 = tpu.matmul %2, %3, %cst {dimension_numbers = #tpu.dot_dimension_numbers<[1], [0], [0], [1], [0, 0, 1, 1], [], []>} : vector<128x128xbf16>, vector<128x128xbf16>, vector<128x128xf32> -> vector<128x128xf32>
    %c0_5 = arith.constant 0 : index
    %c0_6 = arith.constant 0 : index
    %5 = vector.load %arg6[%c0_5, %c0_6] : memref<1x128xf32, #tpu.memory_space<vmem>>, vector<1x128xf32>
    %6 = vector.broadcast %5 : vector<1x128xf32> to vector<128x128xf32>
    %7 = arith.mulf %4, %6 : vector<128x128xf32>
    %c0_7 = arith.constant 0 : index
    %c0_8 = arith.constant 0 : index
    %8 = vector.load %arg7[%c0_7, %c0_8] : memref<1x128xf32, #tpu.memory_space<vmem>>, vector<1x128xf32>
    %9 = vector.broadcast %8 : vector<1x128xf32> to vector<128x128xf32>
    %10 = arith.addf %7, %9 : vector<128x128xf32>
    %c0_9 = arith.constant 0 : index
    %c0_10 = arith.constant 0 : index
    %11 = vector.load %arg8[%c0_9, %c0_10] : memref<128x128xf32, #tpu.memory_space<vmem>>, vector<128x128xf32>
    tpu.vector_store %arg8[%c0_9, %c0_10], %10 {strides = array<i32>} : memref<128x128xf32, #tpu.memory_space<vmem>>, vector<128x128xf32>,
    return
  }
  func.func @transform_0(%arg0: i32, %arg1: i32, %arg2: i32) -> (i32, i32) {
    %c0_i32 = arith.constant 0 : i32
    return %arg0, %arg2 : i32, i32
  }
  func.func @transform_1(%arg0: i32, %arg1: i32, %arg2: i32) -> (i32, i32) {
    %c0_i32 = arith.constant 0 : i32
    return %arg0, %arg2 : i32, i32
  }
  func.func @transform_2(%arg0: i32, %arg1: i32, %arg2: i32) -> (i32, i32) {
    %c0_i32 = arith.constant 0 : i32
    return %arg2, %arg1 : i32, i32
  }
  func.func @transform_3(%arg0: i32, %arg1: i32, %arg2: i32) -> (i32, i32) {
    %c0_i32 = arith.constant 0 : i32
    %c0_i32_0 = arith.constant 0 : i32
    return %c0_i32, %arg1 : i32, i32
  }
  func.func @transform_4(%arg0: i32, %arg1: i32, %arg2: i32) -> (i32, i32) {
    %c0_i32 = arith.constant 0 : i32
    %c0_i32_0 = arith.constant 0 : i32
    return %c0_i32, %arg1 : i32, i32
  }
  func.func @transform_5(%arg0: i32, %arg1: i32, %arg2: i32) -> (i32, i32) {
    %c0_i32 = arith.constant 0 : i32
    return %arg0, %arg1 : i32, i32
  }
}

</mosaic_0001>

<bundles_post_ra>
// kernel: danet_head_forward.13
= control target key start
LH: loop header
LB: loop body
LE: loop exit
PB: predicated region body
PF: predicated region fallthrough
CT: control target
= control target key end

     0   :  { %s519_s9 = smov 0   ;;  %s521_s10 = smov 0   ;;  %s582_s0 = inlined_call_operand.vmem [shape: bf16[2,16,16], index: 0, kind: input, shape index: {}]   ;;  %s583_s1 = inlined_call_operand.vmem [shape: bf16[2,64,16], index: 1, kind: input, shape index: {}]   ;;  %s584_s2 = inlined_call_operand.vmem [shape: bf16[2,64,16], index: 2, kind: output, shape index: {}]  }
   0x1   :  { %s523_s11 = smov 0  }
   0x2 LB: > { %s24_s12 = sadd.s32 1, %s498_s10  ;;  %p412_p0 = scmp.ge.s32.totalorder %s502_s11, 1  ;;  %s502_s11 = sphi %s523_s11, %s12_s11   ;;  %s498_s10 = sphi %s521_s10, %s586_s10   ;;  %s494_s9 = sphi %s519_s9, %s585_s9  }
   0x3   : > { %p26_p1 = scmp.ge.s32.totalorder %s24_s12, 2  ;;  %p143_p2 = scmp.lt.s32.totalorder %s502_s11, 3 }
   0x5   : > { %s588_s12 = smov (%p26_p1, %s24_s12), 0  ;;  %p144_p3 = pnand %p412_p0, %p143_p2 }
   0x6   : > { %p178_p4 = scmp.lt.s32.totalorder (!%p144_p3), %s494_s9, 1 }
   0x7   : > { %147 = sbr.rel (%p144_p3) target bundleno = 171 (0xab), region = 28 }
   0xc   : > { %s590_s9 = smov (!%p178_p4, %s494_s9), 1  ;;  %vm247_vm0 = vcmask 130048   ;;  %vm300_vm1 = vcmask 125952  }
   0xd   : > { %s445_s13 = sshll.u32 %s590_s9, 3  ;;  %s446_s17 = sshll.u32 %s590_s9, 5 }
   0xe   : > { %s182_s16 = scalar_lea.vmem %s582_s0, %s445_s13  ;;  %s191_s20 = scalar_lea.vmem %s583_s1, %s446_s17 }
   0xf   : > { %v452_v0 = vld [vmem:[%s182_s16] sm:$0xff]  ;;  %v449_v3 = vld [vmem:[%s191_s20 + $0x8] sm:$0xff]  ;;  %v450_v4 = vld [vmem:[%s191_s20 + $0x10] sm:$0xff]  ;;  %s555_s23 = scalar_lea.vmem %s584_s2, %s446_s17 }
  0x10   : > { %v261_v1 = vsel %vm247_vm0, %v452_v0, 0  ;;  %v448_v2 = vld [vmem:[%s191_s20] sm:$0xff]  ;;  %v451_v5 = vld [vmem:[%s191_s20 + $0x18] sm:$0xff]  ;;  %v206_v7 = vld [vmem:[%s191_s20 + $0x8] sm:$0xff]  }
  0x11   : > { %270 = vmatpush.bf16.xpose.msra.mxu0 %v261_v1  ;;  %453 = vmatpush.bf16.xpose.msra.mxu1 %v261_v1  ;;  %v204_v6 = vld [vmem:[%s191_s20] sm:$0xff]   ;;  %v216_v9 = vunpack.c.l.bf16 %v206_v7  ;;  %v208_v14 = vld [vmem:[%s191_s20 + $0x10] sm:$0xff]   ;;  %v210_v15 = vld [vmem:[%s191_s20 + $0x18] sm:$0xff]   ;;  %v217_v21 = vunpack.c.h.bf16 %v206_v7 }
  0x12   : > { %454 = vmatpush.bf16.xpose.msra.mxu2 %v261_v1  ;;  %455 = vmatpush.bf16.xpose.msra.mxu3 %v261_v1  ;;  %v214_v8 = vunpack.c.l.bf16 %v204_v6  ;;  %v218_v18 = vunpack.c.l.bf16 %v208_v14  ;;  %v220_v19 = vunpack.c.l.bf16 %v210_v15  ;;  %v215_v20 = vunpack.c.h.bf16 %v204_v6 }
  0x13   : > { %v219_v34 = vunpack.c.h.bf16 %v208_v14  ;;  %v221_v35 = vunpack.c.h.bf16 %v210_v15 }
  0x18   : > { %439 = vmatmul.msk.bf16.vlgmr.msra.gmra.mxu0 %vm247_vm0, %v448_v2  ;;  %440 = vmatmul.msk.bf16.vlgmr.msra.gmra.mxu1 %vm247_vm0, %v449_v3 }
  0x19   : > { %441 = vmatmul.msk.bf16.vlgmr.msra.gmra.mxu2 %vm247_vm0, %v450_v4  ;;  %442 = vmatmul.msk.bf16.vlgmr.msra.gmra.mxu3 %vm247_vm0, %v451_v5 }
  0x95   : > { %v272_v10 = vpop.f32.mrf.mxu0  ;;  %v277_v11 = vpop.f32.mrf.mxu1 }
  0x96   : > { %v273_v12 = vadd.f32 %v272_v10, %v214_v8  ;;  %v278_v13 = vadd.f32 %v277_v11, %v216_v9 }
  0x98   : > { %v292_v16 = vpack.c.bf16 %v273_v12, %v273_v12  ;;  %v294_v17 = vpack.c.bf16 %v278_v13, %v278_v13 }
  0x9a   : > { %301 = vst.msk [vmem:[%s555_s23] sm:$0xf] %vm300_vm1, %v292_v16 }
  0x9b   : > { %303 = vst.msk [vmem:[%s555_s23 + $0x8] sm:$0xf] %vm300_vm1, %v294_v17 }
  0x9c   : > { %v282_v22 = vpop.f32.mrf.mxu2  ;;  %v287_v23 = vpop.f32.mrf.mxu3 }
  0x9d   : > { %v283_v24 = vadd.f32 %v282_v22, %v218_v18  ;;  %v288_v25 = vadd.f32 %v287_v23, %v220_v19  ;;  %v274_v26 = vpop.f32.mrf.mxu0  ;;  %v279_v27 = vpop.f32.mrf.mxu1 }
  0x9e   : > { %v275_v28 = vadd.f32 %v274_v26, %v215_v20  ;;  %v280_v29 = vadd.f32 %v279_v27, %v217_v21 }
  0x9f   : > { %v296_v30 = vpack.c.bf16 %v283_v24, %v283_v24  ;;  %v298_v31 = vpack.c.bf16 %v288_v25, %v288_v25 }
  0xa0   : > { %v293_v32 = vpack.c.bf16 %v275_v28, %v275_v28  ;;  %v295_v33 = vpack.c.bf16 %v280_v29, %v280_v29 }
  0xa1   : > { %305 = vst.msk [vmem:[%s555_s23 + $0x10] sm:$0xf] %vm300_vm1, %v296_v30 }
  0xa2   : > { %307 = vst.msk [vmem:[%s555_s23 + $0x18] sm:$0xf] %vm300_vm1, %v298_v31 }
  0xa3   : > { %302 = vst.msk [vmem:[%s555_s23 + $0x4] sm:$0xf] %vm300_vm1, %v293_v32 }
  0xa4   : > { %304 = vst.msk [vmem:[%s555_s23 + $0xc] sm:$0xf] %vm300_vm1, %v295_v33  ;;  %v284_v36 = vpop.f32.mrf.mxu2  ;;  %v289_v37 = vpop.f32.mrf.mxu3 }
  0xa5   : > { %v285_v38 = vadd.f32 %v284_v36, %v219_v34  ;;  %v290_v39 = vadd.f32 %v289_v37, %v221_v35 }
  0xa7   : > { %v297_v40 = vpack.c.bf16 %v285_v38, %v285_v38  ;;  %v299_v41 = vpack.c.bf16 %v290_v39, %v290_v39 }
  0xa9   : > { %306 = vst.msk [vmem:[%s555_s23 + $0x14] sm:$0xf] %vm300_vm1, %v297_v40 }
  0xaa   : > { %308 = vst.msk [vmem:[%s555_s23 + $0x1c] sm:$0xf] %vm300_vm1, %v299_v41 }
  0xab PF: > { %s12_s11 = sadd.s32 1, %s502_s11   ;;  %s585_s9 = smov %s498_s10 }
  0xac   : > { %p9_p5 = scmp.ge.s32.totalorder %s12_s11, 4   ;;  %s586_s10 = smov %s588_s12 }
  0xae   :  { %11 = sbr.rel (!%p9_p5) target bundleno = 2 (0x2), region = 61 }

// kernel: danet_head_forward.12
= control target key start
LH: loop header
LB: loop body
LE: loop exit
PB: predicated region body
PF: predicated region fallthrough
CT: control target
= control target key end

     0   :  { %s461_s6 = smov 0   ;;  %s463_s7 = smov 0   ;;  %s510_s0 = inlined_call_operand.vmem [shape: bf16[2,64,16], index: 0, kind: input, shape index: {}]   ;;  %s511_s1 = inlined_call_operand.vmem [shape: f32[2,16,16], index: 1, kind: output, shape index: {}]  }
   0x1   :  { %s465_s8 = smov 0  }
   0x2 LB: > { %s23_s9 = sadd.s32 1, %s444_s7  ;;  %p362_p0 = scmp.ge.s32.totalorder %s448_s8, 1  ;;  %s448_s8 = sphi %s465_s8, %s11_s8   ;;  %s444_s7 = sphi %s463_s7, %s513_s7   ;;  %s440_s6 = sphi %s461_s6, %s512_s6  }
   0x3   : > { %p25_p1 = scmp.ge.s32.totalorder %s23_s9, 2  ;;  %p106_p2 = scmp.lt.s32.totalorder %s448_s8, 3 }
   0x5   : > { %s515_s9 = smov (%p25_p1, %s23_s9), 0  ;;  %p107_p3 = pnand %p362_p0, %p106_p2 }
   0x6   : > { %p131_p4 = scmp.lt.s32.totalorder (!%p107_p3), %s440_s6, 1 }
   0x7   : > { %110 = sbr.rel (%p107_p3) target bundleno = 717 (0x2cd), region = 24 }
   0xc   : > { %s517_s6 = smov (!%p131_p4, %s440_s6), 1  ;;  %vm150_vm0 = vcmask 130048   ;;  %v450_v4 = vmov 0.0   ;;  %vm203_vm1 = vcmask 523264  }
   0xd   : > { %s386_s10 = sshll.u32 %s517_s6, 5  ;;  %151 = vst.msk [vmem:[#allocation2] sm:$0xff] %vm150_vm0, %v450_v4  ;;  %s387_s14 = sshll.u32 %s517_s6, 4 }
   0xe   : > { %s138_s13 = scalar_lea.vmem %s510_s0, %s386_s10  ;;  %152 = vst.msk [vmem:[#allocation2 + $0x8] sm:$0xff] %vm150_vm0, %v450_v4  ;;  %s144_s17 = scalar_lea.vmem %s511_s1, %s387_s14 }
   0xf   : > { %v388_v0 = vld [vmem:[%s138_s13] sm:$0xff]  ;;  %v391_v1 = vld [vmem:[%s138_s13 + $0x18] sm:$0xff]  ;;  %v390_v2 = vld [vmem:[%s138_s13 + $0x10] sm:$0xff] }
  0x10   : > { %187 = vxpose.xlu0.c.b16.start [1/4] (short) (narrow) %v388_v0, 16  ;;  %211 = vmatpush.bf16.msra.mxu0 %v391_v1  ;;  %v389_v3 = vld [vmem:[%s138_s13 + $0x8] sm:$0xff] }
  0x14   : > { %212 = vmatpush.bf16.msra.mxu0 %v390_v2  ;;  %v161_v6 = vld [vmem:[#allocation2] sm:$0xff] }
  0x15   : > { %v162_v9 = vld [vmem:[#allocation2 + $0x8] sm:$0xff] }
  0x18   : > { %213 = vmatpush.bf16.msra.mxu0 %v389_v3 }
  0x1c   : > { %214 = vmatpush.bf16.msra.mxu0 %v388_v0 }
  0x20   : > { %188 = vxpose.xlu0.c.b16.cont [2/4] (short) (narrow) %v389_v3, 16 }
  0x30   : > { %189 = vxpose.xlu0.c.b16.cont [3/4] (short) (narrow) %v390_v2, 16 }
  0x40   : > { %190 = vxpose.xlu0.c.b16.end [4/4] (short) (narrow) %v391_v1, 16 }
  0xbc   : > { %v195_v5 = vpop.trf.xlu0 }
  0xbd   : > { %383 = vmatmul.msk.bf16.vlgmr.msra.gmra.mxu0 %vm203_vm1, %v195_v5 }
 0x13a   : > { %v216_v7 = vpop.f32.mrf.mxu0 }
 0x13b   : > { %v221_v8 = vadd.f32 %v216_v7, %v161_v6 }
 0x13d   : > { %224 = vst.msk [vmem:[#allocation2] sm:$0xff] %vm150_vm0, %v221_v8 }
 0x142   : > { %v218_v10 = vpop.f32.mrf.mxu0 }
 0x143   : > { %v222_v11 = vadd.f32 %v218_v10, %v162_v9 }
 0x144   : > { %v229_v12 = vld [vmem:[#allocation2] sm:$0xff] }
 0x145   : > { %225 = vst.msk [vmem:[#allocation2 + $0x8] sm:$0xff] %vm150_vm0, %v222_v11  ;;  %v231_v13 = vsel %vm150_vm0, %v229_v12, -inf }
 0x146   : > { %232 = vmax.xlane.f32.xlu1 %v231_v13 }
 0x14c   : > { %v230_v14 = vld [vmem:[#allocation2 + $0x8] sm:$0xff] }
 0x14d   : > { %v234_v15 = vsel %vm150_vm0, %v230_v14, -inf }
 0x14e   : > { %235 = vmax.xlane.f32.xlu1 %v234_v15 }
 0x1b9   : > { %v233_v16 = vpop.xlane.xlu1 %232 }
 0x1ba   : > { %v237_v17 = vsub.f32 %v233_v16, %v229_v12 }
 0x1bc   : > { %v239_v18 = vsel %vm150_vm0, %v237_v17, -inf }
 0x1bd   : > { %240 = vmax.xlane.f32.xlu2 %v239_v18 }
 0x1c1   : > { %v236_v19 = vpop.xlane.xlu1 %235 }
 0x1c2   : > { %v238_v20 = vsub.f32 %v236_v19, %v230_v14 }
 0x1c4   : > { %v242_v21 = vsel %vm150_vm0, %v238_v20, -inf }
 0x1c5   : > { %243 = vmax.xlane.f32.xlu2 %v242_v21 }
 0x230   : > { %v241_v22 = vpop.xlane.xlu2 %240 }
 0x231   : > { %v245_v23 = vsub.f32 %v237_v17, %v241_v22 }
 0x233   : > { %v247_v24 = vmul.f32 1.442695, %v245_v23 }
 0x235   : > { %418 = vpow2.f32 %v247_v24 }
 0x238   : > { %v244_v25 = vpop.xlane.xlu2 %243 }
 0x239   : > { %v246_v26 = vsub.f32 %v238_v20, %v244_v25 }
 0x23b   : > { %v419_v27 = vpop.eup %418  ;;  %v249_v28 = vmul.f32 1.442695, %v246_v26 }
 0x23c   : > { %v251_v29 = vsel %vm150_vm0, %v419_v27, 0.0 }
 0x23d   : > { %420 = vpow2.f32 %v249_v28  ;;  %252 = vadd.xlane.f32.xlu1 %v251_v29 }
 0x243   : > { %v421_v30 = vpop.eup %420 }
 0x244   : > { %v254_v31 = vsel %vm150_vm0, %v421_v30, 0.0 }
 0x245   : > { %255 = vadd.xlane.f32.xlu2 %v254_v31 }
 0x2b0   : > { %v253_v32 = vpop.xlane.xlu1 %252 }
 0x2b1   : > { %422 = vrcp.f32 %v253_v32  ;;  %v268_v37 = vand.u32 2147483648, %v253_v32  ;;  %v266_v39 = vand.u32 2147483647, %v253_v32  ;;  %vm262_vm3 = vweird.f32 %v253_v32 }
 0x2b3   : > { %v269_v42 = vor.u32 1.1754944e-38, %v268_v37  ;;  %vm267_vm5 = vcmp.eq.f32.partialorder %v266_v39, 8.507059e+37 }
 0x2b7   : > { %v423_v33 = vpop.eup %422 }
 0x2b8   : > { %v258_v34 = vmul.f32 %v423_v33, %v253_v32  ;;  %v256_v35 = vpop.xlane.xlu2 %255  ;;  %vm263_vm2 = vweird.f32 %v423_v33 }
 0x2b9   : > { %424 = vrcp.f32 %v256_v35  ;;  %vm264_vm4 = vmor %vm262_vm3, %vm263_vm2  ;;  %v282_v48 = vand.u32 2147483648, %v256_v35  ;;  %v280_v50 = vand.u32 2147483647, %v256_v35  ;;  %vm276_vm7 = vweird.f32 %v256_v35 }
 0x2ba   : > { %v259_v36 = vsub.f32 1.0, %v258_v34 }
 0x2bb   : > { %v283_v52 = vor.u32 1.1754944e-38, %v282_v48  ;;  %vm281_vm9 = vcmp.eq.f32.partialorder %v280_v50, 8.507059e+37 }
 0x2bc   : > { %v260_v38 = vmul.f32 %v423_v33, %v259_v36 }
 0x2be   : > { %v261_v40 = vadd.f32 %v423_v33, %v260_v38 }
 0x2bf   : > { %v425_v41 = vpop.eup %424 }
 0x2c0   : > { %v265_v43 = vsel %vm264_vm4, %v423_v33, %v261_v40  ;;  %v272_v44 = vmul.f32 %v425_v41, %v256_v35  ;;  %vm277_vm6 = vweird.f32 %v425_v41 }
 0x2c1   : > { %v270_v45 = vsel %vm267_vm5, %v269_v42, %v265_v43  ;;  %vm278_vm8 = vmor %vm276_vm7, %vm277_vm6 }
 0x2c2   : > { %v285_v46 = vmul.f32 %v419_v27, %v270_v45  ;;  %v273_v47 = vsub.f32 1.0, %v272_v44 }
 0x2c4   : > { %287 = vst.msk [vmem:[%s144_s17] sm:$0xff] %vm150_vm0, %v285_v46  ;;  %v274_v49 = vmul.f32 %v425_v41, %v273_v47 }
 0x2c6   : > { %v275_v51 = vadd.f32 %v425_v41, %v274_v49 }
 0x2c8   : > { %v279_v53 = vsel %vm278_vm8, %v425_v41, %v275_v51 }
 0x2c9   : > { %v284_v54 = vsel %vm281_vm9, %v283_v52, %v279_v53 }
 0x2ca   : > { %v286_v55 = vmul.f32 %v421_v30, %v284_v54 }
 0x2cc   : > { %288 = vst.msk [vmem:[%s144_s17 + $0x8] sm:$0xff] %vm150_vm0, %v286_v55 }
 0x2cd PF: > { %s11_s8 = sadd.s32 1, %s448_s8   ;;  %s512_s6 = smov %s444_s7 }
 0x2ce   : > { %p8_p5 = scmp.ge.s32.totalorder %s11_s8, 4   ;;  %s513_s7 = smov %s515_s9 }
 0x2d0   :  { %10 = sbr.rel (!%p8_p5) target bundleno = 2 (0x2), region = 62 }

// kernel: danet_head_forward.8
= control target key start
LH: loop header
LB: loop body
LE: loop exit
PB: predicated region body
PF: predicated region fallthrough
CT: control target
= control target key end

     0   :  { %s1148_s15 = smov 0   ;;  %s1150_s16 = smov 0   ;;  %s1303_s0 = inlined_call_operand.vmem [shape: bf16[128,640], index: 0, kind: input, shape index: {}]   ;;  %s1304_s1 = inlined_call_operand.vmem [shape: bf16[640,128], index: 1, kind: input, shape index: {}]   ;;  %s1305_s2 = inlined_call_operand.vmem [shape: f32[1,128], index: 2, kind: input, shape index: {}]   ;;  %s1306_s3 = inlined_call_operand.vmem [shape: f32[1,128], index: 3, kind: input, shape index: {}]   ;;  %s1307_s4 = inlined_call_operand.vmem [shape: bf16[128,128], index: 4, kind: output, shape index: {}]  }
   0x1   :  { %s1152_s17 = smov 0   ;;  %s1154_s18 = smov 0  }
   0x2   :  { %s1156_s19 = smov 0  }
   0x3 LB: > { %s26_s20 = sadd.s32 1, %s1116_s18  ;;  %p49_p1 = scmp.ne.s32.totalorder %s1108_s16, %s1104_s15  ;;  %s1120_s19 = sphi %s1156_s19, %s14_s19   ;;  %s1116_s18 = sphi %s1154_s18, %s1311_s18   ;;  %s1112_s17 = sphi %s1152_s17, %s1310_s17   ;;  %s1108_s16 = sphi %s1150_s16, %s1309_s16   ;;  %s1104_s15 = sphi %s1148_s15, %s1308_s15  }
   0x4   : > { %p27_p0 = scmp.ge.s32.totalorder %s26_s20, 5  ;;  %p50_p2 = scmp.eq.s32.totalorder %s1120_s19, 0 }
   0x5   : > { %s42_s22 = sadd.s32 1, %s1108_s16  ;;  %p875_p5 = scmp.ge.s32.totalorder %s1120_s19, 5 }
   0x6   : > { %s1313_s20 = smov (%p27_p0, %s26_s20), 0  ;;  %p51_p3 = por %p50_p2, %p49_p1 }
   0x7   : > { %s38_s21 = ssub.s32 %s1116_s18, %s1313_s20  ;;  %195 = sbr.rel (%p875_p5) target bundleno = 32 (0x20), region = 24 }
   0x8   : > { %p40_p4 = scmp.eq.s32.totalorder %s38_s21, 0 }
   0xa   : > { %s1183_s23 = scalar_select %p40_p4, %s1108_s16, %s42_s22  }
   0xc   : > { %198 = sbr.rel (!%p51_p3) target bundleno = 32 (0x20), region = 28  ;;  %s200_s24 = sand.u32 (%p51_p3), 1, %s1108_s16  }
   0xd   : > { %s877_s25 = sshll.u32 (%p51_p3), %s1116_s18, 2  ;;  %s876_s26 = sshll.u32 (%p51_p3), %s200_s24, 6 }
   0xe   : > { %s1191_s29 = scalar_lea.vmem (%p51_p3), %s1303_s0, %s877_s25  ;;  %s202_s30 = scalar_lea.vmem (%p51_p3), [#allocation3], %s876_s26 }
   0xf   : > { %v224_v0 = vld [vmem:[%s1191_s29] sm:$0xf] (%p51_p3)  ;;  %v226_v1 = vld [vmem:[%s1191_s29 + $0x14] sm:$0xf] (%p51_p3)  ;;  %v228_v2 = vld [vmem:[%s1191_s29 + $0x28] sm:$0xf] (%p51_p3) }
  0x10   : > { %225 = vst [vmem:[%s202_s30] sm:$0xf] (%p51_p3), %v224_v0  ;;  %v230_v3 = vld [vmem:[%s1191_s29 + $0x3c] sm:$0xf] (%p51_p3)  ;;  %v232_v4 = vld [vmem:[%s1191_s29 + $0x50] sm:$0xf] (%p51_p3) }
  0x11   : > { %227 = vst [vmem:[%s202_s30 + $0x4] sm:$0xf] %v226_v1  ;;  %v234_v5 = vld [vmem:[%s1191_s29 + $0x64] sm:$0xf]  ;;  %v236_v6 = vld [vmem:[%s1191_s29 + $0x78] sm:$0xf] }
  0x12   : > { %229 = vst [vmem:[%s202_s30 + $0x8] sm:$0xf] %v228_v2  ;;  %v238_v7 = vld [vmem:[%s1191_s29 + $0x8c] sm:$0xf]  ;;  %v240_v8 = vld [vmem:[%s1191_s29 + $0xa0] sm:$0xf] }
  0x13   : > { %231 = vst [vmem:[%s202_s30 + $0xc] sm:$0xf] %v230_v3  ;;  %v242_v9 = vld [vmem:[%s1191_s29 + $0xb4] sm:$0xf]  ;;  %v244_v10 = vld [vmem:[%s1191_s29 + $0xc8] sm:$0xf] }
  0x14   : > { %233 = vst [vmem:[%s202_s30 + $0x10] sm:$0xf] %v232_v4  ;;  %v246_v11 = vld [vmem:[%s1191_s29 + $0xdc] sm:$0xf]  ;;  %v248_v12 = vld [vmem:[%s1191_s29 + $0xf0] sm:$0xf] }
  0x15   : > { %235 = vst [vmem:[%s202_s30 + $0x14] sm:$0xf] %v234_v5  ;;  %v250_v13 = vld [vmem:[%s1191_s29 + $0x104] sm:$0xf]  ;;  %v252_v14 = vld [vmem:[%s1191_s29 + $0x118] sm:$0xf] }
  0x16   : > { %237 = vst [vmem:[%s202_s30 + $0x18] sm:$0xf] %v236_v6  ;;  %v254_v15 = vld [vmem:[%s1191_s29 + $0x12c] sm:$0xf] }
  0x17   : > { %239 = vst [vmem:[%s202_s30 + $0x1c] sm:$0xf] %v238_v7 }
  0x18   : > { %241 = vst [vmem:[%s202_s30 + $0x20] sm:$0xf] %v240_v8 }
  0x19   : > { %243 = vst [vmem:[%s202_s30 + $0x24] sm:$0xf] %v242_v9 }
  0x1a   : > { %245 = vst [vmem:[%s202_s30 + $0x28] sm:$0xf] %v244_v10 }
  0x1b   : > { %247 = vst [vmem:[%s202_s30 + $0x2c] sm:$0xf] %v246_v11 }
  0x1c   : > { %249 = vst [vmem:[%s202_s30 + $0x30] sm:$0xf] %v248_v12 }
  0x1d   : > { %251 = vst [vmem:[%s202_s30 + $0x34] sm:$0xf] %v250_v13 }
  0x1e   : > { %253 = vst [vmem:[%s202_s30 + $0x38] sm:$0xf] %v252_v14 }
  0x1f   : > { %255 = vst [vmem:[%s202_s30 + $0x3c] sm:$0xf] %v254_v15 }
  0x20 PF: > { %p878_p6 = scmp.ge.s32.totalorder %s1120_s19, 1  ;;  %p322_p7 = scmp.lt.s32.totalorder %s1120_s19, 6 }
  0x22   : > { %p323_p8 = pnand %p878_p6, %p322_p7 }
  0x23   : > { %s880_s5 = sshll.u32 (!%p323_p8), %s1112_s17, 4  ;;  %s329_s10 = sand.u32 (!%p323_p8), 1, %s1104_s15  }
  0x24   : > { %326 = sbr.rel (%p323_p8) target bundleno = 290 (0x122), region = 73  ;;  %p373_p9 = scmp.lt.s32.totalorder (!%p323_p8), %s880_s5, 79 }
  0x25   : > { %s879_s11 = sshll.u32 (!%p323_p8), %s329_s10, 6  ;;  %p946_p10 = scmp.ne.s32.totalorder (!%p323_p8), %s1112_s17, 0 }
  0x26   : > { %s331_s12 = scalar_lea.vmem (!%p323_p8), [#allocation3], %s879_s11 }
  0x29   : > { %s1315_s5 = smov (!%p373_p9, %s880_s5), 79  ;;  %v952_v24 = vld [vmem:[%s331_s12] sm:$0xff]  ;;  %v954_v25 = vld [vmem:[%s331_s12 + $0x10] sm:$0xff]  ;;  %v953_v28 = vld [vmem:[%s331_s12 + $0x8] sm:$0xff] }
  0x2a   : > { %s881_s6 = sshll.u32 %s1315_s5, 2  ;;  %v956_v26 = vld [vmem:[%s331_s12 + $0x20] sm:$0xff]  ;;  %v958_v27 = vld [vmem:[%s331_s12 + $0x30] sm:$0xff]  ;;  %v955_v29 = vld [vmem:[%s331_s12 + $0x18] sm:$0xff] }
  0x2b   : > { %s1215_s9 = scalar_lea.vmem %s1304_s1, %s881_s6  ;;  %v957_v30 = vld [vmem:[%s331_s12 + $0x28] sm:$0xff]  ;;  %v959_v31 = vld [vmem:[%s331_s12 + $0x38] sm:$0xff] }
  0x2c   : > { %v967_v16 = vld [vmem:[%s1215_s9 + $0x38] sm:$0xff]  ;;  %v966_v17 = vld [vmem:[%s1215_s9 + $0x30] sm:$0xff]  ;;  %v965_v18 = vld [vmem:[%s1215_s9 + $0x28] sm:$0xff] }
  0x2d   : > { %524 = vmatpush.bf16.msra.mxu0 %v967_v16  ;;  %1015 = vmatpush.bf16.msra.mxu1 %v967_v16  ;;  %v964_v19 = vld [vmem:[%s1215_s9 + $0x20] sm:$0xff]  ;;  %v963_v20 = vld [vmem:[%s1215_s9 + $0x18] sm:$0xff]  ;;  %v962_v21 = vld [vmem:[%s1215_s9 + $0x10] sm:$0xff] }
  0x2e   : > { %1016 = vmatpush.bf16.msra.mxu2 %v967_v16  ;;  %1017 = vmatpush.bf16.msra.mxu3 %v967_v16  ;;  %v961_v22 = vld [vmem:[%s1215_s9 + $0x8] sm:$0xff]  ;;  %v960_v23 = vld [vmem:[%s1215_s9] sm:$0xff] }
  0x31   : > { %525 = vmatpush.bf16.msra.mxu0 %v966_v17  ;;  %1018 = vmatpush.bf16.msra.mxu1 %v966_v17 }
  0x32   : > { %1019 = vmatpush.bf16.msra.mxu2 %v966_v17  ;;  %1020 = vmatpush.bf16.msra.mxu3 %v966_v17 }
  0x35   : > { %526 = vmatpush.bf16.msra.mxu0 %v965_v18  ;;  %1021 = vmatpush.bf16.msra.mxu1 %v965_v18 }
  0x36   : > { %1022 = vmatpush.bf16.msra.mxu2 %v965_v18  ;;  %1023 = vmatpush.bf16.msra.mxu3 %v965_v18 }
  0x39   : > { %527 = vmatpush.bf16.msra.mxu0 %v964_v19  ;;  %1024 = vmatpush.bf16.msra.mxu1 %v964_v19 }
  0x3a   : > { %1025 = vmatpush.bf16.msra.mxu2 %v964_v19  ;;  %1026 = vmatpush.bf16.msra.mxu3 %v964_v19 }
  0x3d   : > { %528 = vmatpush.bf16.msra.mxu0 %v963_v20  ;;  %1027 = vmatpush.bf16.msra.mxu1 %v963_v20 }
  0x3e   : > { %1028 = vmatpush.bf16.msra.mxu2 %v963_v20  ;;  %1029 = vmatpush.bf16.msra.mxu3 %v963_v20 }
  0x41   : > { %529 = vmatpush.bf16.msra.mxu0 %v962_v21  ;;  %1030 = vmatpush.bf16.msra.mxu1 %v962_v21 }
  0x42   : > { %1031 = vmatpush.bf16.msra.mxu2 %v962_v21  ;;  %1032 = vmatpush.bf16.msra.mxu3 %v962_v21 }
  0x45   : > { %530 = vmatpush.bf16.msra.mxu0 %v961_v22  ;;  %1033 = vmatpush.bf16.msra.mxu1 %v961_v22 }
  0x46   : > { %1034 = vmatpush.bf16.msra.mxu2 %v961_v22  ;;  %1035 = vmatpush.bf16.msra.mxu3 %v961_v22 }
  0x49   : > { %531 = vmatpush.bf16.msra.mxu0 %v960_v23  ;;  %1036 = vmatpush.bf16.msra.mxu1 %v960_v23 }
  0x4a   : > { %1037 = vmatpush.bf16.msra.mxu2 %v960_v23  ;;  %1038 = vmatpush.bf16.msra.mxu3 %v960_v23 }
  0x4c   : > { %532 = vmatmul.bf16.vlgmr.msra.gmra.mxu0 %v952_v24  ;;  %542 = vmatmul.bf16.vlgmr.msra.gmra.mxu1 %v954_v25 }
  0x4d   : > { %552 = vmatmul.bf16.vlgmr.msra.gmra.mxu2 %v956_v26  ;;  %562 = vmatmul.bf16.vlgmr.msra.gmra.mxu3 %v958_v27 }
  0x5c   : > { %537 = vmatmul.bf16.gmra.mxu0 %v953_v28  ;;  %547 = vmatmul.bf16.gmra.mxu1 %v955_v29 }
  0x5d   : > { %557 = vmatmul.bf16.gmra.mxu2 %v957_v30  ;;  %567 = vmatmul.bf16.gmra.mxu3 %v959_v31 }
  0xc9   : > { %v533_v32 = vpop.f32.mrf.mxu0  ;;  %v543_v33 = vpop.f32.mrf.mxu1 }
  0xd0   : > { %v553_v34 = vpop.f32.mrf.mxu2  ;;  %v1226_v35 = vpop.f32.mrf.mxu3 }
  0xd1   : > { %v535_v36 = vpop.f32.mrf.mxu0  ;;  %v545_v37 = vpop.f32.mrf.mxu1 }
  0xd8   : > { %v555_v38 = vpop.f32.mrf.mxu2  ;;  %v1228_v39 = vpop.f32.mrf.mxu3 }
  0xd9   : > { %v538_v40 = vpop.f32.mrf.mxu0  ;;  %v548_v41 = vpop.f32.mrf.mxu1 }
  0xe0   : > { %v558_v42 = vpop.f32.mrf.mxu2  ;;  %v1230_v43 = vpop.f32.mrf.mxu3 }
  0xe1   : > { %v540_v44 = vpop.f32.mrf.mxu0  ;;  %v550_v45 = vpop.f32.mrf.mxu1 }
  0xe4   : > { %576 = sbr.rel (%p946_p10) target bundleno = 250 (0xfa), region = 81 }
  0xe8   : > { %v560_v46 = vpop.f32.mrf.mxu2  ;;  %v1232_v47 = vpop.f32.mrf.mxu3 }
  0xe9   : > { %v1122_v48 = vmov 0.0  }
  0xea   : > { %577 = vst [vmem:[#allocation2 + $0x30] sm:$0xff] %v1122_v48 }
  0xeb   : > { %578 = vst [vmem:[#allocation2] sm:$0xff] %v1122_v48 }
  0xec   : > { %579 = vst [vmem:[#allocation2 + $0x58] sm:$0xff] %v1122_v48 }
  0xed   : > { %580 = vst [vmem:[#allocation2 + $0x18] sm:$0xff] %v1122_v48 }
  0xee   : > { %581 = vst [vmem:[#allocation2 + $0x50] sm:$0xff] %v1122_v48 }
  0xef   : > { %582 = vst [vmem:[#allocation2 + $0x68] sm:$0xff] %v1122_v48 }
  0xf0   : > { %583 = vst [vmem:[#allocation2 + $0x8] sm:$0xff] %v1122_v48 }
  0xf1   : > { %584 = vst [vmem:[#allocation2 + $0x48] sm:$0xff] %v1122_v48 }
  0xf2   : > { %585 = vst [vmem:[#allocation2 + $0x40] sm:$0xff] %v1122_v48 }
  0xf3   : > { %586 = vst [vmem:[#allocation2 + $0x20] sm:$0xff] %v1122_v48 }
  0xf4   : > { %587 = vst [vmem:[#allocation2 + $0x10] sm:$0xff] %v1122_v48 }
  0xf5   : > { %588 = vst [vmem:[#allocation2 + $0x38] sm:$0xff] %v1122_v48 }
  0xf6   : > { %589 = vst [vmem:[#allocation2 + $0x60] sm:$0xff] %v1122_v48 }
  0xf7   : > { %590 = vst [vmem:[#allocation2 + $0x70] sm:$0xff] %v1122_v48 }
  0xf8   : > { %591 = vst [vmem:[#allocation2 + $0x78] sm:$0xff] %v1122_v48 }
  0xf9   : > { %592 = vst [vmem:[#allocation2 + $0x28] sm:$0xff] %v1122_v48 }
  0xfa PF: > { %v593_v49 = vld [vmem:[#allocation2 + $0x30] sm:$0xff]  ;;  %v594_v50 = vld [vmem:[#allocation2] sm:$0xff]  ;;  %v595_v51 = vld [vmem:[#allocation2 + $0x58] sm:$0xff]  ;;  %p947_p11 = scmp.ne.s32.totalorder %s1112_s17, 4 }
  0xfb   : > { %v609_v52 = vadd.f32 %v593_v49, %v533_v32  ;;  %v610_v53 = vadd.f32 %v594_v50, %v535_v36  ;;  %v611_v54 = vadd.f32 %v595_v51, %v538_v40  ;;  %v596_v55 = vld [vmem:[#allocation2 + $0x18] sm:$0xff]  ;;  %v597_v56 = vld [vmem:[#allocation2 + $0x50] sm:$0xff]  ;;  %v598_v57 = vld [vmem:[#allocation2 + $0x68] sm:$0xff] }
  0xfc   : > { %v612_v58 = vadd.f32 %v596_v55, %v540_v44  ;;  %v599_v59 = vld [vmem:[#allocation2 + $0x8] sm:$0xff]  ;;  %v613_v60 = vadd.f32 %v597_v56, %v543_v33  ;;  %v614_v62 = vadd.f32 %v598_v57, %v545_v37  ;;  %v601_v63 = vld [vmem:[#allocation2 + $0x40] sm:$0xff]  ;;  %v603_v3 = vld [vmem:[#allocation2 + $0x10] sm:$0xff] }
  0xfd   : > { %625 = vst [vmem:[#allocation2 + $0x30] sm:$0xff] %v609_v52  ;;  %v600_v61 = vld [vmem:[#allocation2 + $0x48] sm:$0xff]  ;;  %v615_v0 = vadd.f32 %v599_v59, %v548_v41  ;;  %v602_v1 = vld [vmem:[#allocation2 + $0x20] sm:$0xff]  ;;  %v617_v4 = vadd.f32 %v601_v63, %v553_v34  ;;  %v604_v5 = vld [vmem:[#allocation2 + $0x38] sm:$0xff]  ;;  %v619_v8 = vadd.f32 %v603_v3, %v558_v42 }
  0xfe   : > { %626 = vst [vmem:[#allocation2] sm:$0xff] %v610_v53  ;;  %v616_v2 = vadd.f32 %v600_v61, %v550_v45  ;;  %v618_v6 = vadd.f32 %v602_v1, %v555_v38  ;;  %v605_v7 = vld [vmem:[#allocation2 + $0x60] sm:$0xff]  ;;  %v606_v9 = vld [vmem:[#allocation2 + $0x70] sm:$0xff]  ;;  %v620_v10 = vadd.f32 %v604_v5, %v560_v46 }
  0xff   : > { %627 = vst [vmem:[#allocation2 + $0x58] sm:$0xff] %v611_v54  ;;  %v607_v11 = vld [vmem:[#allocation2 + $0x78] sm:$0xff]  ;;  %v621_v12 = vadd.f32 %v605_v7, %v1226_v35  ;;  %v622_v14 = vadd.f32 %v606_v9, %v1228_v39 }
 0x100   : > { %628 = vst [vmem:[#allocation2 + $0x18] sm:$0xff] %v612_v58  ;;  %v608_v13 = vld [vmem:[#allocation2 + $0x28] sm:$0xff]  ;;  %v623_v15 = vadd.f32 %v607_v11, %v1230_v43 }
 0x101   : > { %629 = vst [vmem:[#allocation2 + $0x50] sm:$0xff] %v613_v60  ;;  %v624_v16 = vadd.f32 %v608_v13, %v1232_v47 }
 0x102   : > { %630 = vst [vmem:[#allocation2 + $0x68] sm:$0xff] %v614_v62 }
 0x103   : > { %631 = vst [vmem:[#allocation2 + $0x8] sm:$0xff] %v615_v0 }
 0x104   : > { %632 = vst [vmem:[#allocation2 + $0x48] sm:$0xff] %v616_v2 }
 0x105   : > { %633 = vst [vmem:[#allocation2 + $0x40] sm:$0xff] %v617_v4 }
 0x106   : > { %634 = vst [vmem:[#allocation2 + $0x20] sm:$0xff] %v618_v6 }
 0x107   : > { %635 = vst [vmem:[#allocation2 + $0x10] sm:$0xff] %v619_v8 }
 0x108   : > { %636 = vst [vmem:[#allocation2 + $0x38] sm:$0xff] %v620_v10  ;;  %644 = sbr.rel (%p947_p11) target bundleno = 290 (0x122), region = 85 }
 0x109   : > { %637 = vst [vmem:[#allocation2 + $0x60] sm:$0xff] %v621_v12 }
 0x10a   : > { %638 = vst [vmem:[#allocation2 + $0x70] sm:$0xff] %v622_v14 }
 0x10b   : > { %639 = vst [vmem:[#allocation2 + $0x78] sm:$0xff] %v623_v15 }
 0x10c   : > { %640 = vst [vmem:[#allocation2 + $0x28] sm:$0xff] %v624_v16 }
 0x10d   : > { %v645_v17 = vld [vmem:[#allocation2 + $0x30] sm:$0xff]  ;;  %v646_v18 = vld [vmem:[#allocation2] sm:$0xff]  ;;  %v647_v21 = vld [vmem:[#allocation2 + $0x58] sm:$0xff] }
 0x10e   : > { %v1080_v19 = vld [vmem:[%s1305_s2] ss:$0 sm:$0xff]  ;;  %v648_v22 = vld [vmem:[#allocation2 + $0x18] sm:$0xff]  ;;  %v649_v23 = vld [vmem:[#allocation2 + $0x50] sm:$0xff] }
 0x10f   : > { %v1246_v20 = vld [vmem:[%s1306_s3] ss:$0 sm:$0xff]  ;;  %v665_v24 = vmul.f32 %v1080_v19, %v645_v17  ;;  %v666_v25 = vmul.f32 %v1080_v19, %v646_v18  ;;  %v667_v26 = vmul.f32 %v1080_v19, %v647_v21  ;;  %v668_v27 = vmul.f32 %v1080_v19, %v648_v22  ;;  %v650_v28 = vld [vmem:[#allocation2 + $0x68] sm:$0xff]  ;;  %v655_v49 = vld [vmem:[#allocation2 + $0x10] sm:$0xff] }
 0x110   : > { %v651_v29 = vld [vmem:[#allocation2 + $0x8] sm:$0xff]  ;;  %v669_v31 = vmul.f32 %v1080_v19, %v649_v23  ;;  %v670_v32 = vmul.f32 %v1080_v19, %v650_v28  ;;  %v653_v43 = vld [vmem:[#allocation2 + $0x40] sm:$0xff]  ;;  %v656_v50 = vld [vmem:[#allocation2 + $0x38] sm:$0xff]  ;;  %v675_v1 = vmul.f32 %v1080_v19, %v655_v49 }
 0x111   : > { %v652_v30 = vld [vmem:[#allocation2 + $0x48] sm:$0xff]  ;;  %v671_v33 = vmul.f32 %v1080_v19, %v651_v29  ;;  %v685_v35 = vadd.f32 %v1246_v20, %v665_v24  ;;  %v686_v36 = vadd.f32 %v1246_v20, %v666_v25  ;;  %v687_v37 = vadd.f32 %v1246_v20, %v667_v26  ;;  %v654_v44 = vld [vmem:[#allocation2 + $0x20] sm:$0xff]  ;;  %v658_v56 = vld [vmem:[#allocation2 + $0x70] sm:$0xff] }
 0x112   : > { %v672_v34 = vmul.f32 %v1080_v19, %v652_v30  ;;  %v688_v38 = vadd.f32 %v1246_v20, %v668_v27  ;;  %v689_v39 = vadd.f32 %v1246_v20, %v669_v31  ;;  %v690_v40 = vadd.f32 %v1246_v20, %v670_v32  ;;  %v657_v55 = vld [vmem:[#allocation2 + $0x60] sm:$0xff]  ;;  %v659_v61 = vld [vmem:[#allocation2 + $0x78] sm:$0xff] }
 0x113   : > { %v691_v41 = vadd.f32 %v1246_v20, %v671_v33  ;;  %v701_v45 = vmax.f32 %v685_v35, 0.0  ;;  %v702_v46 = vmax.f32 %v686_v36, 0.0  ;;  %v703_v47 = vmax.f32 %v687_v37, 0.0  ;;  %v660_v62 = vld [vmem:[#allocation2 + $0x28] sm:$0xff] }
 0x114   : > { %v692_v42 = vadd.f32 %v1246_v20, %v672_v34  ;;  %v704_v48 = vmax.f32 %v688_v38, 0.0  ;;  %v705_v51 = vmax.f32 %v689_v39, 0.0  ;;  %v706_v52 = vmax.f32 %v690_v40, 0.0 }
 0x115   : > { %v707_v53 = vmax.f32 %v691_v41, 0.0  ;;  %v971_v57 = vpack.c.bf16 %v702_v46, %v701_v45  ;;  %v673_v59 = vmul.f32 %v1080_v19, %v653_v43  ;;  %v674_v60 = vmul.f32 %v1080_v19, %v654_v44 }
 0x116   : > { %v708_v54 = vmax.f32 %v692_v42, 0.0  ;;  %v976_v58 = vpack.c.bf16 %v704_v48, %v703_v47  ;;  %v981_v63 = vpack.c.bf16 %v706_v52, %v705_v51  ;;  %v676_v2 = vmul.f32 %v1080_v19, %v656_v50 }
 0x117   : > { %972 = vst [vmem:[%s1307_s4] sm:$0xff] %v971_v57   ;;  %v693_v3 = vadd.f32 %v1246_v20, %v673_v59  ;;  %v694_v4 = vadd.f32 %v1246_v20, %v674_v60  ;;  %v677_v5 = vmul.f32 %v1080_v19, %v657_v55  ;;  %v678_v6 = vmul.f32 %v1080_v19, %v658_v56 }
 0x118   : > { %v986_v0 = vpack.c.bf16 %v708_v54, %v707_v53  ;;  %1008 = vst [vmem:[%s1307_s4 + $0x8] sm:$0xff] %v976_v58   ;;  %v695_v7 = vadd.f32 %v1246_v20, %v675_v1  ;;  %v696_v8 = vadd.f32 %v1246_v20, %v676_v2  ;;  %v679_v9 = vmul.f32 %v1080_v19, %v659_v61 }
 0x119   : > { %v680_v10 = vmul.f32 %v1080_v19, %v660_v62  ;;  %1009 = vst [vmem:[%s1307_s4 + $0x10] sm:$0xff] %v981_v63   ;;  %v709_v11 = vmax.f32 %v693_v3, 0.0  ;;  %v710_v12 = vmax.f32 %v694_v4, 0.0  ;;  %v697_v13 = vadd.f32 %v1246_v20, %v677_v5 }
 0x11a   : > { %v698_v14 = vadd.f32 %v1246_v20, %v678_v6  ;;  %1010 = vst [vmem:[%s1307_s4 + $0x18] sm:$0xff] %v986_v0   ;;  %v711_v15 = vmax.f32 %v695_v7, 0.0  ;;  %v712_v16 = vmax.f32 %v696_v8, 0.0  ;;  %v699_v17 = vadd.f32 %v1246_v20, %v679_v9 }
 0x11b   : > { %v700_v18 = vadd.f32 %v1246_v20, %v680_v10  ;;  %v991_v19 = vpack.c.bf16 %v710_v12, %v709_v11  ;;  %v713_v21 = vmax.f32 %v697_v13, 0.0 }
 0x11c   : > { %v714_v22 = vmax.f32 %v698_v14, 0.0  ;;  %v996_v23 = vpack.c.bf16 %v712_v16, %v711_v15  ;;  %v715_v24 = vmax.f32 %v699_v17, 0.0 }
 0x11d   : > { %v716_v25 = vmax.f32 %v700_v18, 0.0  ;;  %1011 = vst [vmem:[%s1307_s4 + $0x20] sm:$0xff] %v991_v19  }
 0x11e   : > { %v1001_v26 = vpack.c.bf16 %v714_v22, %v713_v21  ;;  %1012 = vst [vmem:[%s1307_s4 + $0x28] sm:$0xff] %v996_v23  }
 0x11f   : > { %v1006_v27 = vpack.c.bf16 %v716_v25, %v715_v24 }
 0x120   : > { %1013 = vst [vmem:[%s1307_s4 + $0x30] sm:$0xff] %v1001_v26  }
 0x121   : > { %1014 = vst [vmem:[%s1307_s4 + $0x38] sm:$0xff] %v1006_v27  }
 0x122 PF: > { %s14_s19 = sadd.s32 1, %s1120_s19   ;;  %s1308_s15 = smov %s1108_s16 }
 0x123   : > { %p11_p12 = scmp.ge.s32.totalorder %s14_s19, 7   ;;  %s1309_s16 = smov %s1183_s23 }
 0x124   : > { %s1310_s17 = smov %s1116_s18  ;;  %s1311_s18 = smov %s1313_s20 }
 0x125   :  { %13 = sbr.rel (!%p11_p12) target bundleno = 3 (0x3), region = 129 }

// kernel: mul.11
= control target key start
LH: loop header
LB: loop body
LE: loop exit
PB: predicated region body
PF: predicated region fallthrough
CT: control target
= control target key end

     0   :  { %s20_s0 = inlined_call_operand.<no memory space> [shape: f32[], index: 0, kind: input, shape index: {}]   ;;  %s21_s1 = inlined_call_operand.vmem [shape: f32[128], index: 1, kind: output, shape index: {}]  }
   0x1   :  { %v2_v0 = vstv %s20_s0 }
   0x2   :  { %3 = vst [vmem:[%s21_s1] sm:$0x1] %v2_v0 }

// kernel: danet_head_forward.14
= control target key start
LH: loop header
LB: loop body
LE: loop exit
PB: predicated region body
PF: predicated region fallthrough
CT: control target
= control target key end

     0   :  { %s891_s1 = inlined_call_operand.vmem [shape: bf16[256,128], index: 1, kind: input, shape index: {}]   ;;  %s892_s0 = inlined_call_operand.vmem [shape: bf16[128,256], index: 0, kind: input, shape index: {}]   ;;  %s893_s2 = inlined_call_operand.vmem [shape: f32[1,128], index: 2, kind: input, shape index: {}]   ;;  %s894_s3 = inlined_call_operand.vmem [shape: f32[1,128], index: 3, kind: input, shape index: {}]   ;;  %s895_s4 = inlined_call_operand.vmem [shape: bf16[128,128], index: 4, kind: output, shape index: {}]  }
   0x1   :  { %v582_v0 = vld [vmem:[%s891_s1 + $0x38] sm:$0xff]  ;;  %v581_v2 = vld [vmem:[%s891_s1 + $0x30] sm:$0xff]  ;;  %v580_v4 = vld [vmem:[%s891_s1 + $0x28] sm:$0xff] }
   0x2   :  { %v590_v1 = vld [vmem:[%s891_s1 + $0x78] sm:$0xff]  ;;  %241 = vmatpush.bf16.msra.mxu0 %v582_v0  ;;  %638 = vmatpush.bf16.msra.mxu2 %v582_v0  ;;  %v589_v3 = vld [vmem:[%s891_s1 + $0x70] sm:$0xff]  ;;  %v588_v5 = vld [vmem:[%s891_s1 + $0x68] sm:$0xff] }
   0x3   :  { %290 = vmatpush.bf16.msra.mxu1 %v590_v1  ;;  %646 = vmatpush.bf16.msra.mxu3 %v590_v1  ;;  %v579_v6 = vld [vmem:[%s891_s1 + $0x20] sm:$0xff]  ;;  %v578_v8 = vld [vmem:[%s891_s1 + $0x18] sm:$0xff]  ;;  %v577_v10 = vld [vmem:[%s891_s1 + $0x10] sm:$0xff] }
   0x4   :  { %v587_v7 = vld [vmem:[%s891_s1 + $0x60] sm:$0xff]  ;;  %v586_v9 = vld [vmem:[%s891_s1 + $0x58] sm:$0xff]  ;;  %v585_v11 = vld [vmem:[%s891_s1 + $0x50] sm:$0xff] }
   0x5   :  { %v576_v12 = vld [vmem:[%s891_s1 + $0x8] sm:$0xff]  ;;  %v575_v14 = vld [vmem:[%s891_s1] sm:$0xff]  ;;  %v441_v28 = vld [vmem:[%s892_s0 + $0x10] sm:$0xf] }
   0x6   :  { %242 = vmatpush.bf16.msra.mxu0 %v581_v2  ;;  %639 = vmatpush.bf16.msra.mxu2 %v581_v2  ;;  %v584_v13 = vld [vmem:[%s891_s1 + $0x48] sm:$0xff]  ;;  %v583_v15 = vld [vmem:[%s891_s1 + $0x40] sm:$0xff]  ;;  %v562_v29 = vld [vmem:[%s892_s0 + $0x14] sm:$0xf0] }
   0x7   :  { %291 = vmatpush.bf16.msra.mxu1 %v589_v3  ;;  %647 = vmatpush.bf16.msra.mxu3 %v589_v3  ;;  %v433_v16 = vld [vmem:[%s892_s0] sm:$0xf]  ;;  %v560_v17 = vld [vmem:[%s892_s0 + $0x4] sm:$0xf0]  ;;  %v559_v20 = vld [vmem:[%s892_s0 + $0x4] sm:$0xf]  ;;  %v442_v36 = vor.u32 %v562_v29, %v441_v28 }
   0x8   :  { %v465_v18 = vld [vmem:[%s892_s0 + $0x40] sm:$0xf]  ;;  %v568_v19 = vld [vmem:[%s892_s0 + $0x44] sm:$0xf0]  ;;  %v435_v21 = vld [vmem:[%s892_s0 + $0x8] sm:$0xf0]  ;;  %v434_v24 = vor.u32 %v560_v17, %v433_v16 }
   0x9   :  { %v567_v22 = vld [vmem:[%s892_s0 + $0x44] sm:$0xf]  ;;  %v467_v23 = vld [vmem:[%s892_s0 + $0x48] sm:$0xf0]  ;;  %v466_v25 = vor.u32 %v568_v19, %v465_v18  ;;  %v438_v26 = vor.u32 %v559_v20, %v435_v21  ;;  %v473_v30 = vld [vmem:[%s892_s0 + $0x50] sm:$0xf] }
   0xa   :  { %243 = vmatpush.bf16.msra.mxu0 %v580_v4  ;;  %640 = vmatpush.bf16.msra.mxu2 %v580_v4  ;;  %v470_v27 = vor.u32 %v567_v22, %v467_v23  ;;  %v570_v31 = vld [vmem:[%s892_s0 + $0x54] sm:$0xf0]  ;;  %v561_v32 = vld [vmem:[%s892_s0 + $0x14] sm:$0xf]  ;;  %v443_v33 = vld [vmem:[%s892_s0 + $0x18] sm:$0xf0] }
   0xb   :  { %292 = vmatpush.bf16.msra.mxu1 %v588_v5  ;;  %648 = vmatpush.bf16.msra.mxu3 %v588_v5  ;;  %v569_v34 = vld [vmem:[%s892_s0 + $0x54] sm:$0xf]  ;;  %v475_v35 = vld [vmem:[%s892_s0 + $0x58] sm:$0xf0]  ;;  %v474_v37 = vor.u32 %v570_v31, %v473_v30  ;;  %v446_v38 = vor.u32 %v561_v32, %v443_v33  ;;  %v449_v40 = vld [vmem:[%s892_s0 + $0x20] sm:$0xf] }
   0xc   :  { %v478_v39 = vor.u32 %v569_v34, %v475_v35  ;;  %v564_v41 = vld [vmem:[%s892_s0 + $0x24] sm:$0xf0]  ;;  %v481_v42 = vld [vmem:[%s892_s0 + $0x60] sm:$0xf]  ;;  %v563_v44 = vld [vmem:[%s892_s0 + $0x24] sm:$0xf] }
   0xd   :  { %v572_v43 = vld [vmem:[%s892_s0 + $0x64] sm:$0xf0]  ;;  %v451_v45 = vld [vmem:[%s892_s0 + $0x28] sm:$0xf0]  ;;  %v571_v46 = vld [vmem:[%s892_s0 + $0x64] sm:$0xf]  ;;  %v450_v48 = vor.u32 %v564_v41, %v449_v40 }
   0xe   :  { %244 = vmatpush.bf16.msra.mxu0 %v579_v6  ;;  %641 = vmatpush.bf16.msra.mxu2 %v579_v6  ;;  %v483_v47 = vld [vmem:[%s892_s0 + $0x68] sm:$0xf0]  ;;  %v482_v49 = vor.u32 %v572_v43, %v481_v42  ;;  %v454_v50 = vor.u32 %v563_v44, %v451_v45  ;;  %v457_v52 = vld [vmem:[%s892_s0 + $0x30] sm:$0xf]  ;;  %v566_v53 = vld [vmem:[%s892_s0 + $0x34] sm:$0xf0] }
   0xf   :  { %293 = vmatpush.bf16.msra.mxu1 %v587_v7  ;;  %649 = vmatpush.bf16.msra.mxu3 %v587_v7  ;;  %v486_v51 = vor.u32 %v571_v46, %v483_v47  ;;  %v489_v54 = vld [vmem:[%s892_s0 + $0x70] sm:$0xf]  ;;  %v574_v55 = vld [vmem:[%s892_s0 + $0x74] sm:$0xf0]  ;;  %v565_v56 = vld [vmem:[%s892_s0 + $0x34] sm:$0xf]  ;;  %v458_v60 = vor.u32 %v566_v53, %v457_v52 }
  0x10   :  { %v459_v57 = vld [vmem:[%s892_s0 + $0x38] sm:$0xf0]  ;;  %v573_v58 = vld [vmem:[%s892_s0 + $0x74] sm:$0xf]  ;;  %v490_v61 = vor.u32 %v574_v55, %v489_v54  ;;  %v828_v3 = vld [vmem:[%s893_s2] ss:$0 sm:$0xff] }
  0x11   :  { %v491_v59 = vld [vmem:[%s892_s0 + $0x78] sm:$0xf0]  ;;  %v462_v62 = vor.u32 %v565_v56, %v459_v57  ;;  %v834_v7 = vld [vmem:[%s894_s3] ss:$0 sm:$0xff] }
  0x12   :  { %245 = vmatpush.bf16.msra.mxu0 %v578_v8  ;;  %642 = vmatpush.bf16.msra.mxu2 %v578_v8  ;;  %v494_v63 = vor.u32 %v573_v58, %v491_v59 }
  0x13   :  { %294 = vmatpush.bf16.msra.mxu1 %v586_v9  ;;  %650 = vmatpush.bf16.msra.mxu3 %v586_v9 }
  0x16   :  { %246 = vmatpush.bf16.msra.mxu0 %v577_v10  ;;  %643 = vmatpush.bf16.msra.mxu2 %v577_v10 }
  0x17   :  { %295 = vmatpush.bf16.msra.mxu1 %v585_v11  ;;  %651 = vmatpush.bf16.msra.mxu3 %v585_v11 }
  0x1a   :  { %247 = vmatpush.bf16.msra.mxu0 %v576_v12  ;;  %644 = vmatpush.bf16.msra.mxu2 %v576_v12 }
  0x1b   :  { %296 = vmatpush.bf16.msra.mxu1 %v584_v13  ;;  %652 = vmatpush.bf16.msra.mxu3 %v584_v13 }
  0x1e   :  { %248 = vmatpush.bf16.msra.mxu0 %v575_v14  ;;  %645 = vmatpush.bf16.msra.mxu2 %v575_v14 }
  0x1f   :  { %297 = vmatpush.bf16.msra.mxu1 %v583_v15  ;;  %653 = vmatpush.bf16.msra.mxu3 %v583_v15 }
  0x21   :  { %249 = vmatmul.bf16.vlgmr.msra.gmra.mxu0 %v434_v24  ;;  %269 = vmatmul.bf16.vlgmr.msra.gmra.mxu2 %v466_v25 }
  0x22   :  { %298 = vmatmul.bf16.vlgmr.msra.gmra.mxu1 %v438_v26  ;;  %318 = vmatmul.bf16.vlgmr.msra.gmra.mxu3 %v470_v27 }
  0x31   :  { %254 = vmatmul.bf16.gmra.mxu0 %v442_v36  ;;  %274 = vmatmul.bf16.gmra.mxu2 %v474_v37 }
  0x32   :  { %303 = vmatmul.bf16.gmra.mxu1 %v446_v38  ;;  %323 = vmatmul.bf16.gmra.mxu3 %v478_v39 }
  0x41   :  { %259 = vmatmul.bf16.gmra.mxu0 %v450_v48  ;;  %279 = vmatmul.bf16.gmra.mxu2 %v482_v49 }
  0x42   :  { %308 = vmatmul.bf16.gmra.mxu1 %v454_v50  ;;  %328 = vmatmul.bf16.gmra.mxu3 %v486_v51 }
  0x51   :  { %264 = vmatmul.bf16.gmra.mxu0 %v458_v60  ;;  %284 = vmatmul.bf16.gmra.mxu2 %v490_v61 }
  0x52   :  { %313 = vmatmul.bf16.gmra.mxu1 %v462_v62  ;;  %333 = vmatmul.bf16.gmra.mxu3 %v494_v63 }
  0x9e   :  { %v250_v0 = vpop.f32.mrf.mxu0 }
  0x9f   :  { %v299_v1 = vpop.f32.mrf.mxu1 }
  0xa0   :  { %v300_v2 = vadd.f32 %v299_v1, %v250_v0 }
  0xa2   :  { %v343_v6 = vmul.f32 %v828_v3, %v300_v2 }
  0xa4   :  { %v270_v4 = vpop.f32.mrf.mxu2  ;;  %v363_v12 = vadd.f32 %v834_v7, %v343_v6 }
  0xa5   :  { %v319_v5 = vpop.f32.mrf.mxu3 }
  0xa6   :  { %v252_v8 = vpop.f32.mrf.mxu0  ;;  %v320_v10 = vadd.f32 %v319_v5, %v270_v4  ;;  %v379_v18 = vmax.f32 %v363_v12, 0.0 }
  0xa7   :  { %v301_v9 = vpop.f32.mrf.mxu1 }
  0xa8   :  { %v302_v11 = vadd.f32 %v301_v9, %v252_v8  ;;  %v351_v14 = vmul.f32 %v828_v3, %v320_v10 }
  0xaa   :  { %v344_v13 = vmul.f32 %v828_v3, %v302_v11  ;;  %v371_v23 = vadd.f32 %v834_v7, %v351_v14 }
  0xac   :  { %v364_v15 = vadd.f32 %v834_v7, %v344_v13  ;;  %v272_v16 = vpop.f32.mrf.mxu2  ;;  %v387_v28 = vmax.f32 %v371_v23, 0.0 }
  0xad   :  { %v321_v17 = vpop.f32.mrf.mxu3 }
  0xae   :  { %v380_v19 = vmax.f32 %v364_v15, 0.0  ;;  %v322_v20 = vadd.f32 %v321_v17, %v272_v16  ;;  %v255_v21 = vpop.f32.mrf.mxu0 }
  0xaf   :  { %v304_v22 = vpop.f32.mrf.mxu1 }
  0xb0   :  { %v594_v24 = vpack.c.bf16 %v380_v19, %v379_v18  ;;  %v352_v25 = vmul.f32 %v828_v3, %v322_v20  ;;  %v305_v27 = vadd.f32 %v304_v22, %v255_v21 }
  0xb2   :  { %595 = vst [vmem:[%s895_s4] sm:$0xff] %v594_v24   ;;  %v372_v26 = vadd.f32 %v834_v7, %v352_v25  ;;  %v345_v33 = vmul.f32 %v828_v3, %v305_v27 }
  0xb4   :  { %v388_v29 = vmax.f32 %v372_v26, 0.0  ;;  %v275_v30 = vpop.f32.mrf.mxu2  ;;  %v365_v38 = vadd.f32 %v834_v7, %v345_v33 }
  0xb5   :  { %v324_v31 = vpop.f32.mrf.mxu3 }
  0xb6   :  { %v614_v32 = vpack.c.bf16 %v388_v29, %v387_v28  ;;  %v257_v34 = vpop.f32.mrf.mxu0  ;;  %v325_v36 = vadd.f32 %v324_v31, %v275_v30  ;;  %v381_v44 = vmax.f32 %v365_v38, 0.0 }
  0xb7   :  { %v306_v35 = vpop.f32.mrf.mxu1 }
  0xb8   :  { %634 = vst [vmem:[%s895_s4 + $0x20] sm:$0xff] %v614_v32   ;;  %v307_v37 = vadd.f32 %v306_v35, %v257_v34  ;;  %v353_v40 = vmul.f32 %v828_v3, %v325_v36 }
  0xba   :  { %v346_v39 = vmul.f32 %v828_v3, %v307_v37  ;;  %v373_v49 = vadd.f32 %v834_v7, %v353_v40 }
  0xbc   :  { %v366_v41 = vadd.f32 %v834_v7, %v346_v39  ;;  %v277_v42 = vpop.f32.mrf.mxu2  ;;  %v389_v54 = vmax.f32 %v373_v49, 0.0 }
  0xbd   :  { %v326_v43 = vpop.f32.mrf.mxu3 }
  0xbe   :  { %v382_v45 = vmax.f32 %v366_v41, 0.0  ;;  %v327_v46 = vadd.f32 %v326_v43, %v277_v42  ;;  %v260_v47 = vpop.f32.mrf.mxu0 }
  0xbf   :  { %v309_v48 = vpop.f32.mrf.mxu1 }
  0xc0   :  { %v599_v50 = vpack.c.bf16 %v382_v45, %v381_v44  ;;  %v354_v51 = vmul.f32 %v828_v3, %v327_v46  ;;  %v310_v53 = vadd.f32 %v309_v48, %v260_v47 }
  0xc2   :  { %631 = vst [vmem:[%s895_s4 + $0x8] sm:$0xff] %v599_v50   ;;  %v374_v52 = vadd.f32 %v834_v7, %v354_v51  ;;  %v347_v59 = vmul.f32 %v828_v3, %v310_v53 }
  0xc4   :  { %v390_v55 = vmax.f32 %v374_v52, 0.0  ;;  %v280_v56 = vpop.f32.mrf.mxu2  ;;  %v367_v0 = vadd.f32 %v834_v7, %v347_v59 }
  0xc5   :  { %v329_v57 = vpop.f32.mrf.mxu3 }
  0xc6   :  { %v619_v58 = vpack.c.bf16 %v390_v55, %v389_v54  ;;  %v262_v60 = vpop.f32.mrf.mxu0  ;;  %v330_v62 = vadd.f32 %v329_v57, %v280_v56  ;;  %v383_v8 = vmax.f32 %v367_v0, 0.0 }
  0xc7   :  { %v311_v61 = vpop.f32.mrf.mxu1 }
  0xc8   :  { %635 = vst [vmem:[%s895_s4 + $0x28] sm:$0xff] %v619_v58   ;;  %v312_v63 = vadd.f32 %v311_v61, %v262_v60  ;;  %v355_v2 = vmul.f32 %v828_v3, %v330_v62 }
  0xca   :  { %v348_v1 = vmul.f32 %v828_v3, %v312_v63  ;;  %v375_v13 = vadd.f32 %v834_v7, %v355_v2 }
  0xcc   :  { %v368_v4 = vadd.f32 %v834_v7, %v348_v1  ;;  %v282_v5 = vpop.f32.mrf.mxu2  ;;  %v391_v18 = vmax.f32 %v375_v13, 0.0 }
  0xcd   :  { %v331_v6 = vpop.f32.mrf.mxu3 }
  0xce   :  { %v384_v9 = vmax.f32 %v368_v4, 0.0  ;;  %v332_v10 = vadd.f32 %v331_v6, %v282_v5  ;;  %v265_v11 = vpop.f32.mrf.mxu0 }
  0xcf   :  { %v314_v12 = vpop.f32.mrf.mxu1 }
  0xd0   :  { %v604_v14 = vpack.c.bf16 %v384_v9, %v383_v8  ;;  %v356_v15 = vmul.f32 %v828_v3, %v332_v10  ;;  %v315_v17 = vadd.f32 %v314_v12, %v265_v11 }
  0xd2   :  { %632 = vst [vmem:[%s895_s4 + $0x10] sm:$0xff] %v604_v14   ;;  %v376_v16 = vadd.f32 %v834_v7, %v356_v15  ;;  %v349_v23 = vmul.f32 %v828_v3, %v315_v17 }
  0xd4   :  { %v392_v19 = vmax.f32 %v376_v16, 0.0  ;;  %v285_v20 = vpop.f32.mrf.mxu2  ;;  %v369_v28 = vadd.f32 %v834_v7, %v349_v23 }
  0xd5   :  { %v334_v21 = vpop.f32.mrf.mxu3 }
  0xd6   :  { %v624_v22 = vpack.c.bf16 %v392_v19, %v391_v18  ;;  %v267_v24 = vpop.f32.mrf.mxu0  ;;  %v335_v26 = vadd.f32 %v334_v21, %v285_v20  ;;  %v385_v34 = vmax.f32 %v369_v28, 0.0 }
  0xd7   :  { %v316_v25 = vpop.f32.mrf.mxu1 }
  0xd8   :  { %636 = vst [vmem:[%s895_s4 + $0x30] sm:$0xff] %v624_v22   ;;  %v317_v27 = vadd.f32 %v316_v25, %v267_v24  ;;  %v357_v30 = vmul.f32 %v828_v3, %v335_v26 }
  0xda   :  { %v350_v29 = vmul.f32 %v828_v3, %v317_v27  ;;  %v377_v37 = vadd.f32 %v834_v7, %v357_v30 }
  0xdc   :  { %v370_v31 = vadd.f32 %v834_v7, %v350_v29  ;;  %v287_v32 = vpop.f32.mrf.mxu2  ;;  %v393_v41 = vmax.f32 %v377_v37, 0.0 }
  0xdd   :  { %v336_v33 = vpop.f32.mrf.mxu3 }
  0xde   :  { %v386_v35 = vmax.f32 %v370_v31, 0.0  ;;  %v337_v36 = vadd.f32 %v336_v33, %v287_v32 }
  0xe0   :  { %v609_v38 = vpack.c.bf16 %v386_v35, %v385_v34  ;;  %v358_v39 = vmul.f32 %v828_v3, %v337_v36 }
  0xe2   :  { %633 = vst [vmem:[%s895_s4 + $0x18] sm:$0xff] %v609_v38   ;;  %v378_v40 = vadd.f32 %v834_v7, %v358_v39 }
  0xe4   :  { %v394_v42 = vmax.f32 %v378_v40, 0.0 }
  0xe6   :  { %v629_v43 = vpack.c.bf16 %v394_v42, %v393_v41 }
  0xe8   :  { %637 = vst [vmem:[%s895_s4 + $0x38] sm:$0xff] %v629_v43  }

// kernel: danet_head_forward.9
= control target key start
LH: loop header
LB: loop body
LE: loop exit
PB: predicated region body
PF: predicated region fallthrough
CT: control target
= control target key end

     0   :  { %s1201_s1 = inlined_call_operand.vmem [shape: bf16[128,384], index: 1, kind: input, shape index: {}]   ;;  %s1202_s0 = inlined_call_operand.vmem [shape: bf16[128,128], index: 0, kind: input, shape index: {}]   ;;  %s1203_s2 = inlined_call_operand.vmem [shape: f32[1,384], index: 2, kind: input, shape index: {}]   ;;  %s1204_s3 = inlined_call_operand.vmem [shape: f32[1,384], index: 3, kind: input, shape index: {}]   ;;  %s1205_s4 = inlined_call_operand.vmem [shape: bf16[128,384], index: 4, kind: output, shape index: {}]  }
   0x1   :  { %v686_v0 = vld [vmem:[%s1201_s1 + $0xa8] sm:$0xf]  ;;  %v726_v1 = vld [vmem:[%s1201_s1 + $0xb0] sm:$0xf0]  ;;  %v725_v2 = vld [vmem:[%s1201_s1 + $0xac] sm:$0xf] }
   0x2   :  { %v687_v3 = vor.u32 %v726_v1, %v686_v0  ;;  %v688_v4 = vld [vmem:[%s1201_s1 + $0xb4] sm:$0xf0]  ;;  %v694_v5 = vld [vmem:[%s1201_s1 + $0xb0] sm:$0xf]  ;;  %v727_v6 = vld [vmem:[%s1201_s1 + $0xb8] sm:$0xf0] }
   0x3   :  { %v795_v7 = vor.u32 %v725_v2, %v688_v4  ;;  %v797_v8 = vor.u32 %v727_v6, %v694_v5  ;;  %v674_v9 = vld [vmem:[%s1201_s1 + $0x90] sm:$0xf]  ;;  %v723_v10 = vld [vmem:[%s1201_s1 + $0x98] sm:$0xf0]  ;;  %v722_v11 = vld [vmem:[%s1201_s1 + $0x94] sm:$0xf] }
   0x4   :  { %241 = vmatpush.bf16.msra.mxu0 %v687_v3  ;;  %728 = vmatpush.bf16.msra.mxu3 %v687_v3  ;;  %v675_v12 = vor.u32 %v723_v10, %v674_v9  ;;  %v676_v13 = vld [vmem:[%s1201_s1 + $0x9c] sm:$0xf0]  ;;  %v682_v14 = vld [vmem:[%s1201_s1 + $0x98] sm:$0xf]  ;;  %v724_v15 = vld [vmem:[%s1201_s1 + $0xa0] sm:$0xf0] }
   0x5   :  { %290 = vmatpush.bf16.msra.mxu1 %v795_v7  ;;  %339 = vmatpush.bf16.msra.mxu2 %v797_v8  ;;  %v819_v16 = vor.u32 %v722_v11, %v676_v13  ;;  %v821_v17 = vor.u32 %v724_v15, %v682_v14  ;;  %v662_v18 = vld [vmem:[%s1201_s1 + $0x78] sm:$0xf]  ;;  %v720_v19 = vld [vmem:[%s1201_s1 + $0x80] sm:$0xf0]  ;;  %v719_v20 = vld [vmem:[%s1201_s1 + $0x7c] sm:$0xf] }
   0x6   :  { %v664_v21 = vld [vmem:[%s1201_s1 + $0x84] sm:$0xf0]  ;;  %v670_v22 = vld [vmem:[%s1201_s1 + $0x80] sm:$0xf]  ;;  %v721_v23 = vld [vmem:[%s1201_s1 + $0x88] sm:$0xf0]  ;;  %v663_v24 = vor.u32 %v720_v19, %v662_v18 }
   0x7   :  { %v843_v25 = vor.u32 %v719_v20, %v664_v21  ;;  %v845_v26 = vor.u32 %v721_v23, %v670_v22  ;;  %v650_v27 = vld [vmem:[%s1201_s1 + $0x60] sm:$0xf]  ;;  %v717_v28 = vld [vmem:[%s1201_s1 + $0x68] sm:$0xf0]  ;;  %v716_v29 = vld [vmem:[%s1201_s1 + $0x64] sm:$0xf] }
   0x8   :  { %242 = vmatpush.bf16.msra.mxu0 %v675_v12  ;;  %729 = vmatpush.bf16.msra.mxu3 %v675_v12  ;;  %v652_v30 = vld [vmem:[%s1201_s1 + $0x6c] sm:$0xf0]  ;;  %v658_v31 = vld [vmem:[%s1201_s1 + $0x68] sm:$0xf]  ;;  %v718_v32 = vld [vmem:[%s1201_s1 + $0x70] sm:$0xf0]  ;;  %v651_v33 = vor.u32 %v717_v28, %v650_v27 }
   0x9   :  { %291 = vmatpush.bf16.msra.mxu1 %v819_v16  ;;  %340 = vmatpush.bf16.msra.mxu2 %v821_v17  ;;  %v867_v34 = vor.u32 %v716_v29, %v652_v30  ;;  %v869_v35 = vor.u32 %v718_v32, %v658_v31  ;;  %v638_v36 = vld [vmem:[%s1201_s1 + $0x48] sm:$0xf]  ;;  %v714_v37 = vld [vmem:[%s1201_s1 + $0x50] sm:$0xf0]  ;;  %v713_v38 = vld [vmem:[%s1201_s1 + $0x4c] sm:$0xf] }
   0xa   :  { %v640_v39 = vld [vmem:[%s1201_s1 + $0x54] sm:$0xf0]  ;;  %v646_v40 = vld [vmem:[%s1201_s1 + $0x50] sm:$0xf]  ;;  %v715_v41 = vld [vmem:[%s1201_s1 + $0x58] sm:$0xf0]  ;;  %v639_v42 = vor.u32 %v714_v37, %v638_v36 }
   0xb   :  { %v643_v43 = vor.u32 %v713_v38, %v640_v39  ;;  %v891_v44 = vor.u32 %v715_v41, %v646_v40  ;;  %v626_v45 = vld [vmem:[%s1201_s1 + $0x30] sm:$0xf]  ;;  %v711_v46 = vld [vmem:[%s1201_s1 + $0x38] sm:$0xf0]  ;;  %v710_v47 = vld [vmem:[%s1201_s1 + $0x34] sm:$0xf] }
   0xc   :  { %243 = vmatpush.bf16.msra.mxu0 %v663_v24  ;;  %730 = vmatpush.bf16.msra.mxu3 %v663_v24  ;;  %v628_v48 = vld [vmem:[%s1201_s1 + $0x3c] sm:$0xf0]  ;;  %v634_v49 = vld [vmem:[%s1201_s1 + $0x38] sm:$0xf]  ;;  %v712_v50 = vld [vmem:[%s1201_s1 + $0x40] sm:$0xf0]  ;;  %v627_v51 = vor.u32 %v711_v46, %v626_v45 }
   0xd   :  { %292 = vmatpush.bf16.msra.mxu1 %v843_v25  ;;  %341 = vmatpush.bf16.msra.mxu2 %v845_v26  ;;  %v631_v52 = vor.u32 %v710_v47, %v628_v48  ;;  %v912_v53 = vor.u32 %v712_v50, %v634_v49  ;;  %v614_v54 = vld [vmem:[%s1201_s1 + $0x18] sm:$0xf]  ;;  %v708_v55 = vld [vmem:[%s1201_s1 + $0x20] sm:$0xf0]  ;;  %v707_v56 = vld [vmem:[%s1201_s1 + $0x1c] sm:$0xf] }
   0xe   :  { %v616_v57 = vld [vmem:[%s1201_s1 + $0x24] sm:$0xf0]  ;;  %v622_v58 = vld [vmem:[%s1201_s1 + $0x20] sm:$0xf]  ;;  %v709_v59 = vld [vmem:[%s1201_s1 + $0x28] sm:$0xf0]  ;;  %v615_v60 = vor.u32 %v708_v55, %v614_v54 }
   0xf   :  { %v619_v61 = vor.u32 %v707_v56, %v616_v57  ;;  %v623_v62 = vor.u32 %v709_v59, %v622_v58  ;;  %v602_v63 = vld [vmem:[%s1201_s1] sm:$0xf]  ;;  %v705_v0 = vld [vmem:[%s1201_s1 + $0x8] sm:$0xf0]  ;;  %v704_v1 = vld [vmem:[%s1201_s1 + $0x4] sm:$0xf] }
  0x10   :  { %244 = vmatpush.bf16.msra.mxu0 %v651_v33  ;;  %731 = vmatpush.bf16.msra.mxu3 %v651_v33  ;;  %v604_v2 = vld [vmem:[%s1201_s1 + $0xc] sm:$0xf0]  ;;  %v610_v3 = vld [vmem:[%s1201_s1 + $0x8] sm:$0xf]  ;;  %v706_v4 = vld [vmem:[%s1201_s1 + $0x10] sm:$0xf0]  ;;  %v603_v5 = vor.u32 %v705_v0, %v602_v63 }
  0x11   :  { %293 = vmatpush.bf16.msra.mxu1 %v867_v34  ;;  %342 = vmatpush.bf16.msra.mxu2 %v869_v35  ;;  %v607_v6 = vor.u32 %v704_v1, %v604_v2  ;;  %v611_v9 = vor.u32 %v706_v4, %v610_v3  ;;  %v696_v10 = vld [vmem:[%s1202_s0] sm:$0xff]  ;;  %v702_v11 = vld [vmem:[%s1202_s0 + $0x30] sm:$0xff]  ;;  %v697_v12 = vld [vmem:[%s1202_s0 + $0x8] sm:$0xff] }
  0x12   :  { %v703_v13 = vld [vmem:[%s1202_s0 + $0x38] sm:$0xff]  ;;  %v701_v15 = vld [vmem:[%s1202_s0 + $0x28] sm:$0xff] }
  0x13   :  { %v699_v14 = vld [vmem:[%s1202_s0 + $0x18] sm:$0xff] }
  0x14   :  { %245 = vmatpush.bf16.msra.mxu0 %v639_v42  ;;  %732 = vmatpush.bf16.msra.mxu3 %v639_v42 }
  0x15   :  { %294 = vmatpush.bf16.msra.mxu1 %v643_v43  ;;  %343 = vmatpush.bf16.msra.mxu2 %v891_v44 }
  0x18   :  { %246 = vmatpush.bf16.msra.mxu0 %v627_v51  ;;  %733 = vmatpush.bf16.msra.mxu3 %v627_v51 }
  0x19   :  { %295 = vmatpush.bf16.msra.mxu1 %v631_v52  ;;  %344 = vmatpush.bf16.msra.mxu2 %v912_v53 }
  0x1c   :  { %247 = vmatpush.bf16.msra.mxu0 %v615_v60  ;;  %734 = vmatpush.bf16.msra.mxu3 %v615_v60 }
  0x1d   :  { %296 = vmatpush.bf16.msra.mxu1 %v619_v61  ;;  %345 = vmatpush.bf16.msra.mxu2 %v623_v62 }
  0x20   :  { %248 = vmatpush.bf16.msra.mxu0 %v603_v5  ;;  %735 = vmatpush.bf16.msra.mxu3 %v603_v5 }
  0x21   :  { %297 = vmatpush.bf16.msra.mxu1 %v607_v6  ;;  %346 = vmatpush.bf16.msra.mxu2 %v611_v9 }
  0x23   :  { %249 = vmatmul.bf16.vlgmr.msra.gmra.mxu0 %v696_v10  ;;  %279 = vmatmul.bf16.vlgmr.msra.gmra.mxu3 %v702_v11 }
  0x24   :  { %736 = vmatpush.bf16.msrb.mxu3 %v795_v7  ;;  %298 = vmatmul.bf16.vlgmr.msra.gmra.mxu1 %v696_v10  ;;  %v698_v7 = vld [vmem:[%s1202_s0 + $0x10] sm:$0xff] }
  0x25   :  { %347 = vmatmul.bf16.vlgmr.msra.gmra.mxu2 %v696_v10 }
  0x28   :  { %737 = vmatpush.bf16.msrb.mxu3 %v819_v16  ;;  %v388_v16 = vld [vmem:[%s1203_s2] sm:$0x7] }
  0x29   :  { %v991_v18 = vperm.slane %v388_v16, 0  ;;  %v993_v19 = vperm.slane %v388_v16, 1  ;;  %v1003_v28 = vperm.slane %v388_v16, 2 }
  0x2c   :  { %738 = vmatpush.bf16.msrb.mxu3 %v843_v25 }
  0x30   :  { %739 = vmatpush.bf16.msrb.mxu3 %v867_v34 }
  0x33   :  { %254 = vmatmul.bf16.gmra.mxu0 %v697_v12  ;;  %284 = vmatmul.bf16.gmra.mxu3 %v703_v13 }
  0x34   :  { %740 = vmatpush.bf16.msrb.mxu3 %v643_v43  ;;  %303 = vmatmul.bf16.gmra.mxu1 %v697_v12 }
  0x35   :  { %352 = vmatmul.bf16.gmra.mxu2 %v697_v12 }
  0x38   :  { %741 = vmatpush.bf16.msrb.mxu3 %v631_v52 }
  0x3c   :  { %742 = vmatpush.bf16.msrb.mxu3 %v619_v61 }
  0x40   :  { %743 = vmatpush.bf16.msrb.mxu3 %v607_v6 }
  0x43   :  { %259 = vmatmul.bf16.gmra.mxu0 %v698_v7  ;;  %328 = vmatmul.bf16.vlgmr.msrb.gmra.mxu3 %v702_v11 }
  0x44   :  { %744 = vmatpush.bf16.msra.mxu3 %v797_v8  ;;  %308 = vmatmul.bf16.gmra.mxu1 %v698_v7  ;;  %v700_v8 = vld [vmem:[%s1202_s0 + $0x20] sm:$0xff] }
  0x45   :  { %357 = vmatmul.bf16.gmra.mxu2 %v698_v7 }
  0x48   :  { %745 = vmatpush.bf16.msra.mxu3 %v821_v17  ;;  %v444_v17 = vld [vmem:[%s1204_s3] sm:$0x7] }
  0x49   :  { %v995_v20 = vperm.slane %v444_v17, 0  ;;  %v997_v22 = vperm.slane %v444_v17, 1  ;;  %v1005_v31 = vperm.slane %v444_v17, 2 }
  0x4c   :  { %746 = vmatpush.bf16.msra.mxu3 %v845_v26 }
  0x50   :  { %747 = vmatpush.bf16.msra.mxu3 %v869_v35 }
  0x53   :  { %264 = vmatmul.bf16.gmra.mxu0 %v699_v14  ;;  %333 = vmatmul.bf16.gmra.mxu3 %v703_v13 }
  0x54   :  { %748 = vmatpush.bf16.msra.mxu3 %v891_v44  ;;  %313 = vmatmul.bf16.gmra.mxu1 %v699_v14 }
  0x55   :  { %362 = vmatmul.bf16.gmra.mxu2 %v699_v14 }
  0x58   :  { %749 = vmatpush.bf16.msra.mxu3 %v912_v53 }
  0x5c   :  { %750 = vmatpush.bf16.msra.mxu3 %v623_v62 }
  0x60   :  { %751 = vmatpush.bf16.msra.mxu3 %v611_v9 }
  0x63   :  { %269 = vmatmul.bf16.gmra.mxu0 %v700_v8  ;;  %377 = vmatmul.bf16.vlgmr.msra.gmra.mxu3 %v702_v11 }
  0x64   :  { %318 = vmatmul.bf16.gmra.mxu1 %v700_v8 }
  0x65   :  { %367 = vmatmul.bf16.gmra.mxu2 %v700_v8 }
  0x73   :  { %274 = vmatmul.bf16.gmra.mxu0 %v701_v15  ;;  %382 = vmatmul.bf16.gmra.mxu3 %v703_v13 }
  0x74   :  { %323 = vmatmul.bf16.gmra.mxu1 %v701_v15 }
  0x75   :  { %372 = vmatmul.bf16.gmra.mxu2 %v701_v15 }
  0xa0   :  { %v250_v21 = vpop.f32.mrf.mxu0 }
  0xa1   :  { %v396_v23 = vmul.f32 %v991_v18, %v250_v21  ;;  %v299_v24 = vpop.f32.mrf.mxu1 }
  0xa2   :  { %v397_v25 = vmul.f32 %v993_v19, %v299_v24 }
  0xa3   :  { %v452_v26 = vadd.f32 %v995_v20, %v396_v23 }
  0xa4   :  { %v453_v27 = vadd.f32 %v997_v22, %v397_v25 }
  0xa6   :  { %v500_v29 = vpack.c.bf16 %v453_v27, %v452_v26  ;;  %v280_v30 = vpop.f32.mrf.mxu3 }
  0xa7   :  { %v432_v8 = vmul.f32 %v991_v18, %v280_v30 }
  0xa8   :  { %v348_v32 = vpop.f32.mrf.mxu2  ;;  %532 = vst [vmem:[%s1205_s4] sm:$0xff] %v500_v29  ;;  %v252_v34 = vpop.f32.mrf.mxu0 }
  0xa9   :  { %v398_v33 = vmul.f32 %v1003_v28, %v348_v32  ;;  %v399_v35 = vmul.f32 %v991_v18, %v252_v34  ;;  %v301_v36 = vpop.f32.mrf.mxu1  ;;  %v488_v25 = vadd.f32 %v995_v20, %v432_v8 }
  0xaa   :  { %v400_v38 = vmul.f32 %v993_v19, %v301_v36 }
  0xab   :  { %v454_v37 = vadd.f32 %v1005_v31, %v398_v33  ;;  %v455_v39 = vadd.f32 %v995_v20, %v399_v35 }
  0xac   :  { %v456_v41 = vadd.f32 %v997_v22, %v400_v38 }
  0xad   :  { %v501_v40 = vpack.c.bf16 %v454_v37, %v454_v37 }
  0xae   :  { %v502_v42 = vpack.c.bf16 %v456_v41, %v455_v39  ;;  %v282_v43 = vpop.f32.mrf.mxu3 }
  0xaf   :  { %533 = vst [vmem:[%s1205_s4 + $0x8] sm:$0xf] %v501_v40  ;;  %v435_v37 = vmul.f32 %v991_v18, %v282_v43 }
  0xb0   :  { %v350_v44 = vpop.f32.mrf.mxu2  ;;  %534 = vst [vmem:[%s1205_s4 + $0xc] sm:$0xff] %v502_v42  ;;  %v255_v46 = vpop.f32.mrf.mxu0 }
  0xb1   :  { %v401_v45 = vmul.f32 %v1003_v28, %v350_v44  ;;  %v402_v47 = vmul.f32 %v991_v18, %v255_v46  ;;  %v304_v48 = vpop.f32.mrf.mxu1  ;;  %v491_v44 = vadd.f32 %v995_v20, %v435_v37 }
  0xb2   :  { %v403_v50 = vmul.f32 %v993_v19, %v304_v48 }
  0xb3   :  { %v457_v49 = vadd.f32 %v1005_v31, %v401_v45  ;;  %v458_v51 = vadd.f32 %v995_v20, %v402_v47 }
  0xb4   :  { %v459_v53 = vadd.f32 %v997_v22, %v403_v50 }
  0xb5   :  { %v503_v52 = vpack.c.bf16 %v457_v49, %v457_v49 }
  0xb6   :  { %v504_v54 = vpack.c.bf16 %v459_v53, %v458_v51  ;;  %v1031_v55 = vpop.f32.mrf.mxu3 }
  0xb7   :  { %535 = vst [vmem:[%s1205_s4 + $0x14] sm:$0xf] %v503_v52 }
  0xb8   :  { %v353_v56 = vpop.f32.mrf.mxu2  ;;  %536 = vst [vmem:[%s1205_s4 + $0x18] sm:$0xff] %v504_v54  ;;  %v257_v58 = vpop.f32.mrf.mxu0  ;;  %v438_v54 = vmul.f32 %v991_v18, %v1031_v55 }
  0xb9   :  { %v404_v57 = vmul.f32 %v1003_v28, %v353_v56  ;;  %v405_v59 = vmul.f32 %v991_v18, %v257_v58  ;;  %v306_v60 = vpop.f32.mrf.mxu1 }
  0xba   :  { %v406_v62 = vmul.f32 %v993_v19, %v306_v60 }
  0xbb   :  { %v460_v61 = vadd.f32 %v1005_v31, %v404_v57  ;;  %v461_v63 = vadd.f32 %v995_v20, %v405_v59 }
  0xbc   :  { %v462_v1 = vadd.f32 %v997_v22, %v406_v62 }
  0xbd   :  { %v505_v0 = vpack.c.bf16 %v460_v61, %v460_v61  ;;  %v494_v61 = vadd.f32 %v995_v20, %v438_v54 }
  0xbe   :  { %v506_v2 = vpack.c.bf16 %v462_v1, %v461_v63  ;;  %v1045_v3 = vpop.f32.mrf.mxu3 }
  0xbf   :  { %537 = vst [vmem:[%s1205_s4 + $0x20] sm:$0xf] %v505_v0 }
  0xc0   :  { %v355_v4 = vpop.f32.mrf.mxu2  ;;  %538 = vst [vmem:[%s1205_s4 + $0x24] sm:$0xff] %v506_v2  ;;  %v260_v6 = vpop.f32.mrf.mxu0 }
  0xc1   :  { %v407_v5 = vmul.f32 %v1003_v28, %v355_v4  ;;  %v408_v9 = vmul.f32 %v991_v18, %v260_v6  ;;  %v309_v10 = vpop.f32.mrf.mxu1 }
  0xc2   :  { %v409_v12 = vmul.f32 %v993_v19, %v309_v10  ;;  %v441_v10 = vmul.f32 %v991_v18, %v1045_v3 }
  0xc3   :  { %v463_v11 = vadd.f32 %v1005_v31, %v407_v5  ;;  %v464_v13 = vadd.f32 %v995_v20, %v408_v9 }
  0xc4   :  { %v465_v14 = vadd.f32 %v997_v22, %v409_v12  ;;  %v497_v8 = vadd.f32 %v995_v20, %v441_v10 }
  0xc5   :  { %v507_v7 = vpack.c.bf16 %v463_v11, %v463_v11 }
  0xc6   :  { %v508_v15 = vpack.c.bf16 %v465_v14, %v464_v13  ;;  %v329_v16 = vpop.f32.mrf.mxu3 }
  0xc7   :  { %539 = vst [vmem:[%s1205_s4 + $0x2c] sm:$0xf] %v507_v7  ;;  %v433_v17 = vmul.f32 %v993_v19, %v329_v16 }
  0xc8   :  { %v358_v21 = vpop.f32.mrf.mxu2  ;;  %540 = vst [vmem:[%s1205_s4 + $0x30] sm:$0xff] %v508_v15  ;;  %v262_v24 = vpop.f32.mrf.mxu0 }
  0xc9   :  { %v410_v23 = vmul.f32 %v1003_v28, %v358_v21  ;;  %v489_v26 = vadd.f32 %v997_v22, %v433_v17  ;;  %v411_v27 = vmul.f32 %v991_v18, %v262_v24  ;;  %v311_v29 = vpop.f32.mrf.mxu1 }
  0xca   :  { %v412_v32 = vmul.f32 %v993_v19, %v311_v29 }
  0xcb   :  { %v466_v30 = vadd.f32 %v1005_v31, %v410_v23  ;;  %v524_v33 = vpack.c.bf16 %v489_v26, %v488_v25  ;;  %v467_v34 = vadd.f32 %v995_v20, %v411_v27 }
  0xcc   :  { %v468_v36 = vadd.f32 %v997_v22, %v412_v32 }
  0xcd   :  { %v509_v35 = vpack.c.bf16 %v466_v30, %v466_v30  ;;  %556 = vst [vmem:[%s1205_s4 + $0x90] sm:$0xff] %v524_v33 }
  0xce   :  { %v510_v38 = vpack.c.bf16 %v468_v36, %v467_v34  ;;  %v331_v39 = vpop.f32.mrf.mxu3 }
  0xcf   :  { %541 = vst [vmem:[%s1205_s4 + $0x38] sm:$0xf] %v509_v35  ;;  %v436_v40 = vmul.f32 %v993_v19, %v331_v39 }
  0xd0   :  { %v360_v41 = vpop.f32.mrf.mxu2  ;;  %542 = vst [vmem:[%s1205_s4 + $0x3c] sm:$0xff] %v510_v38  ;;  %v265_v43 = vpop.f32.mrf.mxu0 }
  0xd1   :  { %v413_v42 = vmul.f32 %v1003_v28, %v360_v41  ;;  %v492_v45 = vadd.f32 %v997_v22, %v436_v40  ;;  %v414_v46 = vmul.f32 %v991_v18, %v265_v43  ;;  %v314_v47 = vpop.f32.mrf.mxu1 }
  0xd2   :  { %v415_v49 = vmul.f32 %v993_v19, %v314_v47 }
  0xd3   :  { %v469_v48 = vadd.f32 %v1005_v31, %v413_v42  ;;  %v526_v50 = vpack.c.bf16 %v492_v45, %v491_v44  ;;  %v470_v51 = vadd.f32 %v995_v20, %v414_v46 }
  0xd4   :  { %v471_v53 = vadd.f32 %v997_v22, %v415_v49 }
  0xd5   :  { %v511_v52 = vpack.c.bf16 %v469_v48, %v469_v48  ;;  %558 = vst [vmem:[%s1205_s4 + $0x9c] sm:$0xff] %v526_v50 }
  0xd6   :  { %v512_v56 = vpack.c.bf16 %v471_v53, %v470_v51  ;;  %v334_v57 = vpop.f32.mrf.mxu3 }
  0xd7   :  { %543 = vst [vmem:[%s1205_s4 + $0x44] sm:$0xf] %v511_v52  ;;  %v439_v58 = vmul.f32 %v993_v19, %v334_v57 }
  0xd8   :  { %v363_v59 = vpop.f32.mrf.mxu2  ;;  %544 = vst [vmem:[%s1205_s4 + $0x48] sm:$0xff] %v512_v56  ;;  %v267_v55 = vpop.f32.mrf.mxu0 }
  0xd9   :  { %v416_v60 = vmul.f32 %v1003_v28, %v363_v59  ;;  %v495_v62 = vadd.f32 %v997_v22, %v439_v58  ;;  %v417_v63 = vmul.f32 %v991_v18, %v267_v55  ;;  %v316_v0 = vpop.f32.mrf.mxu1 }
  0xda   :  { %v418_v2 = vmul.f32 %v993_v19, %v316_v0 }
  0xdb   :  { %v472_v1 = vadd.f32 %v1005_v31, %v416_v60  ;;  %v528_v4 = vpack.c.bf16 %v495_v62, %v494_v61  ;;  %v473_v5 = vadd.f32 %v995_v20, %v417_v63 }
  0xdc   :  { %v474_v9 = vadd.f32 %v997_v22, %v418_v2 }
  0xdd   :  { %v513_v6 = vpack.c.bf16 %v472_v1, %v472_v1  ;;  %560 = vst [vmem:[%s1205_s4 + $0xa8] sm:$0xff] %v528_v4 }
  0xde   :  { %v514_v11 = vpack.c.bf16 %v474_v9, %v473_v5  ;;  %v336_v12 = vpop.f32.mrf.mxu3 }
  0xdf   :  { %545 = vst [vmem:[%s1205_s4 + $0x50] sm:$0xf] %v513_v6  ;;  %v442_v13 = vmul.f32 %v993_v19, %v336_v12 }
  0xe0   :  { %v365_v7 = vpop.f32.mrf.mxu2  ;;  %546 = vst [vmem:[%s1205_s4 + $0x54] sm:$0xff] %v514_v11  ;;  %v270_v3 = vpop.f32.mrf.mxu0 }
  0xe1   :  { %v419_v14 = vmul.f32 %v1003_v28, %v365_v7  ;;  %v498_v15 = vadd.f32 %v997_v22, %v442_v13  ;;  %v420_v16 = vmul.f32 %v991_v18, %v270_v3  ;;  %v319_v17 = vpop.f32.mrf.mxu1 }
  0xe2   :  { %v421_v23 = vmul.f32 %v993_v19, %v319_v17 }
  0xe3   :  { %v475_v21 = vadd.f32 %v1005_v31, %v419_v14  ;;  %v530_v24 = vpack.c.bf16 %v498_v15, %v497_v8  ;;  %v476_v25 = vadd.f32 %v995_v20, %v420_v16 }
  0xe4   :  { %v477_v27 = vadd.f32 %v997_v22, %v421_v23 }
  0xe5   :  { %v515_v26 = vpack.c.bf16 %v475_v21, %v475_v21  ;;  %562 = vst [vmem:[%s1205_s4 + $0xb4] sm:$0xff] %v530_v24 }
  0xe6   :  { %v516_v29 = vpack.c.bf16 %v477_v27, %v476_v25  ;;  %v378_v30 = vpop.f32.mrf.mxu3 }
  0xe7   :  { %547 = vst [vmem:[%s1205_s4 + $0x5c] sm:$0xf] %v515_v26  ;;  %v434_v33 = vmul.f32 %v1003_v28, %v378_v30 }
  0xe8   :  { %v368_v32 = vpop.f32.mrf.mxu2  ;;  %548 = vst [vmem:[%s1205_s4 + $0x60] sm:$0xff] %v516_v29  ;;  %v272_v35 = vpop.f32.mrf.mxu0 }
  0xe9   :  { %v422_v34 = vmul.f32 %v1003_v28, %v368_v32  ;;  %v490_v36 = vadd.f32 %v1005_v31, %v434_v33  ;;  %v423_v37 = vmul.f32 %v991_v18, %v272_v35  ;;  %v321_v38 = vpop.f32.mrf.mxu1 }
  0xea   :  { %v424_v40 = vmul.f32 %v993_v19, %v321_v38 }
  0xeb   :  { %v478_v39 = vadd.f32 %v1005_v31, %v422_v34  ;;  %v525_v41 = vpack.c.bf16 %v490_v36, %v490_v36  ;;  %v479_v42 = vadd.f32 %v995_v20, %v423_v37 }
  0xec   :  { %v480_v44 = vadd.f32 %v997_v22, %v424_v40 }
  0xed   :  { %v517_v43 = vpack.c.bf16 %v478_v39, %v478_v39  ;;  %557 = vst [vmem:[%s1205_s4 + $0x98] sm:$0xf] %v525_v41 }
  0xee   :  { %v518_v45 = vpack.c.bf16 %v480_v44, %v479_v42  ;;  %v380_v46 = vpop.f32.mrf.mxu3 }
  0xef   :  { %549 = vst [vmem:[%s1205_s4 + $0x68] sm:$0xf] %v517_v43  ;;  %v437_v48 = vmul.f32 %v1003_v28, %v380_v46 }
  0xf0   :  { %v370_v47 = vpop.f32.mrf.mxu2  ;;  %550 = vst [vmem:[%s1205_s4 + $0x6c] sm:$0xff] %v518_v45  ;;  %v275_v50 = vpop.f32.mrf.mxu0 }
  0xf1   :  { %v425_v49 = vmul.f32 %v1003_v28, %v370_v47  ;;  %v493_v51 = vadd.f32 %v1005_v31, %v437_v48  ;;  %v426_v52 = vmul.f32 %v991_v18, %v275_v50  ;;  %v324_v53 = vpop.f32.mrf.mxu1 }
  0xf2   :  { %v427_v56 = vmul.f32 %v993_v19, %v324_v53 }
  0xf3   :  { %v481_v54 = vadd.f32 %v1005_v31, %v425_v49  ;;  %v527_v57 = vpack.c.bf16 %v493_v51, %v493_v51  ;;  %v482_v58 = vadd.f32 %v995_v20, %v426_v52 }
  0xf4   :  { %v483_v60 = vadd.f32 %v997_v22, %v427_v56 }
  0xf5   :  { %v519_v59 = vpack.c.bf16 %v481_v54, %v481_v54  ;;  %559 = vst [vmem:[%s1205_s4 + $0xa4] sm:$0xf] %v527_v57 }
  0xf6   :  { %v520_v55 = vpack.c.bf16 %v483_v60, %v482_v58  ;;  %v383_v61 = vpop.f32.mrf.mxu3 }
  0xf7   :  { %551 = vst [vmem:[%s1205_s4 + $0x74] sm:$0xf] %v519_v59  ;;  %v440_v63 = vmul.f32 %v1003_v28, %v383_v61 }
  0xf8   :  { %v373_v62 = vpop.f32.mrf.mxu2  ;;  %552 = vst [vmem:[%s1205_s4 + $0x78] sm:$0xff] %v520_v55  ;;  %v277_v1 = vpop.f32.mrf.mxu0 }
  0xf9   :  { %v428_v0 = vmul.f32 %v1003_v28, %v373_v62  ;;  %v496_v2 = vadd.f32 %v1005_v31, %v440_v63  ;;  %v429_v4 = vmul.f32 %v991_v18, %v277_v1  ;;  %v326_v5 = vpop.f32.mrf.mxu1 }
  0xfa   :  { %v430_v9 = vmul.f32 %v993_v19, %v326_v5 }
  0xfb   :  { %v484_v6 = vadd.f32 %v1005_v31, %v428_v0  ;;  %v529_v10 = vpack.c.bf16 %v496_v2, %v496_v2  ;;  %v485_v11 = vadd.f32 %v995_v20, %v429_v4 }
  0xfc   :  { %v486_v13 = vadd.f32 %v997_v22, %v430_v9 }
  0xfd   :  { %v521_v12 = vpack.c.bf16 %v484_v6, %v484_v6  ;;  %561 = vst [vmem:[%s1205_s4 + $0xb0] sm:$0xf] %v529_v10 }
  0xfe   :  { %v522_v18 = vpack.c.bf16 %v486_v13, %v485_v11  ;;  %v385_v7 = vpop.f32.mrf.mxu3 }
  0xff   :  { %553 = vst [vmem:[%s1205_s4 + $0x80] sm:$0xf] %v521_v12  ;;  %v443_v3 = vmul.f32 %v1003_v28, %v385_v7 }
 0x100   :  { %v375_v14 = vpop.f32.mrf.mxu2  ;;  %554 = vst [vmem:[%s1205_s4 + $0x84] sm:$0xff] %v522_v18 }
 0x101   :  { %v431_v19 = vmul.f32 %v1003_v28, %v375_v14  ;;  %v499_v20 = vadd.f32 %v1005_v31, %v443_v3 }
 0x103   :  { %v487_v22 = vadd.f32 %v1005_v31, %v431_v19  ;;  %v531_v8 = vpack.c.bf16 %v499_v20, %v499_v20 }
 0x105   :  { %v523_v15 = vpack.c.bf16 %v487_v22, %v487_v22  ;;  %563 = vst [vmem:[%s1205_s4 + $0xbc] sm:$0xf] %v531_v8 }
 0x107   :  { %555 = vst [vmem:[%s1205_s4 + $0x8c] sm:$0xf] %v523_v15 }

// kernel: danet_head_forward.15
= control target key start
LH: loop header
LB: loop body
LE: loop exit
PB: predicated region body
PF: predicated region fallthrough
CT: control target
= control target key end

     0   :  { %s619_s0 = inlined_call_operand.vmem [shape: bf16[128,128], index: 0, kind: input, shape index: {}]   ;;  %s620_s1 = inlined_call_operand.vmem [shape: bf16[128,128], index: 1, kind: input, shape index: {}]   ;;  %s621_s2 = inlined_call_operand.vmem [shape: bf16[128,128], index: 2, kind: input, shape index: {}]   ;;  %s622_s3 = inlined_call_operand.vmem [shape: f32[1,128], index: 3, kind: input, shape index: {}]   ;;  %s623_s4 = inlined_call_operand.vmem [shape: f32[1,128], index: 4, kind: input, shape index: {}]   ;;  %s624_s5 = inlined_call_operand.hbm [shape: f32[128,128], index: 5, kind: output, shape index: {}]  }
   0x1   :  { %v335_v0 = vld [vmem:[%s621_s2 + $0x38] sm:$0xff]  ;;  %v334_v1 = vld [vmem:[%s621_s2 + $0x30] sm:$0xff]  ;;  %v333_v2 = vld [vmem:[%s621_s2 + $0x28] sm:$0xff] }
   0x2   :  { %173 = vmatpush.bf16.msra.mxu0 %v335_v0  ;;  %414 = vmatpush.bf16.msra.mxu1 %v335_v0 }
   0x3   :  { %415 = vmatpush.bf16.msra.mxu2 %v335_v0  ;;  %416 = vmatpush.bf16.msra.mxu3 %v335_v0 }
   0x6   :  { %174 = vmatpush.bf16.msra.mxu0 %v334_v1  ;;  %417 = vmatpush.bf16.msra.mxu1 %v334_v1 }
   0x7   :  { %10 = vsyncpa [#allocation3], 0  ;;  %418 = vmatpush.bf16.msra.mxu2 %v334_v1  ;;  %419 = vmatpush.bf16.msra.mxu3 %v334_v1  ;;  %v332_v3 = vld [vmem:[%s621_s2 + $0x20] sm:$0xff]  ;;  %v331_v4 = vld [vmem:[%s621_s2 + $0x18] sm:$0xff]  ;;  %s284_s19 = sshll.u32 %s624_s5, 4  ;;  %s470_s20 = smov 128   ;;  %s285_s19 = int_to_ptr.hbm [resolvable:$true] %s284_s19 }
   0x8   :  { %v337_v5 = vld [vmem:[%s619_s0] sm:$0xff]   ;;  %v401_v7 = vld [vmem:[%s619_s0 + $0x10] sm:$0xff]   ;;  %v329_v26 = vld [vmem:[%s621_s2 + $0x8] sm:$0xff]  ;;  %s471_s21 = smov 8  }
   0x9   :  { %v369_v6 = vld [vmem:[%s620_s1] sm:$0xff]   ;;  %v408_v8 = vld [vmem:[%s620_s1 + $0x10] sm:$0xff]   ;;  %v338_v12 = vunpack.c.l.bf16 %v337_v5  ;;  %v339_v13 = vunpack.c.h.bf16 %v337_v5  ;;  %v346_v18 = vunpack.c.l.bf16 %v401_v7  ;;  %v347_v19 = vunpack.c.h.bf16 %v401_v7  ;;  %v400_v44 = vld [vmem:[%s619_s0 + $0x8] sm:$0xff]  }
   0xa   :  { %175 = vmatpush.bf16.msra.mxu0 %v333_v2  ;;  %420 = vmatpush.bf16.msra.mxu1 %v333_v2  ;;  %v330_v9 = vld [vmem:[%s621_s2 + $0x10] sm:$0xff]  ;;  %v403_v10 = vld [vmem:[%s619_s0 + $0x20] sm:$0xff]   ;;  %v370_v14 = vunpack.c.l.bf16 %v369_v6  ;;  %v371_v15 = vunpack.c.h.bf16 %v369_v6  ;;  %v378_v20 = vunpack.c.l.bf16 %v408_v8  ;;  %v379_v21 = vunpack.c.h.bf16 %v408_v8  ;;  %v407_v45 = vld [vmem:[%s620_s1 + $0x8] sm:$0xff]  }
   0xb   :  { %421 = vmatpush.bf16.msra.mxu2 %v333_v2  ;;  %422 = vmatpush.bf16.msra.mxu3 %v333_v2  ;;  %v410_v11 = vld [vmem:[%s620_s1 + $0x20] sm:$0xff]   ;;  %v405_v16 = vld [vmem:[%s619_s0 + $0x30] sm:$0xff]   ;;  %v354_v22 = vunpack.c.l.bf16 %v403_v10  ;;  %v355_v23 = vunpack.c.h.bf16 %v403_v10  ;;  %v402_v46 = vld [vmem:[%s619_s0 + $0x18] sm:$0xff]   ;;  %v342_v50 = vunpack.c.l.bf16 %v400_v44  ;;  %v343_v51 = vunpack.c.h.bf16 %v400_v44 }
   0xc   :  { %v412_v17 = vld [vmem:[%s620_s1 + $0x30] sm:$0xff]   ;;  %v386_v24 = vunpack.c.l.bf16 %v410_v11  ;;  %v387_v25 = vunpack.c.h.bf16 %v410_v11  ;;  %v362_v27 = vunpack.c.l.bf16 %v405_v16  ;;  %v363_v28 = vunpack.c.h.bf16 %v405_v16  ;;  %v328_v36 = vld [vmem:[%s621_s2] sm:$0xff]  ;;  %v409_v47 = vld [vmem:[%s620_s1 + $0x18] sm:$0xff]  }
   0xd   :  { %v394_v29 = vunpack.c.l.bf16 %v412_v17  ;;  %v395_v30 = vunpack.c.h.bf16 %v412_v17  ;;  %v85_v31 = vadd.f32 %v370_v14, %v338_v12  ;;  %v86_v32 = vadd.f32 %v371_v15, %v339_v13  ;;  %v404_v48 = vld [vmem:[%s619_s0 + $0x28] sm:$0xff]   ;;  %v406_v54 = vld [vmem:[%s619_s0 + $0x38] sm:$0xff]   ;;  %v577_v16 = vld [vmem:[%s622_s3] ss:$0 sm:$0xff]  ;;  %s469_s3 = smov [#allocation2]  }
   0xe   :  { %176 = vmatpush.bf16.msra.mxu0 %v332_v3  ;;  %423 = vmatpush.bf16.msra.mxu1 %v332_v3  ;;  %v89_v33 = vadd.f32 %v378_v20, %v346_v18  ;;  %v90_v34 = vadd.f32 %v379_v21, %v347_v19  ;;  %v93_v35 = vadd.f32 %v386_v24, %v354_v22  ;;  %v411_v49 = vld [vmem:[%s620_s1 + $0x28] sm:$0xff]   ;;  %v374_v52 = vunpack.c.l.bf16 %v407_v45  ;;  %v413_v55 = vld [vmem:[%s620_s1 + $0x38] sm:$0xff]   ;;  %v582_v17 = vld [vmem:[%s623_s4] ss:$0 sm:$0xff]  ;;  %s282_s4 = sshll.u32 %s469_s3, 4  ;;  %s283_s4 = int_to_ptr.vmem [resolvable:$true] %s282_s4 }
   0xf   :  { %424 = vmatpush.bf16.msra.mxu2 %v332_v3  ;;  %425 = vmatpush.bf16.msra.mxu3 %v332_v3  ;;  %v94_v37 = vadd.f32 %v387_v25, %v355_v23  ;;  %v97_v38 = vadd.f32 %v394_v29, %v362_v27  ;;  %v98_v39 = vadd.f32 %v395_v30, %v363_v28  ;;  %v375_v53 = vunpack.c.h.bf16 %v407_v45 }
  0x10   :  { %v101_v40 = vpack.c.bf16 %v86_v32, %v85_v31  ;;  %v103_v41 = vpack.c.bf16 %v90_v34, %v89_v33  ;;  %v350_v56 = vunpack.c.l.bf16 %v402_v46  ;;  %v351_v57 = vunpack.c.h.bf16 %v402_v46 }
  0x11   :  { %v105_v42 = vpack.c.bf16 %v94_v37, %v93_v35  ;;  %v107_v43 = vpack.c.bf16 %v98_v39, %v97_v38  ;;  %v382_v58 = vunpack.c.l.bf16 %v409_v47  ;;  %v383_v59 = vunpack.c.h.bf16 %v409_v47 }
  0x12   :  { %177 = vmatpush.bf16.msra.mxu0 %v331_v4  ;;  %426 = vmatpush.bf16.msra.mxu1 %v331_v4  ;;  %v358_v60 = vunpack.c.l.bf16 %v404_v48  ;;  %v359_v61 = vunpack.c.h.bf16 %v404_v48  ;;  %v390_v62 = vunpack.c.l.bf16 %v411_v49  ;;  %v391_v63 = vunpack.c.h.bf16 %v411_v49 }
  0x13   :  { %427 = vmatpush.bf16.msra.mxu2 %v331_v4  ;;  %428 = vmatpush.bf16.msra.mxu3 %v331_v4  ;;  %v366_v0 = vunpack.c.l.bf16 %v406_v54  ;;  %v367_v1 = vunpack.c.h.bf16 %v406_v54  ;;  %v398_v2 = vunpack.c.l.bf16 %v413_v55  ;;  %v399_v3 = vunpack.c.h.bf16 %v413_v55 }
  0x14   :  { %v87_v4 = vadd.f32 %v374_v52, %v342_v50  ;;  %v88_v5 = vadd.f32 %v375_v53, %v343_v51  ;;  %v91_v6 = vadd.f32 %v382_v58, %v350_v56  ;;  %v92_v7 = vadd.f32 %v383_v59, %v351_v57 }
  0x15   :  { %v95_v8 = vadd.f32 %v390_v62, %v358_v60  ;;  %v99_v10 = vadd.f32 %v398_v2, %v366_v0  ;;  %v100_v11 = vadd.f32 %v399_v3, %v367_v1 }
  0x16   :  { %178 = vmatpush.bf16.msra.mxu0 %v330_v9  ;;  %429 = vmatpush.bf16.msra.mxu1 %v330_v9  ;;  %v102_v12 = vpack.c.bf16 %v88_v5, %v87_v4  ;;  %v104_v13 = vpack.c.bf16 %v92_v7, %v91_v6 }
  0x17   :  { %430 = vmatpush.bf16.msra.mxu2 %v330_v9  ;;  %431 = vmatpush.bf16.msra.mxu3 %v330_v9  ;;  %v96_v9 = vadd.f32 %v391_v63, %v359_v61  ;;  %v108_v15 = vpack.c.bf16 %v100_v11, %v99_v10 }
  0x19   :  { %v106_v14 = vpack.c.bf16 %v96_v9, %v95_v8 }
  0x1a   :  { %179 = vmatpush.bf16.msra.mxu0 %v329_v26  ;;  %432 = vmatpush.bf16.msra.mxu1 %v329_v26 }
  0x1b   :  { %433 = vmatpush.bf16.msra.mxu2 %v329_v26  ;;  %434 = vmatpush.bf16.msra.mxu3 %v329_v26 }
  0x1e   :  { %180 = vmatpush.bf16.msra.mxu0 %v328_v36  ;;  %435 = vmatpush.bf16.msra.mxu1 %v328_v36 }
  0x1f   :  { %436 = vmatpush.bf16.msra.mxu2 %v328_v36  ;;  %437 = vmatpush.bf16.msra.mxu3 %v328_v36 }
  0x21   :  { %181 = vmatmul.bf16.vlgmr.msra.gmra.mxu0 %v101_v40  ;;  %191 = vmatmul.bf16.vlgmr.msra.gmra.mxu1 %v103_v41 }
  0x22   :  { %201 = vmatmul.bf16.vlgmr.msra.gmra.mxu2 %v105_v42  ;;  %211 = vmatmul.bf16.vlgmr.msra.gmra.mxu3 %v107_v43 }
  0x31   :  { %186 = vmatmul.bf16.gmra.mxu0 %v102_v12  ;;  %196 = vmatmul.bf16.gmra.mxu1 %v104_v13 }
  0x32   :  { %206 = vmatmul.bf16.gmra.mxu2 %v106_v14  ;;  %216 = vmatmul.bf16.gmra.mxu3 %v108_v15 }
  0x9e   :  { %v182_v18 = vpop.f32.mrf.mxu0  ;;  %v192_v19 = vpop.f32.mrf.mxu1 }
  0x9f   :  { %v226_v20 = vmul.f32 %v577_v16, %v182_v18  ;;  %v230_v21 = vmul.f32 %v577_v16, %v192_v19 }
  0xa1   :  { %v246_v22 = vadd.f32 %v582_v17, %v226_v20  ;;  %v250_v23 = vadd.f32 %v582_v17, %v230_v21 }
  0xa3   :  { %262 = vst [vmem:[#allocation2] sm:$0xff] %v246_v22 }
  0xa4   :  { %266 = vst [vmem:[#allocation2 + $0x20] sm:$0xff] %v250_v23 }
  0xa5   :  { %v202_v24 = vpop.f32.mrf.mxu2  ;;  %v212_v25 = vpop.f32.mrf.mxu3 }
  0xa6   :  { %v234_v26 = vmul.f32 %v577_v16, %v202_v24  ;;  %v238_v27 = vmul.f32 %v577_v16, %v212_v25  ;;  %v184_v28 = vpop.f32.mrf.mxu0  ;;  %v194_v29 = vpop.f32.mrf.mxu1 }
  0xa7   :  { %v227_v30 = vmul.f32 %v577_v16, %v184_v28  ;;  %v231_v31 = vmul.f32 %v577_v16, %v194_v29 }
  0xa8   :  { %v254_v32 = vadd.f32 %v582_v17, %v234_v26  ;;  %v258_v33 = vadd.f32 %v582_v17, %v238_v27 }
  0xa9   :  { %v247_v34 = vadd.f32 %v582_v17, %v227_v30  ;;  %v251_v35 = vadd.f32 %v582_v17, %v231_v31 }
  0xaa   :  { %270 = vst [vmem:[#allocation2 + $0x40] sm:$0xff] %v254_v32 }
  0xab   :  { %274 = vst [vmem:[#allocation2 + $0x60] sm:$0xff] %v258_v33 }
  0xac   :  { %263 = vst [vmem:[#allocation2 + $0x8] sm:$0xff] %v247_v34 }
  0xad   :  { %267 = vst [vmem:[#allocation2 + $0x28] sm:$0xff] %v251_v35  ;;  %v204_v36 = vpop.f32.mrf.mxu2  ;;  %v214_v37 = vpop.f32.mrf.mxu3 }
  0xae   :  { %v235_v38 = vmul.f32 %v577_v16, %v204_v36  ;;  %v239_v39 = vmul.f32 %v577_v16, %v214_v37  ;;  %v187_v40 = vpop.f32.mrf.mxu0  ;;  %v197_v41 = vpop.f32.mrf.mxu1 }
  0xaf   :  { %v228_v42 = vmul.f32 %v577_v16, %v187_v40  ;;  %v232_v43 = vmul.f32 %v577_v16, %v197_v41 }
  0xb0   :  { %v255_v44 = vadd.f32 %v582_v17, %v235_v38  ;;  %v259_v45 = vadd.f32 %v582_v17, %v239_v39 }
  0xb1   :  { %v248_v46 = vadd.f32 %v582_v17, %v228_v42  ;;  %v252_v47 = vadd.f32 %v582_v17, %v232_v43 }
  0xb2   :  { %271 = vst [vmem:[#allocation2 + $0x48] sm:$0xff] %v255_v44 }
  0xb3   :  { %275 = vst [vmem:[#allocation2 + $0x68] sm:$0xff] %v259_v45 }
  0xb4   :  { %264 = vst [vmem:[#allocation2 + $0x10] sm:$0xff] %v248_v46 }
  0xb5   :  { %268 = vst [vmem:[#allocation2 + $0x30] sm:$0xff] %v252_v47  ;;  %v207_v48 = vpop.f32.mrf.mxu2  ;;  %v217_v49 = vpop.f32.mrf.mxu3 }
  0xb6   :  { %v236_v50 = vmul.f32 %v577_v16, %v207_v48  ;;  %v240_v51 = vmul.f32 %v577_v16, %v217_v49  ;;  %v189_v52 = vpop.f32.mrf.mxu0  ;;  %v199_v53 = vpop.f32.mrf.mxu1 }
  0xb7   :  { %v229_v54 = vmul.f32 %v577_v16, %v189_v52  ;;  %v233_v55 = vmul.f32 %v577_v16, %v199_v53 }
  0xb8   :  { %v256_v56 = vadd.f32 %v582_v17, %v236_v50  ;;  %v260_v57 = vadd.f32 %v582_v17, %v240_v51 }
  0xb9   :  { %v249_v58 = vadd.f32 %v582_v17, %v229_v54  ;;  %v253_v59 = vadd.f32 %v582_v17, %v233_v55 }
  0xba   :  { %272 = vst [vmem:[#allocation2 + $0x50] sm:$0xff] %v256_v56 }
  0xbb   :  { %276 = vst [vmem:[#allocation2 + $0x70] sm:$0xff] %v260_v57 }
  0xbc   :  { %265 = vst [vmem:[#allocation2 + $0x18] sm:$0xff] %v249_v58 }
  0xbd   :  { %269 = vst [vmem:[#allocation2 + $0x38] sm:$0xff] %v253_v59  ;;  %v209_v60 = vpop.f32.mrf.mxu2  ;;  %v219_v61 = vpop.f32.mrf.mxu3 }
  0xbe   :  { %v237_v62 = vmul.f32 %v577_v16, %v209_v60  ;;  %v241_v63 = vmul.f32 %v577_v16, %v219_v61 }
  0xc0   :  { %v257_v0 = vadd.f32 %v582_v17, %v237_v62  ;;  %v261_v1 = vadd.f32 %v582_v17, %v241_v63 }
  0xc2   :  { %273 = vst [vmem:[#allocation2 + $0x58] sm:$0xff] %v257_v0 }
  0xc3   :  { %277 = vst [vmem:[#allocation2 + $0x78] sm:$0xff] %v261_v1 }
  0xc4   :  { %290 = dma.vmem_to_hbm [thread:$0]  %s283_s4, 2048, %s285_s19, [#allocation3], %s470_s20, %s470_s20, %s471_s21  }
  0xc5   :  { %467 = dma.done.wait [#allocation3], 2048  }
  0xc6   :  { %468 = vsyncadd [#allocation3], 4294965248 }
  0xc7   :  { %295 = vsyncpa [#allocation3], 1 }

// kernel: danet_head_forward.10
= control target key start
LH: loop header
LB: loop body
LE: loop exit
PB: predicated region body
PF: predicated region fallthrough
CT: control target
= control target key end

     0   :  { %s1673_s15 = smov 0   ;;  %s1675_s16 = smov 0   ;;  %s2009_s0 = inlined_call_operand.vmem [shape: bf16[2,64,384], index: 0, kind: input, shape index: {}, may-alias: {0,1,2}]   ;;  %s2010_s1 = inlined_call_operand.vmem [shape: bf16[2,64,384], index: 1, kind: input, shape index: {}, may-alias: {0,1,2}]   ;;  %s2011_s2 = inlined_call_operand.vmem [shape: bf16[2,64,384], index: 2, kind: input, shape index: {}, may-alias: {0,1,2}]   ;;  %s2012_s3 = inlined_call_operand.vmem [shape: bf16[2,64,16], index: 3, kind: input, shape index: {}]   ;;  %s2013_s4 = inlined_call_operand.vmem [shape: bf16[2,64,16], index: 4, kind: output, shape index: {}]  }
   0x1   :  { %s1677_s17 = smov 0   ;;  %s1679_s18 = smov 0  }
   0x2   :  { %s1681_s19 = smov 0  }
   0x3 LB: > { %s33_s20 = sadd.s32 1, %s1639_s18  ;;  %p49_p1 = scmp.ne.s32.totalorder %s1631_s16, %s1627_s15  ;;  %s1643_s19 = sphi %s1681_s19, %s14_s19   ;;  %s1639_s18 = sphi %s1679_s18, %s2020_s18   ;;  %s1635_s17 = sphi %s1677_s17, %s2019_s17   ;;  %s1631_s16 = sphi %s1675_s16, %s2018_s16   ;;  %s1627_s15 = sphi %s1673_s15, %s2017_s15  }
   0x4   : > { %p35_p0 = scmp.ge.s32.totalorder %s33_s20, 2  ;;  %p50_p2 = scmp.eq.s32.totalorder %s1643_s19, 0 }
   0x5   : > { %s42_s23 = sadd.s32 1, %s1631_s16  ;;  %p1384_p5 = scmp.ge.s32.totalorder %s1643_s19, 2 }
   0x6   : > { %s2022_s20 = smov (%p35_p0, %s33_s20), 0  ;;  %p1704_p3 = por %p50_p2, %p49_p1 }
   0x7   : > { %s37_s22 = ssub.s32 %s1639_s18, %s2022_s20  ;;  %187 = sbr.rel (%p1384_p5) target bundleno = 51 (0x33), region = 16 }
   0x8   : > { %p40_p4 = scmp.eq.s32.totalorder %s37_s22, 0 }
   0xa   : > { %s1712_s24 = scalar_select %p40_p4, %s1631_s16, %s42_s23  }
   0xc   : > { %190 = sbr.rel (!%p1704_p3) target bundleno = 25 (0x19), region = 20  ;;  %s192_s25 = sand.u32 (%p1704_p3), 1, %s1631_s16  }
   0xd   : > { %s1386_s26 = smul.u32 (%p1704_p3), 96, %s1639_s18  ;;  %s1385_s27 = sshll.u32 (%p1704_p3), %s192_s25, 5 }
   0xe   : > { %s194_s5 = scalar_lea.vmem (%p1704_p3), [#allocation5], %s1385_s27 }
   0xf   : > { %s1262_s30 = scalar_lea.vmem (%p1704_p3), %s2009_s0, %s1386_s26 }
  0x10   : > { %v1387_v0 = vld [vmem:[%s1262_s30 + $0x4] sm:$0xf] (%p1704_p3)  ;;  %v1388_v1 = vld [vmem:[%s1262_s30 + $0x10] sm:$0xf] (%p1704_p3)  ;;  %v1389_v2 = vld [vmem:[%s1262_s30 + $0x1c] sm:$0xf] (%p1704_p3) }
  0x11   : > { %219 = vst [vmem:[%s194_s5] sm:$0xf] %v1387_v0  ;;  %v1390_v3 = vld [vmem:[%s1262_s30 + $0x28] sm:$0xf]  ;;  %v1391_v4 = vld [vmem:[%s1262_s30 + $0x34] sm:$0xf] }
  0x12   : > { %221 = vst [vmem:[%s194_s5 + $0x4] sm:$0xf] %v1388_v1  ;;  %v1392_v5 = vld [vmem:[%s1262_s30 + $0x40] sm:$0xf]  ;;  %v1393_v6 = vld [vmem:[%s1262_s30 + $0x4c] sm:$0xf] }
  0x13   : > { %223 = vst [vmem:[%s194_s5 + $0x8] sm:$0xf] %v1389_v2  ;;  %v1394_v7 = vld [vmem:[%s1262_s30 + $0x58] sm:$0xf] }
  0x14   : > { %225 = vst [vmem:[%s194_s5 + $0xc] sm:$0xf] %v1390_v3 }
  0x15   : > { %227 = vst [vmem:[%s194_s5 + $0x10] sm:$0xf] %v1391_v4 }
  0x16   : > { %229 = vst [vmem:[%s194_s5 + $0x14] sm:$0xf] %v1392_v5 }
  0x17   : > { %231 = vst [vmem:[%s194_s5 + $0x18] sm:$0xf] %v1393_v6 }
  0x18   : > { %233 = vst [vmem:[%s194_s5 + $0x1c] sm:$0xf] %v1394_v7 }
  0x19 PF: > { %273 = sbr.rel (!%p1704_p3) target bundleno = 38 (0x26), region = 61  ;;  %s275_s6 = sand.u32 (%p1704_p3), 1, %s1631_s16  }
  0x1a   : > { %s1396_s7 = smul.u32 (%p1704_p3), 96, %s1639_s18  ;;  %s1395_s8 = sshll.u32 (%p1704_p3), %s275_s6, 5 }
  0x1b   : > { %s277_s12 = scalar_lea.vmem (%p1704_p3), [#allocation6], %s1395_s8 }
  0x1c   : > { %s1270_s11 = scalar_lea.vmem (%p1704_p3), %s2010_s1, %s1396_s7 }
  0x1d   : > { %v1397_v8 = vld [vmem:[%s1270_s11 + $0x8] sm:$0xf] (%p1704_p3)  ;;  %v1398_v9 = vld [vmem:[%s1270_s11 + $0x14] sm:$0xf] (%p1704_p3)  ;;  %v1399_v10 = vld [vmem:[%s1270_s11 + $0x20] sm:$0xf] (%p1704_p3) }
  0x1e   : > { %302 = vst [vmem:[%s277_s12] sm:$0xf] %v1397_v8  ;;  %v1400_v11 = vld [vmem:[%s1270_s11 + $0x2c] sm:$0xf]  ;;  %v1401_v12 = vld [vmem:[%s1270_s11 + $0x38] sm:$0xf] }
  0x1f   : > { %304 = vst [vmem:[%s277_s12 + $0x4] sm:$0xf] %v1398_v9  ;;  %v1402_v13 = vld [vmem:[%s1270_s11 + $0x44] sm:$0xf]  ;;  %v1403_v14 = vld [vmem:[%s1270_s11 + $0x50] sm:$0xf] }
  0x20   : > { %306 = vst [vmem:[%s277_s12 + $0x8] sm:$0xf] %v1399_v10  ;;  %v1404_v15 = vld [vmem:[%s1270_s11 + $0x5c] sm:$0xf] }
  0x21   : > { %308 = vst [vmem:[%s277_s12 + $0xc] sm:$0xf] %v1400_v11 }
  0x22   : > { %310 = vst [vmem:[%s277_s12 + $0x10] sm:$0xf] %v1401_v12 }
  0x23   : > { %312 = vst [vmem:[%s277_s12 + $0x14] sm:$0xf] %v1402_v13 }
  0x24   : > { %314 = vst [vmem:[%s277_s12 + $0x18] sm:$0xf] %v1403_v14 }
  0x25   : > { %316 = vst [vmem:[%s277_s12 + $0x1c] sm:$0xf] %v1404_v15 }
  0x26 PF: > { %356 = sbr.rel (!%p1704_p3) target bundleno = 51 (0x33), region = 102  ;;  %s358_s13 = sand.u32 (%p1704_p3), 1, %s1631_s16  }
  0x27   : > { %s1510_s14 = smul.u32 (%p1704_p3), 96, %s1639_s18  ;;  %s1405_s22 = sshll.u32 (%p1704_p3), %s358_s13, 5 }
  0x28   : > { %s360_s27 = scalar_lea.vmem (%p1704_p3), [#allocation7], %s1405_s22 }
  0x29   : > { %s366_s26 = scalar_lea.vmem (%p1704_p3), %s2011_s2, %s1510_s14 }
  0x2a   : > { %v383_v16 = vld [vmem:[%s366_s26] sm:$0xf] (%p1704_p3)  ;;  %v385_v17 = vld [vmem:[%s366_s26 + $0xc] sm:$0xf] (%p1704_p3)  ;;  %v387_v18 = vld [vmem:[%s366_s26 + $0x18] sm:$0xf] (%p1704_p3) }
  0x2b   : > { %384 = vst [vmem:[%s360_s27] sm:$0xf] %v383_v16  ;;  %v389_v19 = vld [vmem:[%s366_s26 + $0x24] sm:$0xf]  ;;  %v391_v20 = vld [vmem:[%s366_s26 + $0x30] sm:$0xf] }
  0x2c   : > { %386 = vst [vmem:[%s360_s27 + $0x4] sm:$0xf] %v385_v17  ;;  %v393_v21 = vld [vmem:[%s366_s26 + $0x3c] sm:$0xf]  ;;  %v395_v22 = vld [vmem:[%s366_s26 + $0x48] sm:$0xf] }
  0x2d   : > { %388 = vst [vmem:[%s360_s27 + $0x8] sm:$0xf] %v387_v18  ;;  %v397_v23 = vld [vmem:[%s366_s26 + $0x54] sm:$0xf] }
  0x2e   : > { %390 = vst [vmem:[%s360_s27 + $0xc] sm:$0xf] %v389_v19 }
  0x2f   : > { %392 = vst [vmem:[%s360_s27 + $0x10] sm:$0xf] %v391_v20 }
  0x30   : > { %394 = vst [vmem:[%s360_s27 + $0x14] sm:$0xf] %v393_v21 }
  0x31   : > { %396 = vst [vmem:[%s360_s27 + $0x18] sm:$0xf] %v395_v22 }
  0x32   : > { %398 = vst [vmem:[%s360_s27 + $0x1c] sm:$0xf] %v397_v23 }
  0x33 PF: > { %p1407_p6 = scmp.ge.s32.totalorder %s1643_s19, 1  ;;  %p450_p7 = scmp.lt.s32.totalorder %s1643_s19, 3 }
  0x35   : > { %p451_p8 = pnand %p1407_p6, %p450_p7 }
  0x36   : > { %s457_s21 = sand.u32 (!%p451_p8), 1, %s1627_s15   ;;  %p521_p9 = scmp.lt.s32.totalorder (!%p451_p8), %s1635_s17, 1 }
  0x37   : > { %454 = sbr.rel (%p451_p8) target bundleno = 775 (0x307), region = 147  ;;  %s1739_s28 = sshll.u32 (!%p451_p8), %s457_s21, 5 }
  0x38   : > { %s466_s29 = scalar_lea.vmem (!%p451_p8), [#allocation6], %s1739_s28  ;;  %s459_s30 = scalar_lea.vmem (!%p451_p8), [#allocation5], %s1739_s28 }
  0x39   : > { %s473_s15 = scalar_lea.vmem (!%p451_p8), [#allocation7], %s1739_s28 }
  0x3c   : > { %v1478_v24 = vld [vmem:[%s466_s29 + $0x18] sm:$0xff]  ;;  %v1477_v25 = vld [vmem:[%s466_s29 + $0x10] sm:$0xff]  ;;  %v1476_v26 = vld [vmem:[%s466_s29 + $0x8] sm:$0xff]  ;;  %vm671_vm0 = vcmask 523264   ;;  %vm545_vm1 = vcmask 7168   ;;  %v1645_v34 = vmov -inf  }
  0x3d   : > { %638 = vmatpush.bf16.xpose.msra.mxu0 %v1478_v24  ;;  %1502 = vmatpush.bf16.xpose.msra.mxu2 %v1478_v24  ;;  %v1475_v27 = vld [vmem:[%s466_s29] sm:$0xff]  ;;  %v1473_v29 = vld [vmem:[%s459_s30 + $0x10] sm:$0xff]  ;;  %v1472_v30 = vld [vmem:[%s459_s30 + $0x8] sm:$0xff]  ;;  %550 = vst.msk [vmem:[#allocation2 + $0x20] sm:$0xff] %vm545_vm1, %v1645_v34  ;;  %v1646_v49 = vmov 0   ;;  %v1647_v50 = vmov 0.0  }
  0x3e   : > { %v1471_v28 = vld [vmem:[%s459_s30] sm:$0xff]  ;;  %v1474_v31 = vld [vmem:[%s459_s30 + $0x18] sm:$0xff]  ;;  %546 = vst.msk [vmem:[#allocation2] sm:$0xff] %vm545_vm1, %v1645_v34  ;;  %1556 = vset.pattern.permute.xlu1 %v1646_v49  ;;  %1554 = vset.pattern.permute.xlu2 %v1646_v49  ;;  %v1481_v23 = vld [vmem:[%s473_s15 + $0x10] sm:$0xff]  ;;  %s2024_s17 = smov (!%p521_p9, %s1635_s17), 1 }
  0x3f   : > { %547 = vst.msk [vmem:[#allocation2 + $0x8] sm:$0xff] %vm545_vm1, %v1645_v34  ;;  %1555 = vset.pattern.permute.xlu0 %v1646_v49  ;;  %v1482_v21 = vld [vmem:[%s473_s15 + $0x18] sm:$0xff]  ;;  %v1480_v24 = vld [vmem:[%s473_s15 + $0x8] sm:$0xff]  ;;  %s1469_s5 = sshll.u32 %s2024_s17, 5 }
  0x40   : > { %548 = vst.msk [vmem:[#allocation2 + $0x10] sm:$0xff] %vm545_vm1, %v1645_v34  ;;  %1506 = vmatpush.bf16.msra.mxu3 %v1482_v21  ;;  %957 = vmatpush.bf16.msra.mxu1 %v1482_v21  ;;  %s1962_s8 = scalar_lea.vmem %s2012_s3, %s1469_s5  ;;  %s1972_s10 = scalar_lea.vmem %s2013_s4, %s1469_s5 }
  0x41   : > { %549 = vst.msk [vmem:[#allocation2 + $0x18] sm:$0xff] %vm545_vm1, %v1645_v34 }
  0x42   : > { %551 = vst.msk [vmem:[#allocation2 + $0x28] sm:$0xff] %vm545_vm1, %v1645_v34 }
  0x43   : > { %552 = vst.msk [vmem:[#allocation2 + $0x30] sm:$0xff] %vm545_vm1, %v1645_v34 }
  0x44   : > { %553 = vst.msk [vmem:[#allocation2 + $0x38] sm:$0xff] %vm545_vm1, %v1645_v34  ;;  %v1792_v54 = vld [vmem:[#allocation2 + $0x20] sm:$0xff]  ;;  %1507 = vmatpush.bf16.msra.mxu3 %v1481_v23  ;;  %958 = vmatpush.bf16.msra.mxu1 %v1481_v23 }
  0x45   : > { %639 = vmatpush.bf16.xpose.msra.mxu0 %v1477_v25  ;;  %1503 = vmatpush.bf16.xpose.msra.mxu2 %v1477_v25  ;;  %559 = vst.msk [vmem:[#allocation3 + $0x28] sm:$0xff] %vm545_vm1, %v1647_v50  ;;  %v663_v51 = vld [vmem:[#allocation2] sm:$0xff] }
  0x46   : > { %554 = vst.msk [vmem:[#allocation3] sm:$0xff] %vm545_vm1, %v1647_v50  ;;  %v1802_v58 = vld [vmem:[#allocation2 + $0x8] sm:$0xff] }
  0x47   : > { %555 = vst.msk [vmem:[#allocation3 + $0x8] sm:$0xff] %vm545_vm1, %v1647_v50  ;;  %v1804_v60 = vld [vmem:[#allocation2 + $0x10] sm:$0xff] }
  0x48   : > { %556 = vst.msk [vmem:[#allocation3 + $0x10] sm:$0xff] %vm545_vm1, %v1647_v50  ;;  %v1825_v6 = vld [vmem:[#allocation2 + $0x18] sm:$0xff]  ;;  %1508 = vmatpush.bf16.msra.mxu3 %v1480_v24  ;;  %959 = vmatpush.bf16.msra.mxu1 %v1480_v24 }
  0x49   : > { %557 = vst.msk [vmem:[#allocation3 + $0x18] sm:$0xff] %vm545_vm1, %v1647_v50  ;;  %v1823_v3 = vld [vmem:[#allocation2 + $0x28] sm:$0xff] }
  0x4a   : > { %558 = vst.msk [vmem:[#allocation3 + $0x20] sm:$0xff] %vm545_vm1, %v1647_v50  ;;  %v1821_v2 = vld [vmem:[#allocation2 + $0x30] sm:$0xff] }
  0x4b   : > { %560 = vst.msk [vmem:[#allocation3 + $0x30] sm:$0xff] %vm545_vm1, %v1647_v50  ;;  %v1850_v14 = vld [vmem:[#allocation2 + $0x38] sm:$0xff] }
  0x4c   : > { %561 = vst.msk [vmem:[#allocation3 + $0x38] sm:$0xff] %vm545_vm1, %v1647_v50 }
  0x4d   : > { %640 = vmatpush.bf16.xpose.msra.mxu0 %v1476_v26  ;;  %1504 = vmatpush.bf16.xpose.msra.mxu2 %v1476_v26 }
  0x55   : > { %641 = vmatpush.bf16.xpose.msra.mxu0 %v1475_v27  ;;  %1505 = vmatpush.bf16.xpose.msra.mxu2 %v1475_v27  ;;  %v1479_v27 = vld [vmem:[%s473_s15] sm:$0xff] }
  0x56   : > { %1509 = vmatpush.bf16.msra.mxu3 %v1479_v27  ;;  %960 = vmatpush.bf16.msra.mxu1 %v1479_v27 }
  0x5c   : > { %642 = vmatmul.bf16.vlgmr.msra.gmra.mxu0 %v1471_v28  ;;  %652 = vmatmul.bf16.vlgmr.msra.gmra.mxu2 %v1473_v29 }
  0x6c   : > { %647 = vmatmul.bf16.gmra.mxu0 %v1472_v30  ;;  %657 = vmatmul.bf16.gmra.mxu2 %v1474_v31 }
  0xd9   : > { %v1743_v32 = vpop.f32.mrf.mxu0 }
  0xda   : > { %v672_v33 = vsel %vm671_vm0, %v1743_v32, -inf }
  0xdb   : > { %673 = vmax.xlane.f32.xlu0 %v672_v33 }
  0xdf   : > { %v1752_v35 = vpop.f32.mrf.mxu2 }
  0xe0   : > { %v684_v36 = vsel %vm671_vm0, %v1752_v35, -inf }
  0xe1   : > { %685 = vmax.xlane.f32.xlu1 %v684_v36  ;;  %v1758_v37 = vpop.f32.mrf.mxu0 }
  0xe2   : > { %v675_v39 = vsel %vm671_vm0, %v1758_v37, -inf }
  0xe7   : > { %v1761_v38 = vpop.f32.mrf.mxu2 }
  0xe8   : > { %v687_v44 = vsel %vm671_vm0, %v1761_v38, -inf }
  0xe9   : > { %676 = vmax.xlane.f32.xlu1 %v675_v39  ;;  %v1765_v40 = vpop.f32.mrf.mxu0 }
  0xea   : > { %v678_v41 = vsel %vm671_vm0, %v1765_v40, -inf }
  0xeb   : > { %679 = vmax.xlane.f32.xlu0 %v678_v41 }
  0xef   : > { %v1769_v42 = vpop.f32.mrf.mxu2 }
  0xf0   : > { %v690_v43 = vsel %vm671_vm0, %v1769_v42, -inf }
  0xf1   : > { %691 = vmax.xlane.f32.xlu2 %v690_v43  ;;  %688 = vmax.xlane.f32.xlu1 %v687_v44  ;;  %v1775_v45 = vpop.f32.mrf.mxu0 }
  0xf2   : > { %v681_v46 = vsel %vm671_vm0, %v1775_v45, -inf }
  0xf3   : > { %682 = vmax.xlane.f32.xlu0 %v681_v46 }
  0xf7   : > { %v1779_v47 = vpop.f32.mrf.mxu2 }
  0xf8   : > { %v693_v48 = vsel %vm671_vm0, %v1779_v47, -inf }
  0xf9   : > { %694 = vmax.xlane.f32.xlu2 %v693_v48 }
 0x14e   : > { %v674_v52 = vpop.xlane.xlu0 %673 }
 0x14f   : > { %v696_v53 = vmax.f32 %v663_v51, %v674_v52 }
 0x151   : > { %998 = vst.msk [vmem:[#allocation2] sm:$0xff] %vm545_vm1, %v696_v53  ;;  %v704_v18 = vsub.f32 %v663_v51, %v696_v53 }
 0x153   : > { %v712_v19 = vmul.f32 1.442695, %v704_v18 }
 0x154   : > { %v686_v55 = vpop.xlane.xlu1 %685 }
 0x155   : > { %v1795_v56 = vmax.f32 %v1792_v54, %v686_v55  ;;  %1557 = vpow2.f32 %v712_v19 }
 0x157   : > { %v708_v57 = vsub.f32 %v1792_v54, %v1795_v56  ;;  %1002 = vst.msk [vmem:[#allocation2 + $0x20] sm:$0xff] %vm545_vm1, %v1795_v56  ;;  %750 = vperm.xlu1 %1556, %v1795_v56  }
 0x159   : > { %v720_v24 = vmul.f32 1.442695, %v708_v57 }
 0x15b   : > { %v1862_v20 = vpop.eup %1557 }
 0x15c   : > { %v677_v59 = vpop.xlane.xlu1 %676 }
 0x15d   : > { %v1807_v61 = vmax.f32 %v1802_v58, %v677_v59 }
 0x15e   : > { %v680_v62 = vpop.xlane.xlu0 %679 }
 0x15f   : > { %v705_v63 = vsub.f32 %v1802_v58, %v1807_v61  ;;  %999 = vst.msk [vmem:[#allocation2 + $0x8] sm:$0xff] %vm545_vm1, %v1807_v61  ;;  %v1814_v0 = vmax.f32 %v1804_v60, %v680_v62 }
 0x161   : > { %v706_v1 = vsub.f32 %v1804_v60, %v1814_v0  ;;  %1000 = vst.msk [vmem:[#allocation2 + $0x10] sm:$0xff] %vm545_vm1, %v1814_v0  ;;  %740 = vperm.xlu2 %1554, %v1814_v0   ;;  %v714_v54 = vmul.f32 1.442695, %v705_v63 }
 0x164   : > { %v692_v4 = vpop.xlane.xlu2 %691  ;;  %v689_v5 = vpop.xlane.xlu1 %688 }
 0x165   : > { %v1828_v7 = vmax.f32 %v1821_v2, %v692_v4  ;;  %v1831_v8 = vmax.f32 %v1823_v3, %v689_v5 }
 0x166   : > { %v683_v9 = vpop.xlane.xlu0 %682 }
 0x167   : > { %v710_v10 = vsub.f32 %v1821_v2, %v1828_v7  ;;  %1004 = vst.msk [vmem:[#allocation2 + $0x30] sm:$0xff] %vm545_vm1, %v1828_v7  ;;  %v709_v11 = vsub.f32 %v1823_v3, %v1831_v8  ;;  %v1840_v12 = vmax.f32 %v1825_v6, %v683_v9 }
 0x168   : > { %1003 = vst.msk [vmem:[#allocation2 + $0x28] sm:$0xff] %vm545_vm1, %v1831_v8 }
 0x169   : > { %v707_v13 = vsub.f32 %v1825_v6, %v1840_v12  ;;  %1001 = vst.msk [vmem:[#allocation2 + $0x18] sm:$0xff] %vm545_vm1, %v1840_v12  ;;  %755 = vperm.xlu2 %1554, %v1831_v8   ;;  %745 = vperm.xlu0 %1555, %v1840_v12   ;;  %v724_v6 = vmul.f32 1.442695, %v710_v10  ;;  %v716_v10 = vmul.f32 1.442695, %v706_v1  ;;  %v792_v8 = vld [vmem:[#allocation3] sm:$0xff] }
 0x16a   : > { %v722_v56 = vmul.f32 1.442695, %v709_v11 }
 0x16b   : > { %v718_v62 = vmul.f32 1.442695, %v707_v13 }
 0x16c   : > { %v695_v15 = vpop.xlane.xlu2 %694 }
 0x16d   : > { %v1853_v16 = vmax.f32 %v1850_v14, %v695_v15 }
 0x16f   : > { %v711_v17 = vsub.f32 %v1850_v14, %v1853_v16  ;;  %1005 = vst.msk [vmem:[#allocation2 + $0x38] sm:$0xff] %vm545_vm1, %v1853_v16  ;;  %765 = vperm.xlu1 %1556, %v1853_v16  }
 0x171   : > { %760 = vperm.xlu2 %1554, %v1828_v7   ;;  %v726_v0 = vmul.f32 1.442695, %v711_v17  ;;  %v797_v17 = vld [vmem:[#allocation3 + $0x28] sm:$0xff] }
 0x177   : > { %735 = vperm.xlu1 %1556, %v1807_v61   ;;  %v794_v61 = vld [vmem:[#allocation3 + $0x10] sm:$0xff] }
 0x179   : > { %730 = vperm.xlu2 %1554, %v696_v53  }
 0x17f   : > { %859 = vperm.xlu1 %1556, %v1862_v20  }
 0x1bb   : > { %v741_v22 = vpop.permute.xlu2 %740 }
 0x1bc   : > { %v770_v28 = vsub.f32 %v1765_v40, %v741_v22 }
 0x1be   : > { %v780_v30 = vmul.f32 1.442695, %v770_v28 }
 0x1c3   : > { %v756_v25 = vpop.permute.xlu2 %755 }
 0x1c4   : > { %v773_v26 = vsub.f32 %v1761_v38, %v756_v25 }
 0x1c6   : > { %v786_v29 = vmul.f32 1.442695, %v773_v26 }
 0x1c8   : > { %1559 = vpow2.f32 %v786_v29 }
 0x1c9   : > { %1561 = vpow2.f32 %v780_v30  ;;  %v751_v36 = vpop.permute.xlu1 %750 }
 0x1ca   : > { %v772_v38 = vsub.f32 %v1752_v35, %v751_v36 }
 0x1cb   : > { %v761_v31 = vpop.permute.xlu2 %760 }
 0x1cc   : > { %v784_v46 = vmul.f32 1.442695, %v772_v38 }
 0x1ce   : > { %v1560_v33 = vpop.eup %1559 }
 0x1cf   : > { %v823_v34 = vsel %vm671_vm0, %v1560_v33, 0.0  ;;  %v1562_v41 = vpop.eup %1561 }
 0x1d0   : > { %824 = vadd.xlane.f32.xlu1 %v823_v34  ;;  %v814_v40 = vsel %vm671_vm0, %v1562_v41, 0.0 }
 0x1d3   : > { %v731_v39 = vpop.permute.xlu2 %730 }
 0x1d4   : > { %v768_v43 = vsub.f32 %v1743_v32, %v731_v39  ;;  %v796_v39 = vld [vmem:[#allocation3 + $0x20] sm:$0xff] }
 0x1d6   : > { %v776_v44 = vmul.f32 1.442695, %v768_v43 }
 0x1d8   : > { %1563 = vpow2.f32 %v776_v44  ;;  %815 = vadd.xlane.f32.xlu1 %v814_v40 }
 0x1d9   : > { %1565 = vpow2.f32 %v784_v46 }
 0x1db   : > { %v746_v48 = vpop.permute.xlu0 %745 }
 0x1dc   : > { %v771_v49 = vsub.f32 %v1775_v45, %v746_v48 }
 0x1de   : > { %v1564_v50 = vpop.eup %1563  ;;  %v782_v51 = vmul.f32 1.442695, %v771_v49  ;;  %v799_v49 = vld [vmem:[#allocation3 + $0x38] sm:$0xff] }
 0x1df   : > { %v808_v52 = vsel %vm671_vm0, %v1564_v50, 0.0  ;;  %v1566_v35 = vpop.eup %1565 }
 0x1e0   : > { %1567 = vpow2.f32 %v782_v51  ;;  %809 = vadd.xlane.f32.xlu0 %v808_v52  ;;  %v820_v45 = vsel %vm671_vm0, %v1566_v35, 0.0  ;;  %v907_v2 = vpack.c.bf16 %v1560_v33, %v1566_v35 }
 0x1e1   : > { %v766_v53 = vpop.permute.xlu1 %765 }
 0x1e2   : > { %v775_v32 = vsub.f32 %v1779_v47, %v766_v53  ;;  %v774_v47 = vsub.f32 %v1769_v42, %v761_v31  ;;  %v800_v31 = vmul.f32 %v1862_v20, %v792_v8 }
 0x1e4   : > { %v790_v55 = vmul.f32 1.442695, %v775_v32  ;;  %v788_v19 = vmul.f32 1.442695, %v774_v47 }
 0x1e6   : > { %v1568_v59 = vpop.eup %1567  ;;  %1569 = vpow2.f32 %v790_v55 }
 0x1e7   : > { %v906_v4 = vpack.c.bf16 %v1568_v59, %v1562_v41  ;;  %1571 = vpow2.f32 %v718_v62  ;;  %v817_v26 = vsel %vm671_vm0, %v1568_v59, 0.0 }
 0x1e8   : > { %821 = vadd.xlane.f32.xlu0 %v820_v45 }
 0x1e9   : > { %v736_v5 = vpop.permute.xlu1 %735  ;;  %1464 = vmatmul.msk.bf16.vlgmr.msra.gmra.mxu3 %vm671_vm0, %v906_v4 }
 0x1ea   : > { %v769_v9 = vsub.f32 %v1758_v37, %v736_v5 }
 0x1ec   : > { %v1570_v15 = vpop.eup %1569  ;;  %v778_v18 = vmul.f32 1.442695, %v769_v9 }
 0x1ed   : > { %v829_v12 = vsel %vm671_vm0, %v1570_v15, 0.0  ;;  %v1886_v13 = vpop.eup %1571 }
 0x1ee   : > { %1573 = vpow2.f32 %v778_v18 }
 0x1ef   : > { %1575 = vpow2.f32 %v724_v6 }
 0x1f0   : > { %830 = vadd.xlane.f32.xlu0 %v829_v12  ;;  %1577 = vpow2.f32 %v788_v19 }
 0x1f1   : > { %874 = vperm.xlu1 %1556, %v1886_v13   ;;  %1579 = vpow2.f32 %v716_v10  ;;  %v1916_v16 = vpop.permute.xlu1 %859 }
 0x1f2   : > { %1581 = vpow2.f32 %v720_v24 }
 0x1f3   : > { %1583 = vpow2.f32 %v726_v0 }
 0x1f4   : > { %v1574_v21 = vpop.eup %1573  ;;  %1585 = vpow2.f32 %v714_v54 }
 0x1f5   : > { %v811_v37 = vsel %vm671_vm0, %v1574_v21, 0.0  ;;  %v905_v42 = vpack.c.bf16 %v1574_v21, %v1564_v50  ;;  %v1891_v7 = vpop.eup %1575  ;;  %1587 = vpow2.f32 %v722_v56  ;;  %v798_v56 = vld [vmem:[#allocation3 + $0x30] sm:$0xff] }
 0x1f6   : > { %812 = vadd.xlane.f32.xlu2 %v811_v37  ;;  %v1578_v22 = vpop.eup %1577 }
 0x1f7   : > { %1463 = vmatmul.msk.bf16.vlgmr.msra.gmra.mxu1 %vm671_vm0, %v905_v42  ;;  %v826_v23 = vsel %vm671_vm0, %v1578_v22, 0.0  ;;  %v1580_v25 = vpop.eup %1579  ;;  %v908_v60 = vpack.c.bf16 %v1570_v15, %v1578_v22  ;;  %v793_v15 = vld [vmem:[#allocation3 + $0x8] sm:$0xff] }
 0x1f8   : > { %v1582_v1 = vpop.eup %1581  ;;  %v802_v63 = vmul.f32 %v1580_v25, %v794_v61 }
 0x1f9   : > { %1465 = vmatmul.msk.bf16.gmra.mxu3 %vm671_vm0, %v907_v2  ;;  %889 = vperm.xlu1 %1556, %v1891_v7   ;;  %v1584_v27 = vpop.eup %1583  ;;  %v804_v43 = vmul.f32 %v1582_v1, %v796_v39 }
 0x1fa   : > { %v1913_v57 = vpop.eup %1585  ;;  %v807_v35 = vmul.f32 %v1584_v27, %v799_v49 }
 0x1fb   : > { %v1588_v14 = vpop.eup %1587  ;;  %v801_v21 = vmul.f32 %v1913_v57, %v793_v15 }
 0x1fc   : > { %v805_v28 = vmul.f32 %v1588_v14, %v797_v17 }
 0x1fe   : > { %827 = vadd.xlane.f32.xlu2 %v826_v23 }
 0x204   : > { %869 = vperm.xlu0 %1555, %v1580_v25  }
 0x206   : > { %818 = vadd.xlane.f32.xlu2 %v817_v26 }
 0x209   : > { %1466 = vmatmul.msk.bf16.gmra.mxu3 %vm671_vm0, %v908_v60 }
 0x20c   : > { %879 = vperm.xlu0 %1555, %v1582_v1  }
 0x214   : > { %894 = vperm.xlu0 %1555, %v1584_v27  }
 0x21e   : > { %864 = vperm.xlu2 %1554, %v1913_v57  }
 0x226   : > { %884 = vperm.xlu2 %1554, %v1588_v14  }
 0x243   : > { %v825_v29 = vpop.xlane.xlu1 %824 }
 0x244   : > { %v837_v58 = vadd.f32 %v825_v29, %v805_v28 }
 0x246   : > { %846 = vst.msk [vmem:[#allocation3 + $0x28] sm:$0xff] %vm545_vm1, %v837_v58  ;;  %v806_v58 = vmul.f32 %v1891_v7, %v798_v56 }
 0x24b   : > { %v816_v30 = vpop.xlane.xlu1 %815 }
 0x24c   : > { %v834_v3 = vadd.f32 %v816_v30, %v802_v63 }
 0x24d   : > { %v1920_v11 = vld [vmem:[#allocation3 + $0x28] sm:$0xff] }
 0x24e   : > { %843 = vst.msk [vmem:[#allocation3 + $0x10] sm:$0xff] %vm545_vm1, %v834_v3  ;;  %1589 = vrcp.f32 %v1920_v11  ;;  %vm1100_vm7 = vweird.f32 %v1920_v11  ;;  %v1106_v37 = vand.u32 2147483648, %v1920_v11  ;;  %v1104_v10 = vand.u32 2147483647, %v1920_v11 }
 0x250   : > { %v1107_v1 = vor.u32 1.1754944e-38, %v1106_v37  ;;  %vm1105_vm12 = vcmp.eq.f32.partialorder %v1104_v10, 8.507059e+37 }
 0x253   : > { %v810_v33 = vpop.xlane.xlu0 %809 }
 0x254   : > { %v832_v34 = vadd.f32 %v810_v33, %v800_v31  ;;  %v1925_v41 = vpop.eup %1589 }
 0x255   : > { %v1019_v36 = vld [vmem:[#allocation3 + $0x10] sm:$0xff]  ;;  %v1096_v44 = vmul.f32 %v1925_v41, %v1920_v11  ;;  %vm1101_vm6 = vweird.f32 %v1925_v41 }
 0x256   : > { %841 = vst.msk [vmem:[#allocation3] sm:$0xff] %vm545_vm1, %v832_v34  ;;  %1591 = vrcp.f32 %v1019_v36  ;;  %v1064_v52 = vand.u32 2147483648, %v1019_v36  ;;  %v1062_v32 = vand.u32 2147483647, %v1019_v36  ;;  %vm1058_vm3 = vweird.f32 %v1019_v36  ;;  %vm1938_vm9 = vmor %vm1100_vm7, %vm1101_vm6 }
 0x257   : > { %v1097_v51 = vsub.f32 1.0, %v1096_v44 }
 0x258   : > { %v1065_v5 = vor.u32 1.1754944e-38, %v1064_v52  ;;  %vm1063_vm5 = vcmp.eq.f32.partialorder %v1062_v32, 8.507059e+37 }
 0x259   : > { %v1098_v62 = vmul.f32 %v1925_v41, %v1097_v51 }
 0x25b   : > { %v822_v38 = vpop.xlane.xlu0 %821  ;;  %v1099_v12 = vadd.f32 %v1925_v41, %v1098_v62 }
 0x25c   : > { %v1592_v40 = vpop.eup %1591  ;;  %v836_v46 = vadd.f32 %v822_v38, %v804_v43 }
 0x25d   : > { %v1054_v48 = vmul.f32 %v1592_v40, %v1019_v36  ;;  %v1017_v20 = vld [vmem:[#allocation3] sm:$0xff]  ;;  %vm1059_vm2 = vweird.f32 %v1592_v40  ;;  %v1103_v26 = vsel %vm1938_vm9, %v1925_v41, %v1099_v12  ;;  %v795_v36 = vld [vmem:[#allocation3 + $0x18] sm:$0xff] }
 0x25e   : > { %845 = vst.msk [vmem:[#allocation3 + $0x20] sm:$0xff] %vm545_vm1, %v836_v46  ;;  %1593 = vrcp.f32 %v1017_v20  ;;  %vm1060_vm4 = vmor %vm1058_vm3, %vm1059_vm2  ;;  %v1036_v42 = vand.u32 2147483648, %v1017_v20  ;;  %v1034_v23 = vand.u32 2147483647, %v1017_v20  ;;  %vm1030_vm10 = vweird.f32 %v1017_v20 }
 0x25f   : > { %v1055_v50 = vsub.f32 1.0, %v1054_v48  ;;  %v1108_v17 = vsel %vm1105_vm12, %v1107_v1, %v1103_v26  ;;  %v803_v41 = vmul.f32 %v1886_v13, %v795_v36 }
 0x260   : > { %v1037_v27 = vor.u32 1.1754944e-38, %v1036_v42  ;;  %vm1035_vm13 = vcmp.eq.f32.partialorder %v1034_v23, 8.507059e+37 }
 0x261   : > { %v1056_v53 = vmul.f32 %v1592_v40, %v1055_v50 }
 0x263   : > { %v831_v55 = vpop.xlane.xlu0 %830  ;;  %v1057_v59 = vadd.f32 %v1592_v40, %v1056_v53 }
 0x264   : > { %v1594_v45 = vpop.eup %1593  ;;  %v839_v4 = vadd.f32 %v831_v55, %v807_v35 }
 0x265   : > { %v1061_v9 = vsel %vm1060_vm4, %v1592_v40, %v1057_v59  ;;  %v1026_v47 = vmul.f32 %v1594_v45, %v1017_v20  ;;  %v1021_v18 = vld [vmem:[#allocation3 + $0x20] sm:$0xff]  ;;  %vm1031_vm8 = vweird.f32 %v1594_v45 }
 0x266   : > { %848 = vst.msk [vmem:[#allocation3 + $0x38] sm:$0xff] %vm545_vm1, %v839_v4  ;;  %v1066_v6 = vsel %vm1063_vm5, %v1065_v5, %v1061_v9  ;;  %1595 = vrcp.f32 %v1021_v18  ;;  %vm1032_vm11 = vmor %vm1030_vm10, %vm1031_vm8  ;;  %v1092_v61 = vand.u32 2147483648, %v1021_v18  ;;  %v1090_v3 = vand.u32 2147483647, %v1021_v18 }
 0x267   : > { %1149 = vperm.xlu0 %1555, %v1066_v6   ;;  %v1027_v19 = vsub.f32 1.0, %v1026_v47  ;;  %vm1086_vm15 = vweird.f32 %v1021_v18 }
 0x268   : > { %v1093_v33 = vor.u32 1.1754944e-38, %v1092_v61  ;;  %vm1091_vm2 = vcmp.eq.f32.partialorder %v1090_v3, 8.507059e+37 }
 0x269   : > { %v813_v2 = vpop.xlane.xlu2 %812  ;;  %v1028_v22 = vmul.f32 %v1594_v45, %v1027_v19 }
 0x26a   : > { %v833_v24 = vadd.f32 %v813_v2, %v801_v21 }
 0x26b   : > { %v1029_v60 = vadd.f32 %v1594_v45, %v1028_v22 }
 0x26c   : > { %v1596_v0 = vpop.eup %1595  ;;  %842 = vst.msk [vmem:[#allocation3 + $0x8] sm:$0xff] %vm545_vm1, %v833_v24 }
 0x26d   : > { %v1033_v54 = vsel %vm1032_vm11, %v1594_v45, %v1029_v60  ;;  %v1082_v57 = vmul.f32 %v1596_v0, %v1021_v18  ;;  %v1946_v14 = vld [vmem:[#allocation3 + $0x38] sm:$0xff]  ;;  %vm1087_vm14 = vweird.f32 %v1596_v0 }
 0x26e   : > { %v1038_v28 = vsel %vm1035_vm13, %v1037_v27, %v1033_v54  ;;  %1597 = vrcp.f32 %v1946_v14  ;;  %vm1088_vm0 = vmor %vm1086_vm15, %vm1087_vm14  ;;  %v1134_v4 = vand.u32 2147483648, %v1946_v14  ;;  %vm1128_vm7 = vweird.f32 %v1946_v14 }
 0x26f   : > { %1164 = vperm.xlu0 %1555, %v1108_v17   ;;  %1139 = vperm.xlu2 %1554, %v1038_v28   ;;  %v1083_v29 = vsub.f32 1.0, %v1082_v57  ;;  %v1132_v5 = vand.u32 2147483647, %v1946_v14 }
 0x270   : > { %v1135_v18 = vor.u32 1.1754944e-38, %v1134_v4 }
 0x271   : > { %v828_v63 = vpop.xlane.xlu2 %827  ;;  %v1084_v30 = vmul.f32 %v1596_v0, %v1083_v29  ;;  %vm1133_vm9 = vcmp.eq.f32.partialorder %v1132_v5, 8.507059e+37  ;;  %v1965_v29 = vld [vmem:[%s1962_s8] sm:$0xff]  }
 0x272   : > { %v838_v8 = vadd.f32 %v828_v63, %v806_v58  ;;  %v897_v58 = vmul.f32 0.0, %v1916_v16 }
 0x273   : > { %v1085_v11 = vadd.f32 %v1596_v0, %v1084_v30  ;;  %v1018_v31 = vld [vmem:[#allocation3 + $0x8] sm:$0xff]  ;;  %v1485_v30 = vunpack.c.l.bf16 %v1965_v29 }
 0x274   : > { %847 = vst.msk [vmem:[#allocation3 + $0x30] sm:$0xff] %vm545_vm1, %v838_v8  ;;  %1599 = vrcp.f32 %v1018_v31  ;;  %v1598_v7 = vpop.eup %1597  ;;  %v1050_v50 = vand.u32 2147483648, %v1018_v31  ;;  %v1048_v52 = vand.u32 2147483647, %v1018_v31  ;;  %vm1044_vm4 = vweird.f32 %v1018_v31  ;;  %v962_v28 = vpop.f32.mrf.mxu1 }
 0x275   : > { %v1089_v34 = vsel %vm1088_vm0, %v1596_v0, %v1085_v11  ;;  %v1124_v38 = vmul.f32 %v1598_v7, %v1946_v14  ;;  %v967_v14 = vpop.f32.mrf.mxu3  ;;  %v982_v63 = vadd.f32 %v962_v28, %v897_v58 }
 0x276   : > { %v1094_v39 = vsel %vm1091_vm2, %v1093_v33, %v1089_v34  ;;  %v1051_v13 = vor.u32 1.1754944e-38, %v1050_v50  ;;  %vm1049_vm6 = vcmp.eq.f32.partialorder %v1048_v52, 8.507059e+37  ;;  %v870_v57 = vpop.permute.xlu0 %869 }
 0x277   : > { %1159 = vperm.xlu1 %1556, %v1094_v39   ;;  %v1125_v20 = vsub.f32 1.0, %v1124_v38  ;;  %v899_v34 = vmul.f32 0.0, %v870_v57  ;;  %v875_v39 = vpop.permute.xlu1 %874 }
 0x278   : > { %v900_v5 = vmul.f32 0.0, %v875_v39 }
 0x279   : > { %v819_v43 = vpop.xlane.xlu2 %818  ;;  %v1126_v32 = vmul.f32 %v1598_v7, %v1125_v20 }
 0x27a   : > { %v1600_v44 = vpop.eup %1599  ;;  %v835_v40 = vadd.f32 %v819_v43, %v803_v41  ;;  %v984_v41 = vadd.f32 %v967_v14, %v899_v34 }
 0x27b   : > { %v1040_v46 = vmul.f32 %v1600_v44, %v1018_v31  ;;  %v1023_v49 = vld [vmem:[#allocation3 + $0x30] sm:$0xff]  ;;  %vm1045_vm3 = vweird.f32 %v1600_v44  ;;  %v1127_v62 = vadd.f32 %v1598_v7, %v1126_v32 }
 0x27c   : > { %844 = vst.msk [vmem:[#allocation3 + $0x18] sm:$0xff] %vm545_vm1, %v835_v40  ;;  %1601 = vrcp.f32 %v1023_v49  ;;  %vm1046_vm5 = vmor %vm1044_vm4, %vm1045_vm3  ;;  %vm1129_vm1 = vweird.f32 %v1598_v7  ;;  %v1120_v60 = vand.u32 2147483648, %v1023_v49  ;;  %vm1114_vm15 = vweird.f32 %v1023_v49 }
 0x27d   : > { %v1041_v48 = vsub.f32 1.0, %v1040_v46  ;;  %vm1130_vm8 = vmor %vm1128_vm7, %vm1129_vm1  ;;  %v1118_v0 = vand.u32 2147483647, %v1023_v49  ;;  %v969_v11 = vpop.f32.mrf.mxu3  ;;  %vm1217_vm3 = vcmask 125952  }
 0x27e   : > { %v1131_v9 = vsel %vm1130_vm8, %v1598_v7, %v1127_v62  ;;  %v1121_v27 = vor.u32 1.1754944e-38, %v1120_v60  ;;  %v880_v61 = vpop.permute.xlu0 %879  ;;  %v1499_v7 = vld [vmem:[%s1962_s8 + $0x8] sm:$0xff]  }
 0x27f   : > { %v1042_v51 = vmul.f32 %v1600_v44, %v1041_v48  ;;  %v1136_v12 = vsel %vm1133_vm9, %v1135_v18, %v1131_v9  ;;  %vm1119_vm2 = vcmp.eq.f32.partialorder %v1118_v0, 8.507059e+37  ;;  %v1489_v43 = vunpack.c.l.bf16 %v1499_v7  ;;  %v1500_v48 = vld [vmem:[%s1962_s8 + $0x10] sm:$0xff]   ;;  %v890_v52 = vpop.permute.xlu1 %889 }
 0x280   : > { %v1493_v62 = vunpack.c.l.bf16 %v1500_v48  ;;  %v1490_v18 = vunpack.c.h.bf16 %v1499_v7 }
 0x281   : > { %v1043_v53 = vadd.f32 %v1600_v44, %v1042_v51  ;;  %v865_v56 = vpop.permute.xlu2 %864  ;;  %v1494_v51 = vunpack.c.h.bf16 %v1500_v48 }
 0x282   : > { %v1602_v45 = vpop.eup %1601 }
 0x283   : > { %v1047_v35 = vsel %vm1046_vm5, %v1600_v44, %v1043_v53  ;;  %v1020_v55 = vld [vmem:[#allocation3 + $0x18] sm:$0xff]  ;;  %v1110_v15 = vmul.f32 %v1602_v45, %v1023_v49  ;;  %vm1115_vm14 = vweird.f32 %v1602_v45 }
 0x284   : > { %v1052_v59 = vsel %vm1049_vm6, %v1051_v13, %v1047_v35  ;;  %1603 = vrcp.f32 %v1020_v55  ;;  %v1078_v37 = vand.u32 2147483648, %v1020_v55  ;;  %v1076_v2 = vand.u32 2147483647, %v1020_v55  ;;  %vm1116_vm0 = vmor %vm1114_vm15, %vm1115_vm14 }
 0x285   : > { %1144 = vperm.xlu1 %1556, %v1052_v59   ;;  %v1111_v21 = vsub.f32 1.0, %v1110_v15  ;;  %vm1072_vm11 = vweird.f32 %v1020_v55  ;;  %v972_v36 = vpop.f32.mrf.mxu3  ;;  %v901_v13 = vmul.f32 0.0, %v880_v61  ;;  %v985_v15 = vadd.f32 %v969_v11, %v900_v5 }
 0x286   : > { %v1079_v23 = vor.u32 1.1754944e-38, %v1078_v37  ;;  %vm1077_vm13 = vcmp.eq.f32.partialorder %v1076_v2, 8.507059e+37  ;;  %v895_v16 = vpop.permute.xlu0 %894  ;;  %v903_v2 = vmul.f32 0.0, %v890_v52 }
 0x287   : > { %v1112_v22 = vmul.f32 %v1602_v45, %v1111_v21  ;;  %v986_v59 = vadd.f32 %v972_v36, %v901_v13  ;;  %v898_v21 = vmul.f32 0.0, %v865_v56  ;;  %v904_v14 = vmul.f32 0.0, %v895_v16 }
 0x289   : > { %v1113_v26 = vadd.f32 %v1602_v45, %v1112_v22  ;;  %v885_v17 = vpop.permute.xlu2 %884  ;;  %v964_v22 = vpop.f32.mrf.mxu1 }
 0x28a   : > { %v1604_v47 = vpop.eup %1603  ;;  %v902_v40 = vmul.f32 0.0, %v885_v17 }
 0x28b   : > { %v1068_v6 = vmul.f32 %v1604_v47, %v1020_v55  ;;  %vm1073_vm10 = vweird.f32 %v1604_v47  ;;  %v1117_v1 = vsel %vm1116_vm0, %v1602_v45, %v1113_v26 }
 0x28c   : > { %vm1074_vm12 = vmor %vm1072_vm11, %vm1073_vm10  ;;  %v1122_v54 = vsel %vm1119_vm2, %v1121_v27, %v1117_v1 }
 0x28d   : > { %1174 = vperm.xlu1 %1556, %v1136_v12   ;;  %v1069_v19 = vsub.f32 1.0, %v1068_v6  ;;  %v974_v49 = vpop.f32.mrf.mxu3 }
 0x28e   : > { %v987_v50 = vadd.f32 %v974_v49, %v902_v40 }
 0x28f   : > { %v1070_v42 = vmul.f32 %v1604_v47, %v1069_v19 }
 0x291   : > { %v1071_v10 = vadd.f32 %v1604_v47, %v1070_v42  ;;  %v1501_v42 = vld [vmem:[%s1962_s8 + $0x18] sm:$0xff]  }
 0x292   : > { %v1497_v26 = vunpack.c.l.bf16 %v1501_v42  ;;  %v1498_v61 = vunpack.c.h.bf16 %v1501_v42 }
 0x293   : > { %v1075_v24 = vsel %vm1074_vm12, %v1604_v47, %v1071_v10 }
 0x294   : > { %v1080_v25 = vsel %vm1077_vm13, %v1079_v23, %v1075_v24  ;;  %v983_v24 = vadd.f32 %v964_v22, %v898_v21 }
 0x295   : > { %1154 = vperm.xlu2 %1554, %v1080_v25   ;;  %v977_v19 = vpop.f32.mrf.mxu3  ;;  %v1486_v25 = vunpack.c.h.bf16 %v1965_v29 }
 0x296   : > { %v988_v23 = vadd.f32 %v977_v19, %v903_v2 }
 0x29d   : > { %1169 = vperm.xlu2 %1554, %v1122_v54   ;;  %v979_v57 = vpop.f32.mrf.mxu3 }
 0x29e   : > { %v989_v58 = vadd.f32 %v979_v57, %v904_v14 }
 0x2c9   : > { %v1140_v3 = vpop.permute.xlu2 %1139 }
 0x2ca   : > { %v1177_v8 = vmul.f32 %v1140_v3, %v982_v63 }
 0x2cc   : > { %v1201_v31 = vadd.f32 %v1485_v30, %v1177_v8 }
 0x2ce   : > { %v1209_v33 = vpack.c.bf16 %v1201_v31, %v1201_v31 }
 0x2d0   : > { %1218 = vst.msk [vmem:[%s1972_s10] sm:$0xf] %vm1217_vm3, %v1209_v33 }
 0x2d9   : > { %v1150_v38 = vpop.permute.xlu0 %1149 }
 0x2da   : > { %v1179_v44 = vmul.f32 %v1150_v38, %v984_v41 }
 0x2dc   : > { %v1203_v46 = vadd.f32 %v1489_v43, %v1179_v44 }
 0x2de   : > { %v1211_v20 = vpack.c.bf16 %v1203_v46, %v1203_v46 }
 0x2e0   : > { %1220 = vst.msk [vmem:[%s1972_s10 + $0x8] sm:$0xf] %vm1217_vm3, %v1211_v20 }
 0x2e1   : > { %v1165_v53 = vpop.permute.xlu0 %1164 }
 0x2e2   : > { %v1182_v32 = vmul.f32 %v1165_v53, %v987_v50 }
 0x2e4   : > { %v1206_v35 = vadd.f32 %v1494_v51, %v1182_v32 }
 0x2e6   : > { %v1214_v55 = vpack.c.bf16 %v1206_v35, %v1206_v35 }
 0x2e8   : > { %1223 = vst.msk [vmem:[%s1972_s10 + $0x14] sm:$0xf] %vm1217_vm3, %v1214_v55 }
 0x2e9   : > { %v1160_v45 = vpop.permute.xlu1 %1159 }
 0x2ea   : > { %v1181_v4 = vmul.f32 %v1160_v45, %v986_v59 }
 0x2ec   : > { %v1205_v9 = vadd.f32 %v1493_v62, %v1181_v4 }
 0x2ee   : > { %v1213_v47 = vpack.c.bf16 %v1205_v9, %v1205_v9 }
 0x2ef   : > { %v1155_v6 = vpop.permute.xlu2 %1154 }
 0x2f0   : > { %1222 = vst.msk [vmem:[%s1972_s10 + $0x10] sm:$0xf] %vm1217_vm3, %v1213_v47  ;;  %v1180_v12 = vmul.f32 %v1155_v6, %v985_v15 }
 0x2f2   : > { %v1204_v37 = vadd.f32 %v1490_v18, %v1180_v12 }
 0x2f4   : > { %v1212_v10 = vpack.c.bf16 %v1204_v37, %v1204_v37 }
 0x2f6   : > { %1221 = vst.msk [vmem:[%s1972_s10 + $0xc] sm:$0xf] %vm1217_vm3, %v1212_v10 }
 0x2f7   : > { %v1145_v60 = vpop.permute.xlu1 %1144  ;;  %v1170_v0 = vpop.permute.xlu2 %1169 }
 0x2f8   : > { %v1178_v1 = vmul.f32 %v1145_v60, %v983_v24  ;;  %v1183_v27 = vmul.f32 %v1170_v0, %v988_v23 }
 0x2fa   : > { %v1202_v54 = vadd.f32 %v1486_v25, %v1178_v1  ;;  %v1207_v56 = vadd.f32 %v1497_v26, %v1183_v27 }
 0x2fc   : > { %v1210_v17 = vpack.c.bf16 %v1202_v54, %v1202_v54  ;;  %v1215_v28 = vpack.c.bf16 %v1207_v56, %v1207_v56 }
 0x2fe   : > { %1219 = vst.msk [vmem:[%s1972_s10 + $0x4] sm:$0xf] %vm1217_vm3, %v1210_v17 }
 0x2ff   : > { %1224 = vst.msk [vmem:[%s1972_s10 + $0x18] sm:$0xf] %vm1217_vm3, %v1215_v28  ;;  %v1175_v63 = vpop.permute.xlu1 %1174 }
 0x300   : > { %v1184_v29 = vmul.f32 %v1175_v63, %v989_v58 }
 0x302   : > { %v1208_v30 = vadd.f32 %v1498_v61, %v1184_v29 }
 0x304   : > { %v1216_v3 = vpack.c.bf16 %v1208_v30, %v1208_v30 }
 0x306   : > { %1225 = vst.msk [vmem:[%s1972_s10 + $0x1c] sm:$0xf] %vm1217_vm3, %v1216_v3 }
 0x307 PF: > { %s14_s19 = sadd.s32 1, %s1643_s19   ;;  %s2017_s15 = smov %s1631_s16 }
 0x308   : > { %p11_p10 = scmp.ge.s32.totalorder %s14_s19, 4   ;;  %s2018_s16 = smov %s1712_s24 }
 0x309   : > { %s2019_s17 = smov %s1639_s18  ;;  %s2020_s18 = smov %s2022_s20 }
 0x30a   :  { %13 = sbr.rel (!%p11_p10) target bundleno = 3 (0x3), region = 221 }

</bundles_post_ra>
